<compile_context>
chip_gen: v5e
topology: v5e:2x2
jax: 0.10.0
libtpu: 0.0.40
codegen_flags: <defaults>
</compile_context>

<pallas_src>
import jax
import jax.numpy as jnp
from jax.experimental import pallas as pl
from jax.experimental.pallas import tpu as pltpu

_GATE_ORDER = (0, 1, 3, 2)   # PyTorch (i, f, g, o) -> packed (i, f, o, g)


def _choose_d_blk(input_size, hidden_dim, lane_cap=128):
    """Largest divisor of input_size with DH = d_blk*hidden_dim <= lane_cap.
    Prefers DH % 128 == 0 (lane-dense gate slices) and n_blk >= 2 (megacore).
    NOTE: if no choice yields DH % 128 == 0 the kernel is still correct, just
    slower (gate slices cross lane-tile boundaries)."""
    divisors = [d for d in range(1, input_size + 1) if input_size % d == 0]
    cands = [d for d in divisors if d * hidden_dim <= lane_cap] or [1]
    dense = [d for d in cands if (d * hidden_dim) % 128 == 0]
    pool = dense or cands
    multi = [d for d in pool if input_size // d >= 2]
    pool = multi or pool
    return max(pool)


def _choose_n_par(n_blk):
    """Independent network-blocks interleaved per grid step (hides the serial
    recurrence latency) while keeping >= 2 grid steps for v7x's two cores."""
    return 2 if (n_blk % 2 == 0 and n_blk >= 4) else 1


def pack_cmfull_params(params, d_blk=None, lane_cap=128, mm_dtype=jnp.bfloat16):
    """One-time repacking of CMFull parameters into gate-grouped, block-diagonal,
    MXU-friendly layouts.  Hoist this out of the per-call forward pass.

    Expected `params` (PyTorch layouts, gate order i,f,g,o, b = b_ih + b_hh):
      Wih0: (D, 4H, D)       layer-0 input weights of every per-target LSTM
      WihL: (D, L-1, 4H, H)  deeper-layer input weights (ignored when L == 1)
      Whh : (D, L, 4H, H)    recurrent weights
      b   : (D, L, 4H)       combined biases
      Wfc : (D, 1, H)        per-target readout applied to the last time step
      bfc : (D, 1)
    """
    f32 = jnp.float32
    D = params["Wih0"].shape[0]
    L = params["Whh"].shape[1]
    H = params["Whh"].shape[2] // 4
    Din = params["Wih0"].shape[2]
    if d_blk is None:
        d_blk = _choose_d_blk(D, H, lane_cap)
    assert D % d_blk == 0
    n_blk = D // d_blk
    DH = d_blk * H
    G = 4 * DH
    eye = jnp.eye(d_blk, dtype=f32)
    go = jnp.array(_GATE_ORDER)

    # layer-0 input weights: (D, 4H, Din) -> (n_blk, Din, G); cols = (gate, net, h)
    w0 = params["Wih0"].astype(f32).reshape(n_blk, d_blk, 4, H, Din)
    w0 = jnp.take(w0, go, axis=2)
    wih0 = w0.transpose(0, 4, 2, 1, 3).reshape(n_blk, Din, G).astype(mm_dtype)

    def block_diag_gates(W, n_l):       # (D, n_l, 4H, H) -> (n_blk, n_l, DH, G)
        r = W.astype(f32).reshape(n_blk, d_blk, n_l, 4, H, H)   # n d l gate out in
        r = jnp.take(r, go, axis=3)
        bd = jnp.einsum('ndlkoi,de->nldikeo', r, eye)   # rows=(d,in) cols=(gate,e,out)
        return bd.reshape(n_blk, n_l, DH, G)

    whh = block_diag_gates(params["Whh"], L).astype(mm_dtype)

    b = params["b"].astype(f32).reshape(n_blk, d_blk, L, 4, H)
    b = jnp.take(b, go, axis=3)
    b = b.transpose(0, 2, 3, 1, 4).reshape(n_blk, L, 1, G)      # f32 (folded into gates)

    # readout stays f32: one tiny matmul at the very end, keep it exact.
    wfc = jnp.einsum('ndj,de->ndje',
                     params["Wfc"].astype(f32).reshape(n_blk, d_blk, H),
                     eye).reshape(n_blk, DH, d_blk)
    bfc = params["bfc"].astype(f32).reshape(n_blk, 1, d_blk)

    packed = {"wih0": wih0, "whh": whh, "b": b, "wfc": wfc, "bfc": bfc}
    if L > 1:
        packed["wihL"] = block_diag_gates(params["WihL"], L - 1).astype(mm_dtype)
    return packed


def _build_kernel(*, T, B, Bp, L, DH, G, n_par, mm_dtype, unroll):
    """One grid step == n_par independent blocks of d_blk batched LSTM networks."""
    n_in = 8 + (1 if L > 1 else 0)

    def kernel(*refs):
        ins, outs, scr = refs[:n_in], refs[n_in:n_in + 3], refs[n_in + 3:]
        x_ref, h0_ref, c0_ref, wih0_ref = ins[:4]
        if L > 1:
            wihL_ref = ins[4]
            whh_ref, b_ref, wfc_ref, bfc_ref = ins[5:9]
        else:
            wihL_ref = None
            whh_ref, b_ref, wfc_ref, bfc_ref = ins[4:8]
        out_ref, hn_ref, cn_ref = outs
        gates_scrs = scr[:n_par]          # n_par x (T*Bp, G)  f32
        seq_scrs = scr[n_par:]            # n_par x (T*Bp, DH) f32 (only when L > 1)

        x_all = x_ref[...]                # (T*Bp, Din), mm_dtype
        h_last = [None] * n_par

        for layer in range(L):            # static unroll over layers
            # ---- (1) whole-sequence input->hidden projection (+bias): a single
            #      flat (T*Bp, K) @ (K, G) MXU matmul per chain, off the serial
            #      critical path. ----
            for c in range(n_par):
                if layer == 0:
                    x_in, w_in = x_all, wih0_ref[c]
                else:
                    x_in = seq_scrs[c][...].astype(mm_dtype)
                    w_in = wihL_ref[c, layer - 1]
                gates_scrs[c][...] = (
                    jnp.dot(x_in, w_in, preferred_element_type=jnp.float32)
                    + b_ref[c, layer])

            # ---- (2) serial recurrence: one bf16 matmul + elementwise per chain
            #      per step; h/c carried in registers. ----
            last_layer = layer == L - 1

            def step(t, carry, layer=layer, last_layer=last_layer):
                row = pl.multiple_of(t * Bp, Bp)       # sublane-tile aligned start
                new = []
                for c in range(n_par):                 # interleaved chains
                    h_prev, c_prev = carry[c]
                    gates = gates_scrs[c][pl.ds(row, B), :] + jnp.dot(
                        h_prev.astype(mm_dtype), whh_ref[c, layer],
                        preferred_element_type=jnp.float32)
                    # packed gate order (i, f, o, g): one sigmoid slab, one tanh
                    sig = jax.nn.sigmoid(gates[:, :3 * DH])
                    i_g = sig[:, 0:DH]
                    f_g = sig[:, DH:2 * DH]
                    o_g = sig[:, 2 * DH:3 * DH]
                    g_g = jnp.tanh(gates[:, 3 * DH:])
                    c_new = f_g * c_prev + i_g * g_g
                    h_new = o_g * jnp.tanh(c_new)
                    if not last_layer:
                        seq_scrs[c][pl.ds(row, B), :] = h_new
                    new.append((h_new, c_new))
                return tuple(new)

            init = tuple((h0_ref[c, layer], c0_ref[c, layer]) for c in range(n_par))
            fin = jax.lax.fori_loop(0, T, step, init, unroll=unroll)
            for c in range(n_par):
                hn_ref[c, layer] = fin[c][0]           # lane-dense (B, DH) writes
                cn_ref[c, layer] = fin[c][1]
                h_last[c] = fin[c][0]

        # ---- (3) per-network readout on the last time step (tiny, f32):
        #      (B, DH) @ block-diag (DH, d_blk) -> (B, d_blk). ----
        for c in range(n_par):
            out = (jnp.dot(h_last[c], wfc_ref[c], preferred_element_type=jnp.float32)
                   + bfc_ref[c])
            out_ref[c] = out.astype(out_ref.dtype)

    return kernel


def cmfull_forward(x, packed, hidden=None, n_par=None, unroll=None):
    """CMFull forward.  x: (B, T, D) float32, `packed` from pack_cmfull_params.
    Returns (out_x (B, D), tuple of D per-network (h_n, c_n) states)."""
    f32 = jnp.float32
    B, T, Din = x.shape
    whh = packed["whh"]
    n_blk, L, DH, G = whh.shape
    d_blk = packed["wfc"].shape[2]
    H = DH // d_blk
    D = n_blk * d_blk
    mm_dtype = whh.dtype

    if n_par is None:
        n_par = _choose_n_par(n_blk)
    assert n_blk % n_par == 0
    n_grid = n_blk // n_par
    if unroll is None:
        unroll = True if (T <= 8 and n_par == 1 and DH <= 128) else min(4, T)

    # ---------- initial hidden state, batched per network-block ----------
    if hidden is None:
        h0 = jnp.zeros((D, L, B, H), f32)
        c0 = jnp.zeros((D, L, B, H), f32)
    else:
        h0 = jnp.stack([h for (h, _) in hidden]).astype(f32)
        c0 = jnp.stack([c for (_, c) in hidden]).astype(f32)

    def batch_state(s):                 # (D, L, B, H) -> (n_blk, L, B, DH)
        return (s.reshape(n_blk, d_blk, L, B, H)
                 .transpose(0, 2, 3, 1, 4)
                 .reshape(n_blk, L, B, DH))

    h0_b, c0_b = batch_state(h0), batch_state(c0)

    # input: time-major, batch zero-padded to a sublane-aligned row count and
    # flattened so the per-layer input projection is ONE (T*Bp, K) matmul and
    # every per-step scratch slice starts on an 8-row tile boundary.
    Bp = ((B + 7) // 8) * 8
    xp = x.astype(mm_dtype)
    if Bp != B:
        xp = jnp.pad(xp, ((0, Bp - B), (0, 0), (0, 0)))
    x2d = jnp.transpose(xp, (1, 0, 2)).reshape(T * Bp, Din)

    kernel = _build_kernel(T=T, B=B, Bp=Bp, L=L, DH=DH, G=G, n_par=n_par,
                           mm_dtype=mm_dtype, unroll=unroll)

    in_specs = [
        pl.BlockSpec((T * Bp, Din), lambda k: (0, 0)),               # x (shared)
        pl.BlockSpec((n_par, L, B, DH), lambda k: (k, 0, 0, 0)),     # h0 (batched)
        pl.BlockSpec((n_par, L, B, DH), lambda k: (k, 0, 0, 0)),     # c0 (batched)
        pl.BlockSpec((n_par, Din, G), lambda k: (k, 0, 0)),          # W_ih layer 0
    ]
    inputs = [x2d, h0_b, c0_b, packed["wih0"]]
    if L > 1:
        in_specs.append(pl.BlockSpec((n_par, L - 1, DH, G), lambda k: (k, 0, 0, 0)))
        inputs.append(packed["wihL"])
    in_specs += [
        pl.BlockSpec((n_par, L, DH, G), lambda k: (k, 0, 0, 0)),     # W_hh (block-diag)
        pl.BlockSpec((n_par, L, 1, G), lambda k: (k, 0, 0, 0)),      # bias
        pl.BlockSpec((n_par, DH, d_blk), lambda k: (k, 0, 0)),       # W_fc (block-diag)
        pl.BlockSpec((n_par, 1, d_blk), lambda k: (k, 0, 0)),        # b_fc
    ]
    inputs += [packed["whh"], packed["b"], packed["wfc"], packed["bfc"]]

    out_specs = [
        pl.BlockSpec((n_par, B, d_blk), lambda k: (k, 0, 0)),        # per-block out
        pl.BlockSpec((n_par, L, B, DH), lambda k: (k, 0, 0, 0)),     # h_n (batched)
        pl.BlockSpec((n_par, L, B, DH), lambda k: (k, 0, 0, 0)),     # c_n (batched)
    ]
    out_shape = [
        jax.ShapeDtypeStruct((n_blk, B, d_blk), f32),
        jax.ShapeDtypeStruct((n_blk, L, B, DH), f32),
        jax.ShapeDtypeStruct((n_blk, L, B, DH), f32),
    ]

    scratch_shapes = [pltpu.VMEM((T * Bp, G), f32) for _ in range(n_par)]
    if L > 1:
        scratch_shapes += [pltpu.VMEM((T * Bp, DH), f32) for _ in range(n_par)]

    # explicit VMEM budget: double-buffered blocks + scratch, capped for v7x (64 MiB)
    mm_b = whh.dtype.itemsize
    blk_bytes = (
        T * Bp * Din * mm_b
        + 4 * n_par * L * B * DH * 4
        + n_par * Din * G * mm_b
        + (L - 1) * n_par * DH * G * mm_b
        + n_par * L * DH * G * mm_b
        + n_par * L * G * 4
        + n_par * DH * d_blk * 4
        + n_par * d_blk * 4
        + n_par * B * d_blk * 4)
    scr_bytes = n_par * T * Bp * G * 4 + (n_par * T * Bp * DH * 4 if L > 1 else 0)
    vmem_limit = int(min(64 * 2 ** 20,
                         max(32 * 2 ** 20, 2 * (2 * blk_bytes + scr_bytes))))

    out_b, hn_b, cn_b = pl.pallas_call(
        kernel,
        grid=(n_grid,),
        in_specs=in_specs,
        out_specs=out_specs,
        out_shape=out_shape,
        scratch_shapes=scratch_shapes,
        compiler_params=pltpu.CompilerParams(
            dimension_semantics=("parallel",),         # megacore sharding on v7x
            vmem_limit_bytes=vmem_limit),
    )(*inputs)

    # ---------- un-batch results back to CMFull's layout ----------
    out_x = out_b.transpose(1, 0, 2).reshape(B, D)     # == torch.cat(dim=1)

    def unbatch_state(s):
        return (s.reshape(n_blk, L, B, d_blk, H)
                 .transpose(0, 3, 1, 2, 4)
                 .reshape(D, L, B, H))

    hn, cn = unbatch_state(hn_b), unbatch_state(cn_b)
    hidden_out = tuple((hn[k], cn[k]) for k in range(D))
    return out_x, hidden_out


def cmfull_reference(x, params, hidden=None):
    """Pure-JAX f32 reference with the same semantics (per-network, unbatched)."""
    B, T, D = x.shape
    L = params["Whh"].shape[1]
    H = params["Whh"].shape[2] // 4
    outs, hns, cns = [], [], []
    for k in range(D):
        if hidden is None:
            h = jnp.zeros((L, B, H), jnp.float32)
            c = jnp.zeros((L, B, H), jnp.float32)
        else:
            h, c = hidden[k]
        seq = x
        h_list, c_list = [], []
        for l in range(L):
            Wih = params["Wih0"][k] if l == 0 else params["WihL"][k, l - 1]
            Whh = params["Whh"][k, l]
            b = params["b"][k, l]
            h_t, c_t = h[l], c[l]
            steps = []
            for t in range(T):
                g = seq[:, t, :] @ Wih.T + h_t @ Whh.T + b
                i = jax.nn.sigmoid(g[:, :H])
                f = jax.nn.sigmoid(g[:, H:2 * H])
                gg = jnp.tanh(g[:, 2 * H:3 * H])
                o = jax.nn.sigmoid(g[:, 3 * H:])
                c_t = f * c_t + i * gg
                h_t = o * jnp.tanh(c_t)
                steps.append(h_t)
            seq = jnp.stack(steps, axis=1)
            h_list.append(h_t)
            c_list.append(c_t)
        out_k = seq[:, -1, :] @ params["Wfc"][k].T + params["bfc"][k]   # (B, 1)
        outs.append(out_k)
        hns.append(jnp.stack(h_list))
        cns.append(jnp.stack(c_list))
    return jnp.concatenate(outs, axis=1), tuple((hns[k], cns[k]) for k in range(D))


if __name__ == "__main__":
    def run_case(D, H, L, B, T, seed):
        key = jax.random.PRNGKey(seed)
        ks = jax.random.split(key, 7)
        bound = float(1.0 / (H ** 0.5))      # PyTorch LSTM default init range

        def u(k, shape):
            return jax.random.uniform(k, shape, jnp.float32, -bound, bound)

        params = {
            "Wih0": u(ks[0], (D, 4 * H, D)),
            "WihL": u(ks[1], (D, max(L - 1, 1), 4 * H, H)),
            "Whh":  u(ks[2], (D, L, 4 * H, H)),
            "b":    u(ks[3], (D, L, 4 * H)),
            "Wfc":  u(ks[4], (D, 1, H)),
            "bfc":  u(ks[5], (D, 1)),
        }
        x = jax.random.normal(ks[6], (B, T, D), jnp.float32)

        # The kernel runs its matmuls in bf16 (MXU-native).  Validate against an
        # f32 reference evaluated at the same bf16-rounded weights/inputs so the
        # check isolates kernel correctness from weight-quantization error.
        params_q = {k: v.astype(jnp.bfloat16).astype(jnp.float32)
                    for k, v in params.items()}
        x_q = x.astype(jnp.bfloat16).astype(jnp.float32)

        packed = pack_cmfull_params(params_q)        # hoisted one-time packing
        fwd = jax.jit(cmfull_forward)
        out_x, hidden = fwd(x_q, packed)
        out_x = jax.block_until_ready(out_x)

        ref_out, ref_hidden = cmfull_reference(x_q, params_q)
        assert out_x.shape == (B, D)
        assert jnp.allclose(out_x, ref_out, atol=2e-2, rtol=2e-2), \
            f"out_x mismatch (D={D}, L={L})"
        for k in range(D):
            assert hidden[k][0].shape == (L, B, H)
            assert jnp.allclose(hidden[k][0], ref_hidden[k][0], atol=2e-2, rtol=2e-2)
            assert jnp.allclose(hidden[k][1], ref_hidden[k][1], atol=2e-2, rtol=2e-2)

    run_case(D=4,  H=32, L=2, B=2, T=8, seed=0)   # demo config (n_blk=1)
    run_case(D=16, H=32, L=2, B=2, T=8, seed=1)   # n_blk=4, two chains/step, grid=2
    run_case(D=4,  H=32, L=1, B=2, T=8, seed=2)   # single-layer path (no seq scratch)
    print("KERNEL_OK")
</pallas_src>

<mosaic_0001>
module attributes {stable_mosaic.version = 11 : i64} {
  func.func @kernel(%arg0: i32, %arg1: memref<64x4xbf16, #tpu.memory_space<vmem>>, %arg2: memref<1x2x2x128xf32, #tpu.memory_space<vmem>>, %arg3: memref<1x2x2x128xf32, #tpu.memory_space<vmem>>, %arg4: memref<1x4x512xbf16, #tpu.memory_space<vmem>>, %arg5: memref<1x1x128x512xbf16, #tpu.memory_space<vmem>>, %arg6: memref<1x2x128x512xbf16, #tpu.memory_space<vmem>>, %arg7: memref<1x2x1x512xf32, #tpu.memory_space<vmem>>, %arg8: memref<1x128x4xf32, #tpu.memory_space<vmem>>, %arg9: memref<1x1x4xf32, #tpu.memory_space<vmem>>, %arg10: memref<1x2x4xf32, #tpu.memory_space<vmem>>, %arg11: memref<1x2x2x128xf32, #tpu.memory_space<vmem>>, %arg12: memref<1x2x2x128xf32, #tpu.memory_space<vmem>>, %arg13: memref<64x512xf32, #tpu.memory_space<vmem>>, %arg14: memref<64x128xf32, #tpu.memory_space<vmem>>) attributes {dimension_semantics = [#tpu.dimension_semantics<parallel>], iteration_bounds = array<i64: 1>, scalar_prefetch = 0 : i64, scratch_operands = 2 : i64, tpu.core_type = #tpu.core_type<tc>, window_params = [{pipeline_mode = #tpu.pipeline_mode<synchronous>, transform_indices = @transform_0, window_bounds = array<i64: 64, 4>}, {transform_indices = @transform_1, window_bounds = array<i64: 1, 2, 2, 128>}, {transform_indices = @transform_2, window_bounds = array<i64: 1, 2, 2, 128>}, {transform_indices = @transform_3, window_bounds = array<i64: 1, 4, 512>}, {transform_indices = @transform_4, window_bounds = array<i64: 1, 1, 128, 512>}, {transform_indices = @transform_5, window_bounds = array<i64: 1, 2, 128, 512>}, {transform_indices = @transform_6, window_bounds = array<i64: 1, 2, 1, 512>}, {transform_indices = @transform_7, window_bounds = array<i64: 1, 128, 4>}, {transform_indices = @transform_8, window_bounds = array<i64: 1, 1, 4>}, {transform_indices = @transform_9, window_bounds = array<i64: 1, 2, 4>}, {transform_indices = @transform_10, window_bounds = array<i64: 1, 2, 2, 128>}, {transform_indices = @transform_11, window_bounds = array<i64: 1, 2, 2, 128>}]} {
    %c0 = arith.constant 0 : index
    %c0_0 = arith.constant 0 : index
    %0 = vector.load %arg1[%c0, %c0_0] : memref<64x4xbf16, #tpu.memory_space<vmem>>, vector<64x4xbf16>
    %c0_1 = arith.constant 0 : index
    %c0_2 = arith.constant 0 : index
    %c0_3 = arith.constant 0 : index
    %1 = vector.load %arg4[%c0_1, %c0_2, %c0_3] : memref<1x4x512xbf16, #tpu.memory_space<vmem>>, vector<1x4x512xbf16>
    %2 = vector.shape_cast %1 : vector<1x4x512xbf16> to vector<4x512xbf16>
    %cst = arith.constant dense<0.000000e+00> : vector<64x512xf32>
    %3 = tpu.matmul %0, %2, %cst {dimension_numbers = #tpu.dot_dimension_numbers<[1], [0], [0], [1], [0, 0, 1, 1], [], []>} : vector<64x4xbf16>, vector<4x512xbf16>, vector<64x512xf32> -> vector<64x512xf32>
    %c0_4 = arith.constant 0 : index
    %c0_5 = arith.constant 0 : index
    %c0_6 = arith.constant 0 : index
    %c0_7 = arith.constant 0 : index
    %4 = vector.load %arg7[%c0_4, %c0_5, %c0_6, %c0_7] : memref<1x2x1x512xf32, #tpu.memory_space<vmem>>, vector<1x1x1x512xf32>
    %5 = vector.shape_cast %4 : vector<1x1x1x512xf32> to vector<1x512xf32>
    %6 = vector.broadcast %5 : vector<1x512xf32> to vector<64x512xf32>
    %7 = arith.addf %3, %6 : vector<64x512xf32>
    %c0_8 = arith.constant 0 : index
    %c0_9 = arith.constant 0 : index
    %8 = vector.load %arg13[%c0_8, %c0_9] : memref<64x512xf32, #tpu.memory_space<vmem>>, vector<64x512xf32>
    tpu.vector_store %arg13[%c0_8, %c0_9], %7 {strides = array<i32>} : memref<64x512xf32, #tpu.memory_space<vmem>>, vector<64x512xf32>,
    %c0_10 = arith.constant 0 : index
    %c0_11 = arith.constant 0 : index
    %c0_12 = arith.constant 0 : index
    %c0_13 = arith.constant 0 : index
    %9 = vector.load %arg2[%c0_10, %c0_11, %c0_12, %c0_13] : memref<1x2x2x128xf32, #tpu.memory_space<vmem>>, vector<1x1x2x128xf32>
    %10 = vector.shape_cast %9 : vector<1x1x2x128xf32> to vector<2x128xf32>
    %c0_14 = arith.constant 0 : index
    %c0_15 = arith.constant 0 : index
    %c0_16 = arith.constant 0 : index
    %c0_17 = arith.constant 0 : index
    %11 = vector.load %arg3[%c0_14, %c0_15, %c0_16, %c0_17] : memref<1x2x2x128xf32, #tpu.memory_space<vmem>>, vector<1x1x2x128xf32>
    %12 = vector.shape_cast %11 : vector<1x1x2x128xf32> to vector<2x128xf32>
    %c0_i32 = arith.constant 0 : i32
    %c8_i32 = arith.constant 8 : i32
    %13 = arith.muli %c0_i32, %c8_i32 : i32
    %14 = tpu.assume_multiple %13, 8 : i32
    %15 = arith.index_cast %14 : i32 to index
    %c0_18 = arith.constant 0 : index
    %16 = vector.load %arg13[%15, %c0_18] : memref<64x512xf32, #tpu.memory_space<vmem>>, vector<2x512xf32>
    %17 = arith.truncf %10 : vector<2x128xf32> to vector<2x128xbf16>
    %c0_19 = arith.constant 0 : index
    %c0_20 = arith.constant 0 : index
    %c0_21 = arith.constant 0 : index
    %c0_22 = arith.constant 0 : index
    %18 = vector.load %arg6[%c0_19, %c0_20, %c0_21, %c0_22] : memref<1x2x128x512xbf16, #tpu.memory_space<vmem>>, vector<1x1x128x512xbf16>
    %19 = vector.shape_cast %18 : vector<1x1x128x512xbf16> to vector<128x512xbf16>
    %cst_23 = arith.constant dense<0.000000e+00> : vector<2x512xf32>
    %20 = tpu.matmul %17, %19, %cst_23 {dimension_numbers = #tpu.dot_dimension_numbers<[1], [0], [0], [1], [0, 0, 1, 1], [], []>} : vector<2x128xbf16>, vector<128x512xbf16>, vector<2x512xf32> -> vector<2x512xf32>
    %21 = arith.addf %16, %20 : vector<2x512xf32>
    %22 = vector.extract_strided_slice %21 {offsets = [0, 0], sizes = [2, 384], strides = [1, 1]} : vector<2x512xf32> to vector<2x384xf32>
    %23 = arith.negf %22 : vector<2x384xf32>
    %24 = math.exp %23 : vector<2x384xf32>
    %cst_24 = arith.constant 1.000000e+00 : f32
    %25 = vector.broadcast %cst_24 : f32 to vector<2x384xf32>
    %26 = arith.addf %25, %24 : vector<2x384xf32>
    %27 = arith.divf %25, %26 : vector<2x384xf32>
    %28 = vector.extract_strided_slice %27 {offsets = [0, 0], sizes = [2, 128], strides = [1, 1]} : vector<2x384xf32> to vector<2x128xf32>
    %29 = vector.extract_strided_slice %27 {offsets = [0, 128], sizes = [2, 128], strides = [1, 1]} : vector<2x384xf32> to vector<2x128xf32>
    %30 = vector.extract_strided_slice %27 {offsets = [0, 256], sizes = [2, 128], strides = [1, 1]} : vector<2x384xf32> to vector<2x128xf32>
    %31 = vector.extract_strided_slice %21 {offsets = [0, 384], sizes = [2, 128], strides = [1, 1]} : vector<2x512xf32> to vector<2x128xf32>
    %32 = math.tanh %31 : vector<2x128xf32>
    %33 = arith.mulf %29, %12 : vector<2x128xf32>
    %34 = arith.mulf %28, %32 : vector<2x128xf32>
    %35 = arith.addf %33, %34 : vector<2x128xf32>
    %36 = math.tanh %35 : vector<2x128xf32>
    %37 = arith.mulf %30, %36 : vector<2x128xf32>
    %38 = arith.index_cast %14 : i32 to index
    %c0_25 = arith.constant 0 : index
    %39 = vector.load %arg14[%38, %c0_25] : memref<64x128xf32, #tpu.memory_space<vmem>>, vector<2x128xf32>
    tpu.vector_store %arg14[%38, %c0_25], %37 {strides = array<i32>} : memref<64x128xf32, #tpu.memory_space<vmem>>, vector<2x128xf32>,
    %c1_i32 = arith.constant 1 : i32
    %c8_i32_26 = arith.constant 8 : i32
    %40 = arith.muli %c1_i32, %c8_i32_26 : i32
    %41 = tpu.assume_multiple %40, 8 : i32
    %42 = arith.index_cast %41 : i32 to index
    %c0_27 = arith.constant 0 : index
    %43 = vector.load %arg13[%42, %c0_27] : memref<64x512xf32, #tpu.memory_space<vmem>>, vector<2x512xf32>
    %44 = arith.truncf %37 : vector<2x128xf32> to vector<2x128xbf16>
    %c0_28 = arith.constant 0 : index
    %c0_29 = arith.constant 0 : index
    %c0_30 = arith.constant 0 : index
    %c0_31 = arith.constant 0 : index
    %45 = vector.load %arg6[%c0_28, %c0_29, %c0_30, %c0_31] : memref<1x2x128x512xbf16, #tpu.memory_space<vmem>>, vector<1x1x128x512xbf16>
    %46 = vector.shape_cast %45 : vector<1x1x128x512xbf16> to vector<128x512xbf16>
    %cst_32 = arith.constant dense<0.000000e+00> : vector<2x512xf32>
    %47 = tpu.matmul %44, %46, %cst_32 {dimension_numbers = #tpu.dot_dimension_numbers<[1], [0], [0], [1], [0, 0, 1, 1], [], []>} : vector<2x128xbf16>, vector<128x512xbf16>, vector<2x512xf32> -> vector<2x512xf32>
    %48 = arith.addf %43, %47 : vector<2x512xf32>
    %49 = vector.extract_strided_slice %48 {offsets = [0, 0], sizes = [2, 384], strides = [1, 1]} : vector<2x512xf32> to vector<2x384xf32>
    %50 = arith.negf %49 : vector<2x384xf32>
    %51 = math.exp %50 : vector<2x384xf32>
    %cst_33 = arith.constant 1.000000e+00 : f32
    %52 = vector.broadcast %cst_33 : f32 to vector<2x384xf32>
    %53 = arith.addf %52, %51 : vector<2x384xf32>
    %54 = arith.divf %52, %53 : vector<2x384xf32>
    %55 = vector.extract_strided_slice %54 {offsets = [0, 0], sizes = [2, 128], strides = [1, 1]} : vector<2x384xf32> to vector<2x128xf32>
    %56 = vector.extract_strided_slice %54 {offsets = [0, 128], sizes = [2, 128], strides = [1, 1]} : vector<2x384xf32> to vector<2x128xf32>
    %57 = vector.extract_strided_slice %54 {offsets = [0, 256], sizes = [2, 128], strides = [1, 1]} : vector<2x384xf32> to vector<2x128xf32>
    %58 = vector.extract_strided_slice %48 {offsets = [0, 384], sizes = [2, 128], strides = [1, 1]} : vector<2x512xf32> to vector<2x128xf32>
    %59 = math.tanh %58 : vector<2x128xf32>
    %60 = arith.mulf %56, %35 : vector<2x128xf32>
    %61 = arith.mulf %55, %59 : vector<2x128xf32>
    %62 = arith.addf %60, %61 : vector<2x128xf32>
    %63 = math.tanh %62 : vector<2x128xf32>
    %64 = arith.mulf %57, %63 : vector<2x128xf32>
    %65 = arith.index_cast %41 : i32 to index
    %c0_34 = arith.constant 0 : index
    %66 = vector.load %arg14[%65, %c0_34] : memref<64x128xf32, #tpu.memory_space<vmem>>, vector<2x128xf32>
    tpu.vector_store %arg14[%65, %c0_34], %64 {strides = array<i32>} : memref<64x128xf32, #tpu.memory_space<vmem>>, vector<2x128xf32>,
    %c2_i32 = arith.constant 2 : i32
    %c8_i32_35 = arith.constant 8 : i32
    %67 = arith.muli %c2_i32, %c8_i32_35 : i32
    %68 = tpu.assume_multiple %67, 8 : i32
    %69 = arith.index_cast %68 : i32 to index
    %c0_36 = arith.constant 0 : index
    %70 = vector.load %arg13[%69, %c0_36] : memref<64x512xf32, #tpu.memory_space<vmem>>, vector<2x512xf32>
    %71 = arith.truncf %64 : vector<2x128xf32> to vector<2x128xbf16>
    %c0_37 = arith.constant 0 : index
    %c0_38 = arith.constant 0 : index
    %c0_39 = arith.constant 0 : index
    %c0_40 = arith.constant 0 : index
    %72 = vector.load %arg6[%c0_37, %c0_38, %c0_39, %c0_40] : memref<1x2x128x512xbf16, #tpu.memory_space<vmem>>, vector<1x1x128x512xbf16>
    %73 = vector.shape_cast %72 : vector<1x1x128x512xbf16> to vector<128x512xbf16>
    %cst_41 = arith.constant dense<0.000000e+00> : vector<2x512xf32>
    %74 = tpu.matmul %71, %73, %cst_41 {dimension_numbers = #tpu.dot_dimension_numbers<[1], [0], [0], [1], [0, 0, 1, 1], [], []>} : vector<2x128xbf16>, vector<128x512xbf16>, vector<2x512xf32> -> vector<2x512xf32>
    %75 = arith.addf %70, %74 : vector<2x512xf32>
    %76 = vector.extract_strided_slice %75 {offsets = [0, 0], sizes = [2, 384], strides = [1, 1]} : vector<2x512xf32> to vector<2x384xf32>
    %77 = arith.negf %76 : vector<2x384xf32>
    %78 = math.exp %77 : vector<2x384xf32>
    %cst_42 = arith.constant 1.000000e+00 : f32
    %79 = vector.broadcast %cst_42 : f32 to vector<2x384xf32>
    %80 = arith.addf %79, %78 : vector<2x384xf32>
    %81 = arith.divf %79, %80 : vector<2x384xf32>
    %82 = vector.extract_strided_slice %81 {offsets = [0, 0], sizes = [2, 128], strides = [1, 1]} : vector<2x384xf32> to vector<2x128xf32>
    %83 = vector.extract_strided_slice %81 {offsets = [0, 128], sizes = [2, 128], strides = [1, 1]} : vector<2x384xf32> to vector<2x128xf32>
    %84 = vector.extract_strided_slice %81 {offsets = [0, 256], sizes = [2, 128], strides = [1, 1]} : vector<2x384xf32> to vector<2x128xf32>
    %85 = vector.extract_strided_slice %75 {offsets = [0, 384], sizes = [2, 128], strides = [1, 1]} : vector<2x512xf32> to vector<2x128xf32>
    %86 = math.tanh %85 : vector<2x128xf32>
    %87 = arith.mulf %83, %62 : vector<2x128xf32>
    %88 = arith.mulf %82, %86 : vector<2x128xf32>
    %89 = arith.addf %87, %88 : vector<2x128xf32>
    %90 = math.tanh %89 : vector<2x128xf32>
    %91 = arith.mulf %84, %90 : vector<2x128xf32>
    %92 = arith.index_cast %68 : i32 to index
    %c0_43 = arith.constant 0 : index
    %93 = vector.load %arg14[%92, %c0_43] : memref<64x128xf32, #tpu.memory_space<vmem>>, vector<2x128xf32>
    tpu.vector_store %arg14[%92, %c0_43], %91 {strides = array<i32>} : memref<64x128xf32, #tpu.memory_space<vmem>>, vector<2x128xf32>,
    %c3_i32 = arith.constant 3 : i32
    %c8_i32_44 = arith.constant 8 : i32
    %94 = arith.muli %c3_i32, %c8_i32_44 : i32
    %95 = tpu.assume_multiple %94, 8 : i32
    %96 = arith.index_cast %95 : i32 to index
    %c0_45 = arith.constant 0 : index
    %97 = vector.load %arg13[%96, %c0_45] : memref<64x512xf32, #tpu.memory_space<vmem>>, vector<2x512xf32>
    %98 = arith.truncf %91 : vector<2x128xf32> to vector<2x128xbf16>
    %c0_46 = arith.constant 0 : index
    %c0_47 = arith.constant 0 : index
    %c0_48 = arith.constant 0 : index
    %c0_49 = arith.constant 0 : index
    %99 = vector.load %arg6[%c0_46, %c0_47, %c0_48, %c0_49] : memref<1x2x128x512xbf16, #tpu.memory_space<vmem>>, vector<1x1x128x512xbf16>
    %100 = vector.shape_cast %99 : vector<1x1x128x512xbf16> to vector<128x512xbf16>
    %cst_50 = arith.constant dense<0.000000e+00> : vector<2x512xf32>
    %101 = tpu.matmul %98, %100, %cst_50 {dimension_numbers = #tpu.dot_dimension_numbers<[1], [0], [0], [1], [0, 0, 1, 1], [], []>} : vector<2x128xbf16>, vector<128x512xbf16>, vector<2x512xf32> -> vector<2x512xf32>
    %102 = arith.addf %97, %101 : vector<2x512xf32>
    %103 = vector.extract_strided_slice %102 {offsets = [0, 0], sizes = [2, 384], strides = [1, 1]} : vector<2x512xf32> to vector<2x384xf32>
    %104 = arith.negf %103 : vector<2x384xf32>
    %105 = math.exp %104 : vector<2x384xf32>
    %cst_51 = arith.constant 1.000000e+00 : f32
    %106 = vector.broadcast %cst_51 : f32 to vector<2x384xf32>
    %107 = arith.addf %106, %105 : vector<2x384xf32>
    %108 = arith.divf %106, %107 : vector<2x384xf32>
    %109 = vector.extract_strided_slice %108 {offsets = [0, 0], sizes = [2, 128], strides = [1, 1]} : vector<2x384xf32> to vector<2x128xf32>
    %110 = vector.extract_strided_slice %108 {offsets = [0, 128], sizes = [2, 128], strides = [1, 1]} : vector<2x384xf32> to vector<2x128xf32>
    %111 = vector.extract_strided_slice %108 {offsets = [0, 256], sizes = [2, 128], strides = [1, 1]} : vector<2x384xf32> to vector<2x128xf32>
    %112 = vector.extract_strided_slice %102 {offsets = [0, 384], sizes = [2, 128], strides = [1, 1]} : vector<2x512xf32> to vector<2x128xf32>
    %113 = math.tanh %112 : vector<2x128xf32>
    %114 = arith.mulf %110, %89 : vector<2x128xf32>
    %115 = arith.mulf %109, %113 : vector<2x128xf32>
    %116 = arith.addf %114, %115 : vector<2x128xf32>
    %117 = math.tanh %116 : vector<2x128xf32>
    %118 = arith.mulf %111, %117 : vector<2x128xf32>
    %119 = arith.index_cast %95 : i32 to index
    %c0_52 = arith.constant 0 : index
    %120 = vector.load %arg14[%119, %c0_52] : memref<64x128xf32, #tpu.memory_space<vmem>>, vector<2x128xf32>
    tpu.vector_store %arg14[%119, %c0_52], %118 {strides = array<i32>} : memref<64x128xf32, #tpu.memory_space<vmem>>, vector<2x128xf32>,
    %c4_i32 = arith.constant 4 : i32
    %c8_i32_53 = arith.constant 8 : i32
    %121 = arith.muli %c4_i32, %c8_i32_53 : i32
    %122 = tpu.assume_multiple %121, 8 : i32
    %123 = arith.index_cast %122 : i32 to index
    %c0_54 = arith.constant 0 : index
    %124 = vector.load %arg13[%123, %c0_54] : memref<64x512xf32, #tpu.memory_space<vmem>>, vector<2x512xf32>
    %125 = arith.truncf %118 : vector<2x128xf32> to vector<2x128xbf16>
    %c0_55 = arith.constant 0 : index
    %c0_56 = arith.constant 0 : index
    %c0_57 = arith.constant 0 : index
    %c0_58 = arith.constant 0 : index
    %126 = vector.load %arg6[%c0_55, %c0_56, %c0_57, %c0_58] : memref<1x2x128x512xbf16, #tpu.memory_space<vmem>>, vector<1x1x128x512xbf16>
    %127 = vector.shape_cast %126 : vector<1x1x128x512xbf16> to vector<128x512xbf16>
    %cst_59 = arith.constant dense<0.000000e+00> : vector<2x512xf32>
    %128 = tpu.matmul %125, %127, %cst_59 {dimension_numbers = #tpu.dot_dimension_numbers<[1], [0], [0], [1], [0, 0, 1, 1], [], []>} : vector<2x128xbf16>, vector<128x512xbf16>, vector<2x512xf32> -> vector<2x512xf32>
    %129 = arith.addf %124, %128 : vector<2x512xf32>
    %130 = vector.extract_strided_slice %129 {offsets = [0, 0], sizes = [2, 384], strides = [1, 1]} : vector<2x512xf32> to vector<2x384xf32>
    %131 = arith.negf %130 : vector<2x384xf32>
    %132 = math.exp %131 : vector<2x384xf32>
    %cst_60 = arith.constant 1.000000e+00 : f32
    %133 = vector.broadcast %cst_60 : f32 to vector<2x384xf32>
    %134 = arith.addf %133, %132 : vector<2x384xf32>
    %135 = arith.divf %133, %134 : vector<2x384xf32>
    %136 = vector.extract_strided_slice %135 {offsets = [0, 0], sizes = [2, 128], strides = [1, 1]} : vector<2x384xf32> to vector<2x128xf32>
    %137 = vector.extract_strided_slice %135 {offsets = [0, 128], sizes = [2, 128], strides = [1, 1]} : vector<2x384xf32> to vector<2x128xf32>
    %138 = vector.extract_strided_slice %135 {offsets = [0, 256], sizes = [2, 128], strides = [1, 1]} : vector<2x384xf32> to vector<2x128xf32>
    %139 = vector.extract_strided_slice %129 {offsets = [0, 384], sizes = [2, 128], strides = [1, 1]} : vector<2x512xf32> to vector<2x128xf32>
    %140 = math.tanh %139 : vector<2x128xf32>
    %141 = arith.mulf %137, %116 : vector<2x128xf32>
    %142 = arith.mulf %136, %140 : vector<2x128xf32>
    %143 = arith.addf %141, %142 : vector<2x128xf32>
    %144 = math.tanh %143 : vector<2x128xf32>
    %145 = arith.mulf %138, %144 : vector<2x128xf32>
    %146 = arith.index_cast %122 : i32 to index
    %c0_61 = arith.constant 0 : index
    %147 = vector.load %arg14[%146, %c0_61] : memref<64x128xf32, #tpu.memory_space<vmem>>, vector<2x128xf32>
    tpu.vector_store %arg14[%146, %c0_61], %145 {strides = array<i32>} : memref<64x128xf32, #tpu.memory_space<vmem>>, vector<2x128xf32>,
    %c5_i32 = arith.constant 5 : i32
    %c8_i32_62 = arith.constant 8 : i32
    %148 = arith.muli %c5_i32, %c8_i32_62 : i32
    %149 = tpu.assume_multiple %148, 8 : i32
    %150 = arith.index_cast %149 : i32 to index
    %c0_63 = arith.constant 0 : index
    %151 = vector.load %arg13[%150, %c0_63] : memref<64x512xf32, #tpu.memory_space<vmem>>, vector<2x512xf32>
    %152 = arith.truncf %145 : vector<2x128xf32> to vector<2x128xbf16>
    %c0_64 = arith.constant 0 : index
    %c0_65 = arith.constant 0 : index
    %c0_66 = arith.constant 0 : index
    %c0_67 = arith.constant 0 : index
    %153 = vector.load %arg6[%c0_64, %c0_65, %c0_66, %c0_67] : memref<1x2x128x512xbf16, #tpu.memory_space<vmem>>, vector<1x1x128x512xbf16>
    %154 = vector.shape_cast %153 : vector<1x1x128x512xbf16> to vector<128x512xbf16>
    %cst_68 = arith.constant dense<0.000000e+00> : vector<2x512xf32>
    %155 = tpu.matmul %152, %154, %cst_68 {dimension_numbers = #tpu.dot_dimension_numbers<[1], [0], [0], [1], [0, 0, 1, 1], [], []>} : vector<2x128xbf16>, vector<128x512xbf16>, vector<2x512xf32> -> vector<2x512xf32>
    %156 = arith.addf %151, %155 : vector<2x512xf32>
    %157 = vector.extract_strided_slice %156 {offsets = [0, 0], sizes = [2, 384], strides = [1, 1]} : vector<2x512xf32> to vector<2x384xf32>
    %158 = arith.negf %157 : vector<2x384xf32>
    %159 = math.exp %158 : vector<2x384xf32>
    %cst_69 = arith.constant 1.000000e+00 : f32
    %160 = vector.broadcast %cst_69 : f32 to vector<2x384xf32>
    %161 = arith.addf %160, %159 : vector<2x384xf32>
    %162 = arith.divf %160, %161 : vector<2x384xf32>
    %163 = vector.extract_strided_slice %162 {offsets = [0, 0], sizes = [2, 128], strides = [1, 1]} : vector<2x384xf32> to vector<2x128xf32>
    %164 = vector.extract_strided_slice %162 {offsets = [0, 128], sizes = [2, 128], strides = [1, 1]} : vector<2x384xf32> to vector<2x128xf32>
    %165 = vector.extract_strided_slice %162 {offsets = [0, 256], sizes = [2, 128], strides = [1, 1]} : vector<2x384xf32> to vector<2x128xf32>
    %166 = vector.extract_strided_slice %156 {offsets = [0, 384], sizes = [2, 128], strides = [1, 1]} : vector<2x512xf32> to vector<2x128xf32>
    %167 = math.tanh %166 : vector<2x128xf32>
    %168 = arith.mulf %164, %143 : vector<2x128xf32>
    %169 = arith.mulf %163, %167 : vector<2x128xf32>
    %170 = arith.addf %168, %169 : vector<2x128xf32>
    %171 = math.tanh %170 : vector<2x128xf32>
    %172 = arith.mulf %165, %171 : vector<2x128xf32>
    %173 = arith.index_cast %149 : i32 to index
    %c0_70 = arith.constant 0 : index
    %174 = vector.load %arg14[%173, %c0_70] : memref<64x128xf32, #tpu.memory_space<vmem>>, vector<2x128xf32>
    tpu.vector_store %arg14[%173, %c0_70], %172 {strides = array<i32>} : memref<64x128xf32, #tpu.memory_space<vmem>>, vector<2x128xf32>,
    %c6_i32 = arith.constant 6 : i32
    %c8_i32_71 = arith.constant 8 : i32
    %175 = arith.muli %c6_i32, %c8_i32_71 : i32
    %176 = tpu.assume_multiple %175, 8 : i32
    %177 = arith.index_cast %176 : i32 to index
    %c0_72 = arith.constant 0 : index
    %178 = vector.load %arg13[%177, %c0_72] : memref<64x512xf32, #tpu.memory_space<vmem>>, vector<2x512xf32>
    %179 = arith.truncf %172 : vector<2x128xf32> to vector<2x128xbf16>
    %c0_73 = arith.constant 0 : index
    %c0_74 = arith.constant 0 : index
    %c0_75 = arith.constant 0 : index
    %c0_76 = arith.constant 0 : index
    %180 = vector.load %arg6[%c0_73, %c0_74, %c0_75, %c0_76] : memref<1x2x128x512xbf16, #tpu.memory_space<vmem>>, vector<1x1x128x512xbf16>
    %181 = vector.shape_cast %180 : vector<1x1x128x512xbf16> to vector<128x512xbf16>
    %cst_77 = arith.constant dense<0.000000e+00> : vector<2x512xf32>
    %182 = tpu.matmul %179, %181, %cst_77 {dimension_numbers = #tpu.dot_dimension_numbers<[1], [0], [0], [1], [0, 0, 1, 1], [], []>} : vector<2x128xbf16>, vector<128x512xbf16>, vector<2x512xf32> -> vector<2x512xf32>
    %183 = arith.addf %178, %182 : vector<2x512xf32>
    %184 = vector.extract_strided_slice %183 {offsets = [0, 0], sizes = [2, 384], strides = [1, 1]} : vector<2x512xf32> to vector<2x384xf32>
    %185 = arith.negf %184 : vector<2x384xf32>
    %186 = math.exp %185 : vector<2x384xf32>
    %cst_78 = arith.constant 1.000000e+00 : f32
    %187 = vector.broadcast %cst_78 : f32 to vector<2x384xf32>
    %188 = arith.addf %187, %186 : vector<2x384xf32>
    %189 = arith.divf %187, %188 : vector<2x384xf32>
    %190 = vector.extract_strided_slice %189 {offsets = [0, 0], sizes = [2, 128], strides = [1, 1]} : vector<2x384xf32> to vector<2x128xf32>
    %191 = vector.extract_strided_slice %189 {offsets = [0, 128], sizes = [2, 128], strides = [1, 1]} : vector<2x384xf32> to vector<2x128xf32>
    %192 = vector.extract_strided_slice %189 {offsets = [0, 256], sizes = [2, 128], strides = [1, 1]} : vector<2x384xf32> to vector<2x128xf32>
    %193 = vector.extract_strided_slice %183 {offsets = [0, 384], sizes = [2, 128], strides = [1, 1]} : vector<2x512xf32> to vector<2x128xf32>
    %194 = math.tanh %193 : vector<2x128xf32>
    %195 = arith.mulf %191, %170 : vector<2x128xf32>
    %196 = arith.mulf %190, %194 : vector<2x128xf32>
    %197 = arith.addf %195, %196 : vector<2x128xf32>
    %198 = math.tanh %197 : vector<2x128xf32>
    %199 = arith.mulf %192, %198 : vector<2x128xf32>
    %200 = arith.index_cast %176 : i32 to index
    %c0_79 = arith.constant 0 : index
    %201 = vector.load %arg14[%200, %c0_79] : memref<64x128xf32, #tpu.memory_space<vmem>>, vector<2x128xf32>
    tpu.vector_store %arg14[%200, %c0_79], %199 {strides = array<i32>} : memref<64x128xf32, #tpu.memory_space<vmem>>, vector<2x128xf32>,
    %c7_i32 = arith.constant 7 : i32
    %c8_i32_80 = arith.constant 8 : i32
    %202 = arith.muli %c7_i32, %c8_i32_80 : i32
    %203 = tpu.assume_multiple %202, 8 : i32
    %204 = arith.index_cast %203 : i32 to index
    %c0_81 = arith.constant 0 : index
    %205 = vector.load %arg13[%204, %c0_81] : memref<64x512xf32, #tpu.memory_space<vmem>>, vector<2x512xf32>
    %206 = arith.truncf %199 : vector<2x128xf32> to vector<2x128xbf16>
    %c0_82 = arith.constant 0 : index
    %c0_83 = arith.constant 0 : index
    %c0_84 = arith.constant 0 : index
    %c0_85 = arith.constant 0 : index
    %207 = vector.load %arg6[%c0_82, %c0_83, %c0_84, %c0_85] : memref<1x2x128x512xbf16, #tpu.memory_space<vmem>>, vector<1x1x128x512xbf16>
    %208 = vector.shape_cast %207 : vector<1x1x128x512xbf16> to vector<128x512xbf16>
    %cst_86 = arith.constant dense<0.000000e+00> : vector<2x512xf32>
    %209 = tpu.matmul %206, %208, %cst_86 {dimension_numbers = #tpu.dot_dimension_numbers<[1], [0], [0], [1], [0, 0, 1, 1], [], []>} : vector<2x128xbf16>, vector<128x512xbf16>, vector<2x512xf32> -> vector<2x512xf32>
    %210 = arith.addf %205, %209 : vector<2x512xf32>
    %211 = vector.extract_strided_slice %210 {offsets = [0, 0], sizes = [2, 384], strides = [1, 1]} : vector<2x512xf32> to vector<2x384xf32>
    %212 = arith.negf %211 : vector<2x384xf32>
    %213 = math.exp %212 : vector<2x384xf32>
    %cst_87 = arith.constant 1.000000e+00 : f32
    %214 = vector.broadcast %cst_87 : f32 to vector<2x384xf32>
    %215 = arith.addf %214, %213 : vector<2x384xf32>
    %216 = arith.divf %214, %215 : vector<2x384xf32>
    %217 = vector.extract_strided_slice %216 {offsets = [0, 0], sizes = [2, 128], strides = [1, 1]} : vector<2x384xf32> to vector<2x128xf32>
    %218 = vector.extract_strided_slice %216 {offsets = [0, 128], sizes = [2, 128], strides = [1, 1]} : vector<2x384xf32> to vector<2x128xf32>
    %219 = vector.extract_strided_slice %216 {offsets = [0, 256], sizes = [2, 128], strides = [1, 1]} : vector<2x384xf32> to vector<2x128xf32>
    %220 = vector.extract_strided_slice %210 {offsets = [0, 384], sizes = [2, 128], strides = [1, 1]} : vector<2x512xf32> to vector<2x128xf32>
    %221 = math.tanh %220 : vector<2x128xf32>
    %222 = arith.mulf %218, %197 : vector<2x128xf32>
    %223 = arith.mulf %217, %221 : vector<2x128xf32>
    %224 = arith.addf %222, %223 : vector<2x128xf32>
    %225 = math.tanh %224 : vector<2x128xf32>
    %226 = arith.mulf %219, %225 : vector<2x128xf32>
    %227 = arith.index_cast %203 : i32 to index
    %c0_88 = arith.constant 0 : index
    %228 = vector.load %arg14[%227, %c0_88] : memref<64x128xf32, #tpu.memory_space<vmem>>, vector<2x128xf32>
    tpu.vector_store %arg14[%227, %c0_88], %226 {strides = array<i32>} : memref<64x128xf32, #tpu.memory_space<vmem>>, vector<2x128xf32>,
    %c8_i32_89 = arith.constant 8 : i32
    %c0_90 = arith.constant 0 : index
    %c0_91 = arith.constant 0 : index
    %c0_92 = arith.constant 0 : index
    %c0_93 = arith.constant 0 : index
    %229 = vector.load %arg11[%c0_90, %c0_91, %c0_92, %c0_93] : memref<1x2x2x128xf32, #tpu.memory_space<vmem>>, vector<1x1x2x128xf32>
    %230 = vector.shape_cast %229 : vector<1x1x2x128xf32> to vector<2x128xf32>
    %231 = vector.shape_cast %226 : vector<2x128xf32> to vector<1x1x2x128xf32>
    tpu.vector_store %arg11[%c0_90, %c0_91, %c0_92, %c0_93], %231 {strides = array<i32>} : memref<1x2x2x128xf32, #tpu.memory_space<vmem>>, vector<1x1x2x128xf32>,
    %c0_94 = arith.constant 0 : index
    %c0_95 = arith.constant 0 : index
    %c0_96 = arith.constant 0 : index
    %c0_97 = arith.constant 0 : index
    %232 = vector.load %arg12[%c0_94, %c0_95, %c0_96, %c0_97] : memref<1x2x2x128xf32, #tpu.memory_space<vmem>>, vector<1x1x2x128xf32>
    %233 = vector.shape_cast %232 : vector<1x1x2x128xf32> to vector<2x128xf32>
    %234 = vector.shape_cast %224 : vector<2x128xf32> to vector<1x1x2x128xf32>
    tpu.vector_store %arg12[%c0_94, %c0_95, %c0_96, %c0_97], %234 {strides = array<i32>} : memref<1x2x2x128xf32, #tpu.memory_space<vmem>>, vector<1x1x2x128xf32>,
    %c0_98 = arith.constant 0 : index
    %c0_99 = arith.constant 0 : index
    %235 = vector.load %arg14[%c0_98, %c0_99] : memref<64x128xf32, #tpu.memory_space<vmem>>, vector<64x128xf32>
    %236 = arith.truncf %235 : vector<64x128xf32> to vector<64x128xbf16>
    %c0_100 = arith.constant 0 : index
    %c0_101 = arith.constant 0 : index
    %c0_102 = arith.constant 0 : index
    %c0_103 = arith.constant 0 : index
    %237 = vector.load %arg5[%c0_100, %c0_101, %c0_102, %c0_103] : memref<1x1x128x512xbf16, #tpu.memory_space<vmem>>, vector<1x1x128x512xbf16>
    %238 = vector.shape_cast %237 : vector<1x1x128x512xbf16> to vector<128x512xbf16>
    %cst_104 = arith.constant dense<0.000000e+00> : vector<64x512xf32>
    %239 = tpu.matmul %236, %238, %cst_104 {dimension_numbers = #tpu.dot_dimension_numbers<[1], [0], [0], [1], [0, 0, 1, 1], [], []>} : vector<64x128xbf16>, vector<128x512xbf16>, vector<64x512xf32> -> vector<64x512xf32>
    %c0_105 = arith.constant 0 : index
    %c1 = arith.constant 1 : index
    %c0_106 = arith.constant 0 : index
    %c0_107 = arith.constant 0 : index
    %240 = vector.load %arg7[%c0_105, %c1, %c0_106, %c0_107] : memref<1x2x1x512xf32, #tpu.memory_space<vmem>>, vector<1x1x1x512xf32>
    %241 = vector.shape_cast %240 : vector<1x1x1x512xf32> to vector<1x512xf32>
    %242 = vector.broadcast %241 : vector<1x512xf32> to vector<64x512xf32>
    %243 = arith.addf %239, %242 : vector<64x512xf32>
    %c0_108 = arith.constant 0 : index
    %c0_109 = arith.constant 0 : index
    %244 = vector.load %arg13[%c0_108, %c0_109] : memref<64x512xf32, #tpu.memory_space<vmem>>, vector<64x512xf32>
    tpu.vector_store %arg13[%c0_108, %c0_109], %243 {strides = array<i32>} : memref<64x512xf32, #tpu.memory_space<vmem>>, vector<64x512xf32>,
    %c0_110 = arith.constant 0 : index
    %c1_111 = arith.constant 1 : index
    %c0_112 = arith.constant 0 : index
    %c0_113 = arith.constant 0 : index
    %245 = vector.load %arg2[%c0_110, %c1_111, %c0_112, %c0_113] : memref<1x2x2x128xf32, #tpu.memory_space<vmem>>, vector<1x1x2x128xf32>
    %246 = vector.shape_cast %245 : vector<1x1x2x128xf32> to vector<2x128xf32>
    %c0_114 = arith.constant 0 : index
    %c1_115 = arith.constant 1 : index
    %c0_116 = arith.constant 0 : index
    %c0_117 = arith.constant 0 : index
    %247 = vector.load %arg3[%c0_114, %c1_115, %c0_116, %c0_117] : memref<1x2x2x128xf32, #tpu.memory_space<vmem>>, vector<1x1x2x128xf32>
    %248 = vector.shape_cast %247 : vector<1x1x2x128xf32> to vector<2x128xf32>
    %c0_i32_118 = arith.constant 0 : i32
    %c8_i32_119 = arith.constant 8 : i32
    %249 = arith.muli %c0_i32_118, %c8_i32_119 : i32
    %250 = tpu.assume_multiple %249, 8 : i32
    %251 = arith.index_cast %250 : i32 to index
    %c0_120 = arith.constant 0 : index
    %252 = vector.load %arg13[%251, %c0_120] : memref<64x512xf32, #tpu.memory_space<vmem>>, vector<2x512xf32>
    %253 = arith.truncf %246 : vector<2x128xf32> to vector<2x128xbf16>
    %c0_121 = arith.constant 0 : index
    %c1_122 = arith.constant 1 : index
    %c0_123 = arith.constant 0 : index
    %c0_124 = arith.constant 0 : index
    %254 = vector.load %arg6[%c0_121, %c1_122, %c0_123, %c0_124] : memref<1x2x128x512xbf16, #tpu.memory_space<vmem>>, vector<1x1x128x512xbf16>
    %255 = vector.shape_cast %254 : vector<1x1x128x512xbf16> to vector<128x512xbf16>
    %cst_125 = arith.constant dense<0.000000e+00> : vector<2x512xf32>
    %256 = tpu.matmul %253, %255, %cst_125 {dimension_numbers = #tpu.dot_dimension_numbers<[1], [0], [0], [1], [0, 0, 1, 1], [], []>} : vector<2x128xbf16>, vector<128x512xbf16>, vector<2x512xf32> -> vector<2x512xf32>
    %257 = arith.addf %252, %256 : vector<2x512xf32>
    %258 = vector.extract_strided_slice %257 {offsets = [0, 0], sizes = [2, 384], strides = [1, 1]} : vector<2x512xf32> to vector<2x384xf32>
    %259 = arith.negf %258 : vector<2x384xf32>
    %260 = math.exp %259 : vector<2x384xf32>
    %cst_126 = arith.constant 1.000000e+00 : f32
    %261 = vector.broadcast %cst_126 : f32 to vector<2x384xf32>
    %262 = arith.addf %261, %260 : vector<2x384xf32>
    %263 = arith.divf %261, %262 : vector<2x384xf32>
    %264 = vector.extract_strided_slice %263 {offsets = [0, 0], sizes = [2, 128], strides = [1, 1]} : vector<2x384xf32> to vector<2x128xf32>
    %265 = vector.extract_strided_slice %263 {offsets = [0, 128], sizes = [2, 128], strides = [1, 1]} : vector<2x384xf32> to vector<2x128xf32>
    %266 = vector.extract_strided_slice %263 {offsets = [0, 256], sizes = [2, 128], strides = [1, 1]} : vector<2x384xf32> to vector<2x128xf32>
    %267 = vector.extract_strided_slice %257 {offsets = [0, 384], sizes = [2, 128], strides = [1, 1]} : vector<2x512xf32> to vector<2x128xf32>
    %268 = math.tanh %267 : vector<2x128xf32>
    %269 = arith.mulf %265, %248 : vector<2x128xf32>
    %270 = arith.mulf %264, %268 : vector<2x128xf32>
    %271 = arith.addf %269, %270 : vector<2x128xf32>
    %272 = math.tanh %271 : vector<2x128xf32>
    %273 = arith.mulf %266, %272 : vector<2x128xf32>
    %c1_i32_127 = arith.constant 1 : i32
    %c8_i32_128 = arith.constant 8 : i32
    %274 = arith.muli %c1_i32_127, %c8_i32_128 : i32
    %275 = tpu.assume_multiple %274, 8 : i32
    %276 = arith.index_cast %275 : i32 to index
    %c0_129 = arith.constant 0 : index
    %277 = vector.load %arg13[%276, %c0_129] : memref<64x512xf32, #tpu.memory_space<vmem>>, vector<2x512xf32>
    %278 = arith.truncf %273 : vector<2x128xf32> to vector<2x128xbf16>
    %c0_130 = arith.constant 0 : index
    %c1_131 = arith.constant 1 : index
    %c0_132 = arith.constant 0 : index
    %c0_133 = arith.constant 0 : index
    %279 = vector.load %arg6[%c0_130, %c1_131, %c0_132, %c0_133] : memref<1x2x128x512xbf16, #tpu.memory_space<vmem>>, vector<1x1x128x512xbf16>
    %280 = vector.shape_cast %279 : vector<1x1x128x512xbf16> to vector<128x512xbf16>
    %cst_134 = arith.constant dense<0.000000e+00> : vector<2x512xf32>
    %281 = tpu.matmul %278, %280, %cst_134 {dimension_numbers = #tpu.dot_dimension_numbers<[1], [0], [0], [1], [0, 0, 1, 1], [], []>} : vector<2x128xbf16>, vector<128x512xbf16>, vector<2x512xf32> -> vector<2x512xf32>
    %282 = arith.addf %277, %281 : vector<2x512xf32>
    %283 = vector.extract_strided_slice %282 {offsets = [0, 0], sizes = [2, 384], strides = [1, 1]} : vector<2x512xf32> to vector<2x384xf32>
    %284 = arith.negf %283 : vector<2x384xf32>
    %285 = math.exp %284 : vector<2x384xf32>
    %cst_135 = arith.constant 1.000000e+00 : f32
    %286 = vector.broadcast %cst_135 : f32 to vector<2x384xf32>
    %287 = arith.addf %286, %285 : vector<2x384xf32>
    %288 = arith.divf %286, %287 : vector<2x384xf32>
    %289 = vector.extract_strided_slice %288 {offsets = [0, 0], sizes = [2, 128], strides = [1, 1]} : vector<2x384xf32> to vector<2x128xf32>
    %290 = vector.extract_strided_slice %288 {offsets = [0, 128], sizes = [2, 128], strides = [1, 1]} : vector<2x384xf32> to vector<2x128xf32>
    %291 = vector.extract_strided_slice %288 {offsets = [0, 256], sizes = [2, 128], strides = [1, 1]} : vector<2x384xf32> to vector<2x128xf32>
    %292 = vector.extract_strided_slice %282 {offsets = [0, 384], sizes = [2, 128], strides = [1, 1]} : vector<2x512xf32> to vector<2x128xf32>
    %293 = math.tanh %292 : vector<2x128xf32>
    %294 = arith.mulf %290, %271 : vector<2x128xf32>
    %295 = arith.mulf %289, %293 : vector<2x128xf32>
    %296 = arith.addf %294, %295 : vector<2x128xf32>
    %297 = math.tanh %296 : vector<2x128xf32>
    %298 = arith.mulf %291, %297 : vector<2x128xf32>
    %c2_i32_136 = arith.constant 2 : i32
    %c8_i32_137 = arith.constant 8 : i32
    %299 = arith.muli %c2_i32_136, %c8_i32_137 : i32
    %300 = tpu.assume_multiple %299, 8 : i32
    %301 = arith.index_cast %300 : i32 to index
    %c0_138 = arith.constant 0 : index
    %302 = vector.load %arg13[%301, %c0_138] : memref<64x512xf32, #tpu.memory_space<vmem>>, vector<2x512xf32>
    %303 = arith.truncf %298 : vector<2x128xf32> to vector<2x128xbf16>
    %c0_139 = arith.constant 0 : index
    %c1_140 = arith.constant 1 : index
    %c0_141 = arith.constant 0 : index
    %c0_142 = arith.constant 0 : index
    %304 = vector.load %arg6[%c0_139, %c1_140, %c0_141, %c0_142] : memref<1x2x128x512xbf16, #tpu.memory_space<vmem>>, vector<1x1x128x512xbf16>
    %305 = vector.shape_cast %304 : vector<1x1x128x512xbf16> to vector<128x512xbf16>
    %cst_143 = arith.constant dense<0.000000e+00> : vector<2x512xf32>
    %306 = tpu.matmul %303, %305, %cst_143 {dimension_numbers = #tpu.dot_dimension_numbers<[1], [0], [0], [1], [0, 0, 1, 1], [], []>} : vector<2x128xbf16>, vector<128x512xbf16>, vector<2x512xf32> -> vector<2x512xf32>
    %307 = arith.addf %302, %306 : vector<2x512xf32>
    %308 = vector.extract_strided_slice %307 {offsets = [0, 0], sizes = [2, 384], strides = [1, 1]} : vector<2x512xf32> to vector<2x384xf32>
    %309 = arith.negf %308 : vector<2x384xf32>
    %310 = math.exp %309 : vector<2x384xf32>
    %cst_144 = arith.constant 1.000000e+00 : f32
    %311 = vector.broadcast %cst_144 : f32 to vector<2x384xf32>
    %312 = arith.addf %311, %310 : vector<2x384xf32>
    %313 = arith.divf %311, %312 : vector<2x384xf32>
    %314 = vector.extract_strided_slice %313 {offsets = [0, 0], sizes = [2, 128], strides = [1, 1]} : vector<2x384xf32> to vector<2x128xf32>
    %315 = vector.extract_strided_slice %313 {offsets = [0, 128], sizes = [2, 128], strides = [1, 1]} : vector<2x384xf32> to vector<2x128xf32>
    %316 = vector.extract_strided_slice %313 {offsets = [0, 256], sizes = [2, 128], strides = [1, 1]} : vector<2x384xf32> to vector<2x128xf32>
    %317 = vector.extract_strided_slice %307 {offsets = [0, 384], sizes = [2, 128], strides = [1, 1]} : vector<2x512xf32> to vector<2x128xf32>
    %318 = math.tanh %317 : vector<2x128xf32>
    %319 = arith.mulf %315, %296 : vector<2x128xf32>
    %320 = arith.mulf %314, %318 : vector<2x128xf32>
    %321 = arith.addf %319, %320 : vector<2x128xf32>
    %322 = math.tanh %321 : vector<2x128xf32>
    %323 = arith.mulf %316, %322 : vector<2x128xf32>
    %c3_i32_145 = arith.constant 3 : i32
    %c8_i32_146 = arith.constant 8 : i32
    %324 = arith.muli %c3_i32_145, %c8_i32_146 : i32
    %325 = tpu.assume_multiple %324, 8 : i32
    %326 = arith.index_cast %325 : i32 to index
    %c0_147 = arith.constant 0 : index
    %327 = vector.load %arg13[%326, %c0_147] : memref<64x512xf32, #tpu.memory_space<vmem>>, vector<2x512xf32>
    %328 = arith.truncf %323 : vector<2x128xf32> to vector<2x128xbf16>
    %c0_148 = arith.constant 0 : index
    %c1_149 = arith.constant 1 : index
    %c0_150 = arith.constant 0 : index
    %c0_151 = arith.constant 0 : index
    %329 = vector.load %arg6[%c0_148, %c1_149, %c0_150, %c0_151] : memref<1x2x128x512xbf16, #tpu.memory_space<vmem>>, vector<1x1x128x512xbf16>
    %330 = vector.shape_cast %329 : vector<1x1x128x512xbf16> to vector<128x512xbf16>
    %cst_152 = arith.constant dense<0.000000e+00> : vector<2x512xf32>
    %331 = tpu.matmul %328, %330, %cst_152 {dimension_numbers = #tpu.dot_dimension_numbers<[1], [0], [0], [1], [0, 0, 1, 1], [], []>} : vector<2x128xbf16>, vector<128x512xbf16>, vector<2x512xf32> -> vector<2x512xf32>
    %332 = arith.addf %327, %331 : vector<2x512xf32>
    %333 = vector.extract_strided_slice %332 {offsets = [0, 0], sizes = [2, 384], strides = [1, 1]} : vector<2x512xf32> to vector<2x384xf32>
    %334 = arith.negf %333 : vector<2x384xf32>
    %335 = math.exp %334 : vector<2x384xf32>
    %cst_153 = arith.constant 1.000000e+00 : f32
    %336 = vector.broadcast %cst_153 : f32 to vector<2x384xf32>
    %337 = arith.addf %336, %335 : vector<2x384xf32>
    %338 = arith.divf %336, %337 : vector<2x384xf32>
    %339 = vector.extract_strided_slice %338 {offsets = [0, 0], sizes = [2, 128], strides = [1, 1]} : vector<2x384xf32> to vector<2x128xf32>
    %340 = vector.extract_strided_slice %338 {offsets = [0, 128], sizes = [2, 128], strides = [1, 1]} : vector<2x384xf32> to vector<2x128xf32>
    %341 = vector.extract_strided_slice %338 {offsets = [0, 256], sizes = [2, 128], strides = [1, 1]} : vector<2x384xf32> to vector<2x128xf32>
    %342 = vector.extract_strided_slice %332 {offsets = [0, 384], sizes = [2, 128], strides = [1, 1]} : vector<2x512xf32> to vector<2x128xf32>
    %343 = math.tanh %342 : vector<2x128xf32>
    %344 = arith.mulf %340, %321 : vector<2x128xf32>
    %345 = arith.mulf %339, %343 : vector<2x128xf32>
    %346 = arith.addf %344, %345 : vector<2x128xf32>
    %347 = math.tanh %346 : vector<2x128xf32>
    %348 = arith.mulf %341, %347 : vector<2x128xf32>
    %c4_i32_154 = arith.constant 4 : i32
    %c8_i32_155 = arith.constant 8 : i32
    %349 = arith.muli %c4_i32_154, %c8_i32_155 : i32
    %350 = tpu.assume_multiple %349, 8 : i32
    %351 = arith.index_cast %350 : i32 to index
    %c0_156 = arith.constant 0 : index
    %352 = vector.load %arg13[%351, %c0_156] : memref<64x512xf32, #tpu.memory_space<vmem>>, vector<2x512xf32>
    %353 = arith.truncf %348 : vector<2x128xf32> to vector<2x128xbf16>
    %c0_157 = arith.constant 0 : index
    %c1_158 = arith.constant 1 : index
    %c0_159 = arith.constant 0 : index
    %c0_160 = arith.constant 0 : index
    %354 = vector.load %arg6[%c0_157, %c1_158, %c0_159, %c0_160] : memref<1x2x128x512xbf16, #tpu.memory_space<vmem>>, vector<1x1x128x512xbf16>
    %355 = vector.shape_cast %354 : vector<1x1x128x512xbf16> to vector<128x512xbf16>
    %cst_161 = arith.constant dense<0.000000e+00> : vector<2x512xf32>
    %356 = tpu.matmul %353, %355, %cst_161 {dimension_numbers = #tpu.dot_dimension_numbers<[1], [0], [0], [1], [0, 0, 1, 1], [], []>} : vector<2x128xbf16>, vector<128x512xbf16>, vector<2x512xf32> -> vector<2x512xf32>
    %357 = arith.addf %352, %356 : vector<2x512xf32>
    %358 = vector.extract_strided_slice %357 {offsets = [0, 0], sizes = [2, 384], strides = [1, 1]} : vector<2x512xf32> to vector<2x384xf32>
    %359 = arith.negf %358 : vector<2x384xf32>
    %360 = math.exp %359 : vector<2x384xf32>
    %cst_162 = arith.constant 1.000000e+00 : f32
    %361 = vector.broadcast %cst_162 : f32 to vector<2x384xf32>
    %362 = arith.addf %361, %360 : vector<2x384xf32>
    %363 = arith.divf %361, %362 : vector<2x384xf32>
    %364 = vector.extract_strided_slice %363 {offsets = [0, 0], sizes = [2, 128], strides = [1, 1]} : vector<2x384xf32> to vector<2x128xf32>
    %365 = vector.extract_strided_slice %363 {offsets = [0, 128], sizes = [2, 128], strides = [1, 1]} : vector<2x384xf32> to vector<2x128xf32>
    %366 = vector.extract_strided_slice %363 {offsets = [0, 256], sizes = [2, 128], strides = [1, 1]} : vector<2x384xf32> to vector<2x128xf32>
    %367 = vector.extract_strided_slice %357 {offsets = [0, 384], sizes = [2, 128], strides = [1, 1]} : vector<2x512xf32> to vector<2x128xf32>
    %368 = math.tanh %367 : vector<2x128xf32>
    %369 = arith.mulf %365, %346 : vector<2x128xf32>
    %370 = arith.mulf %364, %368 : vector<2x128xf32>
    %371 = arith.addf %369, %370 : vector<2x128xf32>
    %372 = math.tanh %371 : vector<2x128xf32>
    %373 = arith.mulf %366, %372 : vector<2x128xf32>
    %c5_i32_163 = arith.constant 5 : i32
    %c8_i32_164 = arith.constant 8 : i32
    %374 = arith.muli %c5_i32_163, %c8_i32_164 : i32
    %375 = tpu.assume_multiple %374, 8 : i32
    %376 = arith.index_cast %375 : i32 to index
    %c0_165 = arith.constant 0 : index
    %377 = vector.load %arg13[%376, %c0_165] : memref<64x512xf32, #tpu.memory_space<vmem>>, vector<2x512xf32>
    %378 = arith.truncf %373 : vector<2x128xf32> to vector<2x128xbf16>
    %c0_166 = arith.constant 0 : index
    %c1_167 = arith.constant 1 : index
    %c0_168 = arith.constant 0 : index
    %c0_169 = arith.constant 0 : index
    %379 = vector.load %arg6[%c0_166, %c1_167, %c0_168, %c0_169] : memref<1x2x128x512xbf16, #tpu.memory_space<vmem>>, vector<1x1x128x512xbf16>
    %380 = vector.shape_cast %379 : vector<1x1x128x512xbf16> to vector<128x512xbf16>
    %cst_170 = arith.constant dense<0.000000e+00> : vector<2x512xf32>
    %381 = tpu.matmul %378, %380, %cst_170 {dimension_numbers = #tpu.dot_dimension_numbers<[1], [0], [0], [1], [0, 0, 1, 1], [], []>} : vector<2x128xbf16>, vector<128x512xbf16>, vector<2x512xf32> -> vector<2x512xf32>
    %382 = arith.addf %377, %381 : vector<2x512xf32>
    %383 = vector.extract_strided_slice %382 {offsets = [0, 0], sizes = [2, 384], strides = [1, 1]} : vector<2x512xf32> to vector<2x384xf32>
    %384 = arith.negf %383 : vector<2x384xf32>
    %385 = math.exp %384 : vector<2x384xf32>
    %cst_171 = arith.constant 1.000000e+00 : f32
    %386 = vector.broadcast %cst_171 : f32 to vector<2x384xf32>
    %387 = arith.addf %386, %385 : vector<2x384xf32>
    %388 = arith.divf %386, %387 : vector<2x384xf32>
    %389 = vector.extract_strided_slice %388 {offsets = [0, 0], sizes = [2, 128], strides = [1, 1]} : vector<2x384xf32> to vector<2x128xf32>
    %390 = vector.extract_strided_slice %388 {offsets = [0, 128], sizes = [2, 128], strides = [1, 1]} : vector<2x384xf32> to vector<2x128xf32>
    %391 = vector.extract_strided_slice %388 {offsets = [0, 256], sizes = [2, 128], strides = [1, 1]} : vector<2x384xf32> to vector<2x128xf32>
    %392 = vector.extract_strided_slice %382 {offsets = [0, 384], sizes = [2, 128], strides = [1, 1]} : vector<2x512xf32> to vector<2x128xf32>
    %393 = math.tanh %392 : vector<2x128xf32>
    %394 = arith.mulf %390, %371 : vector<2x128xf32>
    %395 = arith.mulf %389, %393 : vector<2x128xf32>
    %396 = arith.addf %394, %395 : vector<2x128xf32>
    %397 = math.tanh %396 : vector<2x128xf32>
    %398 = arith.mulf %391, %397 : vector<2x128xf32>
    %c6_i32_172 = arith.constant 6 : i32
    %c8_i32_173 = arith.constant 8 : i32
    %399 = arith.muli %c6_i32_172, %c8_i32_173 : i32
    %400 = tpu.assume_multiple %399, 8 : i32
    %401 = arith.index_cast %400 : i32 to index
    %c0_174 = arith.constant 0 : index
    %402 = vector.load %arg13[%401, %c0_174] : memref<64x512xf32, #tpu.memory_space<vmem>>, vector<2x512xf32>
    %403 = arith.truncf %398 : vector<2x128xf32> to vector<2x128xbf16>
    %c0_175 = arith.constant 0 : index
    %c1_176 = arith.constant 1 : index
    %c0_177 = arith.constant 0 : index
    %c0_178 = arith.constant 0 : index
    %404 = vector.load %arg6[%c0_175, %c1_176, %c0_177, %c0_178] : memref<1x2x128x512xbf16, #tpu.memory_space<vmem>>, vector<1x1x128x512xbf16>
    %405 = vector.shape_cast %404 : vector<1x1x128x512xbf16> to vector<128x512xbf16>
    %cst_179 = arith.constant dense<0.000000e+00> : vector<2x512xf32>
    %406 = tpu.matmul %403, %405, %cst_179 {dimension_numbers = #tpu.dot_dimension_numbers<[1], [0], [0], [1], [0, 0, 1, 1], [], []>} : vector<2x128xbf16>, vector<128x512xbf16>, vector<2x512xf32> -> vector<2x512xf32>
    %407 = arith.addf %402, %406 : vector<2x512xf32>
    %408 = vector.extract_strided_slice %407 {offsets = [0, 0], sizes = [2, 384], strides = [1, 1]} : vector<2x512xf32> to vector<2x384xf32>
    %409 = arith.negf %408 : vector<2x384xf32>
    %410 = math.exp %409 : vector<2x384xf32>
    %cst_180 = arith.constant 1.000000e+00 : f32
    %411 = vector.broadcast %cst_180 : f32 to vector<2x384xf32>
    %412 = arith.addf %411, %410 : vector<2x384xf32>
    %413 = arith.divf %411, %412 : vector<2x384xf32>
    %414 = vector.extract_strided_slice %413 {offsets = [0, 0], sizes = [2, 128], strides = [1, 1]} : vector<2x384xf32> to vector<2x128xf32>
    %415 = vector.extract_strided_slice %413 {offsets = [0, 128], sizes = [2, 128], strides = [1, 1]} : vector<2x384xf32> to vector<2x128xf32>
    %416 = vector.extract_strided_slice %413 {offsets = [0, 256], sizes = [2, 128], strides = [1, 1]} : vector<2x384xf32> to vector<2x128xf32>
    %417 = vector.extract_strided_slice %407 {offsets = [0, 384], sizes = [2, 128], strides = [1, 1]} : vector<2x512xf32> to vector<2x128xf32>
    %418 = math.tanh %417 : vector<2x128xf32>
    %419 = arith.mulf %415, %396 : vector<2x128xf32>
    %420 = arith.mulf %414, %418 : vector<2x128xf32>
    %421 = arith.addf %419, %420 : vector<2x128xf32>
    %422 = math.tanh %421 : vector<2x128xf32>
    %423 = arith.mulf %416, %422 : vector<2x128xf32>
    %c7_i32_181 = arith.constant 7 : i32
    %c8_i32_182 = arith.constant 8 : i32
    %424 = arith.muli %c7_i32_181, %c8_i32_182 : i32
    %425 = tpu.assume_multiple %424, 8 : i32
    %426 = arith.index_cast %425 : i32 to index
    %c0_183 = arith.constant 0 : index
    %427 = vector.load %arg13[%426, %c0_183] : memref<64x512xf32, #tpu.memory_space<vmem>>, vector<2x512xf32>
    %428 = arith.truncf %423 : vector<2x128xf32> to vector<2x128xbf16>
    %c0_184 = arith.constant 0 : index
    %c1_185 = arith.constant 1 : index
    %c0_186 = arith.constant 0 : index
    %c0_187 = arith.constant 0 : index
    %429 = vector.load %arg6[%c0_184, %c1_185, %c0_186, %c0_187] : memref<1x2x128x512xbf16, #tpu.memory_space<vmem>>, vector<1x1x128x512xbf16>
    %430 = vector.shape_cast %429 : vector<1x1x128x512xbf16> to vector<128x512xbf16>
    %cst_188 = arith.constant dense<0.000000e+00> : vector<2x512xf32>
    %431 = tpu.matmul %428, %430, %cst_188 {dimension_numbers = #tpu.dot_dimension_numbers<[1], [0], [0], [1], [0, 0, 1, 1], [], []>} : vector<2x128xbf16>, vector<128x512xbf16>, vector<2x512xf32> -> vector<2x512xf32>
    %432 = arith.addf %427, %431 : vector<2x512xf32>
    %433 = vector.extract_strided_slice %432 {offsets = [0, 0], sizes = [2, 384], strides = [1, 1]} : vector<2x512xf32> to vector<2x384xf32>
    %434 = arith.negf %433 : vector<2x384xf32>
    %435 = math.exp %434 : vector<2x384xf32>
    %cst_189 = arith.constant 1.000000e+00 : f32
    %436 = vector.broadcast %cst_189 : f32 to vector<2x384xf32>
    %437 = arith.addf %436, %435 : vector<2x384xf32>
    %438 = arith.divf %436, %437 : vector<2x384xf32>
    %439 = vector.extract_strided_slice %438 {offsets = [0, 0], sizes = [2, 128], strides = [1, 1]} : vector<2x384xf32> to vector<2x128xf32>
    %440 = vector.extract_strided_slice %438 {offsets = [0, 128], sizes = [2, 128], strides = [1, 1]} : vector<2x384xf32> to vector<2x128xf32>
    %441 = vector.extract_strided_slice %438 {offsets = [0, 256], sizes = [2, 128], strides = [1, 1]} : vector<2x384xf32> to vector<2x128xf32>
    %442 = vector.extract_strided_slice %432 {offsets = [0, 384], sizes = [2, 128], strides = [1, 1]} : vector<2x512xf32> to vector<2x128xf32>
    %443 = math.tanh %442 : vector<2x128xf32>
    %444 = arith.mulf %440, %421 : vector<2x128xf32>
    %445 = arith.mulf %439, %443 : vector<2x128xf32>
    %446 = arith.addf %444, %445 : vector<2x128xf32>
    %447 = math.tanh %446 : vector<2x128xf32>
    %448 = arith.mulf %441, %447 : vector<2x128xf32>
    %c8_i32_190 = arith.constant 8 : i32
    %c0_191 = arith.constant 0 : index
    %c1_192 = arith.constant 1 : index
    %c0_193 = arith.constant 0 : index
    %c0_194 = arith.constant 0 : index
    %449 = vector.load %arg11[%c0_191, %c1_192, %c0_193, %c0_194] : memref<1x2x2x128xf32, #tpu.memory_space<vmem>>, vector<1x1x2x128xf32>
    %450 = vector.shape_cast %449 : vector<1x1x2x128xf32> to vector<2x128xf32>
    %451 = vector.shape_cast %448 : vector<2x128xf32> to vector<1x1x2x128xf32>
    tpu.vector_store %arg11[%c0_191, %c1_192, %c0_193, %c0_194], %451 {strides = array<i32>} : memref<1x2x2x128xf32, #tpu.memory_space<vmem>>, vector<1x1x2x128xf32>,
    %c0_195 = arith.constant 0 : index
    %c1_196 = arith.constant 1 : index
    %c0_197 = arith.constant 0 : index
    %c0_198 = arith.constant 0 : index
    %452 = vector.load %arg12[%c0_195, %c1_196, %c0_197, %c0_198] : memref<1x2x2x128xf32, #tpu.memory_space<vmem>>, vector<1x1x2x128xf32>
    %453 = vector.shape_cast %452 : vector<1x1x2x128xf32> to vector<2x128xf32>
    %454 = vector.shape_cast %446 : vector<2x128xf32> to vector<1x1x2x128xf32>
    tpu.vector_store %arg12[%c0_195, %c1_196, %c0_197, %c0_198], %454 {strides = array<i32>} : memref<1x2x2x128xf32, #tpu.memory_space<vmem>>, vector<1x1x2x128xf32>,
    %c0_199 = arith.constant 0 : index
    %c0_200 = arith.constant 0 : index
    %c0_201 = arith.constant 0 : index
    %455 = vector.load %arg8[%c0_199, %c0_200, %c0_201] : memref<1x128x4xf32, #tpu.memory_space<vmem>>, vector<1x128x4xf32>
    %456 = vector.shape_cast %455 : vector<1x128x4xf32> to vector<128x4xf32>
    %cst_202 = arith.constant dense<0.000000e+00> : vector<2x4xf32>
    %457 = tpu.matmul %448, %456, %cst_202 {dimension_numbers = #tpu.dot_dimension_numbers<[1], [0], [0], [1], [0, 0, 1, 1], [], []>} : vector<2x128xf32>, vector<128x4xf32>, vector<2x4xf32> -> vector<2x4xf32>
    %c0_203 = arith.constant 0 : index
    %c0_204 = arith.constant 0 : index
    %c0_205 = arith.constant 0 : index
    %458 = vector.load %arg9[%c0_203, %c0_204, %c0_205] : memref<1x1x4xf32, #tpu.memory_space<vmem>>, vector<1x1x4xf32>
    %459 = vector.shape_cast %458 : vector<1x1x4xf32> to vector<1x4xf32>
    %460 = vector.broadcast %459 : vector<1x4xf32> to vector<2x4xf32>
    %461 = arith.addf %457, %460 : vector<2x4xf32>
    %c0_206 = arith.constant 0 : index
    %c0_207 = arith.constant 0 : index
    %c0_208 = arith.constant 0 : index
    %462 = vector.load %arg10[%c0_206, %c0_207, %c0_208] : memref<1x2x4xf32, #tpu.memory_space<vmem>>, vector<1x2x4xf32>
    %463 = vector.shape_cast %462 : vector<1x2x4xf32> to vector<2x4xf32>
    %464 = vector.shape_cast %461 : vector<2x4xf32> to vector<1x2x4xf32>
    tpu.vector_store %arg10[%c0_206, %c0_207, %c0_208], %464 {strides = array<i32>} : memref<1x2x4xf32, #tpu.memory_space<vmem>>, vector<1x2x4xf32>,
    return
  }
  func.func @transform_0(%arg0: i32) -> (i32, i32) {
    %c0_i32 = arith.constant 0 : i32
    %c0_i32_0 = arith.constant 0 : i32
    %c0_i32_1 = arith.constant 0 : i32
    return %c0_i32, %c0_i32_0 : i32, i32
  }
  func.func @transform_1(%arg0: i32) -> (i32, i32, i32, i32) {
    %c0_i32 = arith.constant 0 : i32
    %c0_i32_0 = arith.constant 0 : i32
    %c0_i32_1 = arith.constant 0 : i32
    %c0_i32_2 = arith.constant 0 : i32
    return %arg0, %c0_i32, %c0_i32_0, %c0_i32_1 : i32, i32, i32, i32
  }
  func.func @transform_2(%arg0: i32) -> (i32, i32, i32, i32) {
    %c0_i32 = arith.constant 0 : i32
    %c0_i32_0 = arith.constant 0 : i32
    %c0_i32_1 = arith.constant 0 : i32
    %c0_i32_2 = arith.constant 0 : i32
    return %arg0, %c0_i32, %c0_i32_0, %c0_i32_1 : i32, i32, i32, i32
  }
  func.func @transform_3(%arg0: i32) -> (i32, i32, i32) {
    %c0_i32 = arith.constant 0 : i32
    %c0_i32_0 = arith.constant 0 : i32
    %c0_i32_1 = arith.constant 0 : i32
    return %arg0, %c0_i32, %c0_i32_0 : i32, i32, i32
  }
  func.func @transform_4(%arg0: i32) -> (i32, i32, i32, i32) {
    %c0_i32 = arith.constant 0 : i32
    %c0_i32_0 = arith.constant 0 : i32
    %c0_i32_1 = arith.constant 0 : i32
    %c0_i32_2 = arith.constant 0 : i32
    return %arg0, %c0_i32, %c0_i32_0, %c0_i32_1 : i32, i32, i32, i32
  }
  func.func @transform_5(%arg0: i32) -> (i32, i32, i32, i32) {
    %c0_i32 = arith.constant 0 : i32
    %c0_i32_0 = arith.constant 0 : i32
    %c0_i32_1 = arith.constant 0 : i32
    %c0_i32_2 = arith.constant 0 : i32
    return %arg0, %c0_i32, %c0_i32_0, %c0_i32_1 : i32, i32, i32, i32
  }
  func.func @transform_6(%arg0: i32) -> (i32, i32, i32, i32) {
    %c0_i32 = arith.constant 0 : i32
    %c0_i32_0 = arith.constant 0 : i32
    %c0_i32_1 = arith.constant 0 : i32
    %c0_i32_2 = arith.constant 0 : i32
    return %arg0, %c0_i32, %c0_i32_0, %c0_i32_1 : i32, i32, i32, i32
  }
  func.func @transform_7(%arg0: i32) -> (i32, i32, i32) {
    %c0_i32 = arith.constant 0 : i32
    %c0_i32_0 = arith.constant 0 : i32
    %c0_i32_1 = arith.constant 0 : i32
    return %arg0, %c0_i32, %c0_i32_0 : i32, i32, i32
  }
  func.func @transform_8(%arg0: i32) -> (i32, i32, i32) {
    %c0_i32 = arith.constant 0 : i32
    %c0_i32_0 = arith.constant 0 : i32
    %c0_i32_1 = arith.constant 0 : i32
    return %arg0, %c0_i32, %c0_i32_0 : i32, i32, i32
  }
  func.func @transform_9(%arg0: i32) -> (i32, i32, i32) {
    %c0_i32 = arith.constant 0 : i32
    %c0_i32_0 = arith.constant 0 : i32
    %c0_i32_1 = arith.constant 0 : i32
    return %arg0, %c0_i32, %c0_i32_0 : i32, i32, i32
  }
  func.func @transform_10(%arg0: i32) -> (i32, i32, i32, i32) {
    %c0_i32 = arith.constant 0 : i32
    %c0_i32_0 = arith.constant 0 : i32
    %c0_i32_1 = arith.constant 0 : i32
    %c0_i32_2 = arith.constant 0 : i32
    return %arg0, %c0_i32, %c0_i32_0, %c0_i32_1 : i32, i32, i32, i32
  }
  func.func @transform_11(%arg0: i32) -> (i32, i32, i32, i32) {
    %c0_i32 = arith.constant 0 : i32
    %c0_i32_0 = arith.constant 0 : i32
    %c0_i32_1 = arith.constant 0 : i32
    %c0_i32_2 = arith.constant 0 : i32
    return %arg0, %c0_i32, %c0_i32_0, %c0_i32_1 : i32, i32, i32, i32
  }
}

</mosaic_0001>

<bundles_post_ra>
// kernel: cmfull_forward.1
= control target key start
LH: loop header
LB: loop body
LE: loop exit
PB: predicated region body
PF: predicated region fallthrough
CT: control target
= control target key end

     0   :  { %17 = vsyncpa [#allocation5], 0  ;;  %s7350_s0 = inlined_call_operand.vmem [shape: bf16[64,4], index: 0, kind: input, shape index: {}]   ;;  %s7351_s1 = inlined_call_operand.vmem [shape: f32[1,2,2,128], index: 1, kind: input, shape index: {}, may-alias: {1,2}]   ;;  %s7352_s2 = inlined_call_operand.vmem [shape: f32[1,2,2,128], index: 2, kind: input, shape index: {}, may-alias: {1,2}]   ;;  %s7353_s3 = inlined_call_operand.vmem [shape: bf16[1,4,512], index: 3, kind: input, shape index: {}]   ;;  %s7354_s4 = inlined_call_operand.hbm [shape: bf16[1,1,128,512], index: 4, kind: input, shape index: {}]   ;;  %s7355_s5 = inlined_call_operand.hbm [shape: bf16[1,2,128,512], index: 5, kind: input, shape index: {}]   ;;  %s7356_s6 = inlined_call_operand.vmem [shape: f32[1,2,1,512], index: 6, kind: input, shape index: {}]   ;;  %s7357_s7 = inlined_call_operand.vmem [shape: f32[1,128,4], index: 7, kind: input, shape index: {}]   ;;  %s7358_s8 = inlined_call_operand.vmem [shape: f32[1,1,4], index: 8, kind: input, shape index: {}]   ;;  %s7359_s9 = inlined_call_operand.hbm [shape: f32[1,2,4], index: 9, kind: output, shape index: {0}]   ;;  %s7360_s10 = inlined_call_operand.vmem [shape: f32[1,2,2,128], index: 10, kind: output, shape index: {1}]   ;;  %s7361_s11 = inlined_call_operand.vmem [shape: f32[1,2,2,128], index: 11, kind: output, shape index: {2}]  }
   0x1   :  { %18 = vsyncpa [#allocation8], 0 }
   0x2   :  { %19 = vsyncpa [#allocation6], 0  ;;  %s32_s19 = sshll.u32 %s7354_s4, 4  ;;  %s6516_s20 = smov [#allocation4]   ;;  %s33_s19 = int_to_ptr.hbm [resolvable:$true] %s32_s19 }
   0x3   :  { %s34_s21 = sshll.u32 %s6516_s20, 4  ;;  %s45_s24 = sshll.u32 %s7355_s5, 4  ;;  %s35_s21 = int_to_ptr.vmem [resolvable:$true] %s34_s21  ;;  %s46_s24 = int_to_ptr.hbm [resolvable:$true] %s45_s24 }
   0x4   :  { %s6517_s25 = smov 256   ;;  %s6518_s26 = smov 16  }
   0x5   :  { %40 = dma.hbm_to_vmem [thread:$0]  %s33_s19, 4096, %s35_s21, [#allocation5], %s6517_s25, %s6517_s25, %s6518_s26  }
   0x6   :  { %s6519_s27 = smov [#allocation7]  }
   0x7   :  { %s47_s28 = sshll.u32 %s6519_s27, 4  ;;  %s48_s28 = int_to_ptr.vmem [resolvable:$true] %s47_s28 }
   0x8   :  { %53 = dma.hbm_to_vmem [thread:$0]  %s46_s24, 8192, %s48_s28, [#allocation8], %s6517_s25, %s6517_s25, %s6518_s26  }
   0x9   :  { %6510 = dma.done.wait [#allocation5], 4096  }
   0xa   :  { %6511 = vsyncadd [#allocation5], 4294963200 }
   0xb   :  { %6512 = dma.done.wait [#allocation8], 8192  }
   0xc   :  { %6513 = vsyncadd [#allocation8], 4294959104  ;;  %v77_v0 = vld [vmem:[%s7353_s3] sm:$0xff]  ;;  %vm127_vm0 = vcmask 1041408   ;;  %v4632_v1 = vld [vmem:[#allocation7 + $0xe0] sm:$0xf] }
   0xd   :  { %109 = vst [vmem:[#allocation1] ss:$4 sm:$0xff] %v77_v0  ;;  %v5885_v2 = vld [vmem:[#allocation7 + $0xec] sm:$0xf0]  ;;  %v5883_v3 = vld [vmem:[#allocation7 + $0xe4] sm:$0xf] }
   0xe   :  { %v4634_v4 = vld [vmem:[#allocation7 + $0xf0] sm:$0xf0]  ;;  %v4640_v5 = vld [vmem:[#allocation7 + $0xe8] sm:$0xf]  ;;  %v5886_v6 = vld [vmem:[#allocation7 + $0xf4] sm:$0xf0]  ;;  %v4633_v14 = vor.u32 %v5885_v2, %v4632_v1 }
   0xf   :  { %v6593_v7 = vld [vmem:[%s7350_s0] sm:$0xff]  ;;  %v4616_v8 = vld [vmem:[#allocation7 + $0xc0] sm:$0xf]  ;;  %v5881_v9 = vld [vmem:[#allocation7 + $0xcc] sm:$0xf0]  ;;  %vm114_vm1 = vcmask 31744   ;;  %v4637_v22 = vor.u32 %v5883_v3, %v4634_v4  ;;  %v4641_v23 = vor.u32 %v5886_v6, %v4640_v5 }
  0x10   :  { %v5884_v10 = vld [vmem:[#allocation7 + $0xec] sm:$0xf]  ;;  %v4642_v11 = vld [vmem:[#allocation7 + $0xf8] sm:$0xf0]  ;;  %v6600_v18 = vld [vmem:[%s7350_s0 + $0x18] sm:$0xff]  ;;  %v4617_v25 = vor.u32 %v5881_v9, %v4616_v8  ;;  %s6520_s17 = smov [#allocation9]  }
  0x11   :  { %v5879_v24 = vld [vmem:[#allocation7 + $0xc4] sm:$0xf]  ;;  %v4618_v26 = vld [vmem:[#allocation7 + $0xd0] sm:$0xf0]  ;;  %v4624_v27 = vld [vmem:[#allocation7 + $0xc8] sm:$0xf]  ;;  %v4645_v29 = vor.u32 %v5884_v10, %v4642_v11 }
  0x12   :  { %v5882_v28 = vld [vmem:[#allocation7 + $0xd4] sm:$0xf0]  ;;  %v4600_v30 = vld [vmem:[#allocation7 + $0xa0] sm:$0xf]  ;;  %v5877_v31 = vld [vmem:[#allocation7 + $0xac] sm:$0xf0]  ;;  %v4621_v32 = vor.u32 %v5879_v24, %v4618_v26 }
  0x13   :  { %v4625_v33 = vor.u32 %v5882_v28, %v4624_v27  ;;  %v5875_v34 = vld [vmem:[#allocation7 + $0xa4] sm:$0xf]  ;;  %v4602_v35 = vld [vmem:[#allocation7 + $0xb0] sm:$0xf0]  ;;  %v4608_v36 = vld [vmem:[#allocation7 + $0xa8] sm:$0xf]  ;;  %v4601_v37 = vor.u32 %v5877_v31, %v4600_v30 }
  0x14   :  { %v110_v12 = vld.sshfl [vmem:[#allocation1] sm:$0xff pattern:$0x73625140]  ;;  %v112_v13 = vld.sshfl [vmem:[#allocation1 + $0x10] sm:$0xff pattern:$0x73625140]  ;;  %v4605_v46 = vor.u32 %v5875_v34, %v4602_v35 }
  0x15   :  { %v128_v15 = vsel %vm127_vm0, %v110_v12, 0  ;;  %v132_v16 = vsel %vm127_vm0, %v112_v13, 0  ;;  %v113_v17 = vld.sshfl [vmem:[#allocation1 + $0x18] sm:$0xff pattern:$0x73625140]  ;;  %v6615_v62 = vld [vmem:[%s7350_s0 + $0x8] sm:$0xff] }
  0x16   :  { %143 = vmatpush.bf16.msra.mxu0 %v128_v15  ;;  %6175 = vmatpush.bf16.msra.mxu1 %v128_v15  ;;  %v134_v19 = vsel %vm127_vm0, %v113_v17, 0  ;;  %v111_v20 = vld.sshfl [vmem:[#allocation1 + $0x8] sm:$0xff pattern:$0x73625140]  ;;  %v5878_v38 = vld [vmem:[#allocation7 + $0xb4] sm:$0xf0] }
  0x17   :  { %201 = vmatpush.bf16.msra.mxu2 %v132_v16  ;;  %230 = vmatpush.bf16.msra.mxu3 %v134_v19  ;;  %v130_v21 = vsel %vm127_vm0, %v111_v20, 0  ;;  %v5880_v39 = vld [vmem:[#allocation7 + $0xcc] sm:$0xf]  ;;  %v4626_v40 = vld [vmem:[#allocation7 + $0xd8] sm:$0xf0]  ;;  %v4609_v48 = vor.u32 %v5878_v38, %v4608_v36  ;;  %s4460_s20 = sshll.u32 %s7359_s9, 4  ;;  %s4461_s20 = int_to_ptr.hbm [resolvable:$true] %s4460_s20 }
  0x18   :  { %v4584_v41 = vld [vmem:[#allocation7 + $0x80] sm:$0xf]  ;;  %v5873_v42 = vld [vmem:[#allocation7 + $0x8c] sm:$0xf0]  ;;  %v4629_v43 = vor.u32 %v5880_v39, %v4626_v40  ;;  %v5876_v44 = vld [vmem:[#allocation7 + $0xac] sm:$0xf] }
  0x19   :  { %4502 = vmatmul.msk.bf16.vlgmr.msra.gmra.mxu0 %vm114_vm1, %v6593_v7  ;;  %4505 = vmatmul.msk.bf16.vlgmr.msra.gmra.mxu1 %vm114_vm1, %v6600_v18  ;;  %v4610_v45 = vld [vmem:[#allocation7 + $0xb8] sm:$0xf0]  ;;  %v4568_v47 = vld [vmem:[#allocation7 + $0x60] sm:$0xf]  ;;  %v5871_v49 = vld [vmem:[#allocation7 + $0x84] sm:$0xf]  ;;  %v4585_v50 = vor.u32 %v5873_v42, %v4584_v41 }
  0x1a   :  { %172 = vmatpush.bf16.msrb.mxu1 %v130_v21  ;;  %486 = vmatpush.bf16.msrb.mxu0 %v4633_v14  ;;  %v4586_v51 = vld [vmem:[#allocation7 + $0x90] sm:$0xf0]  ;;  %v4613_v52 = vor.u32 %v5876_v44, %v4610_v45  ;;  %v4592_v53 = vld [vmem:[#allocation7 + $0x88] sm:$0xf]  ;;  %v5874_v54 = vld [vmem:[#allocation7 + $0x94] sm:$0xf0] }
  0x1b   :  { %4510 = vmatmul.msk.bf16.vlgmr.msra.gmra.mxu2 %vm114_vm1, %v6593_v7  ;;  %4514 = vmatmul.msk.bf16.vlgmr.msra.gmra.mxu3 %vm114_vm1, %v6593_v7  ;;  %v5869_v55 = vld [vmem:[#allocation7 + $0x6c] sm:$0xf0]  ;;  %v5872_v56 = vld [vmem:[#allocation7 + $0x8c] sm:$0xf]  ;;  %v4594_v57 = vld [vmem:[#allocation7 + $0x98] sm:$0xf0]  ;;  %v4589_v58 = vor.u32 %v5871_v49, %v4586_v51  ;;  %v4593_v59 = vor.u32 %v5874_v54, %v4592_v53 }
  0x1c   :  { %512 = vmatpush.bf16.msrb.mxu2 %v4641_v23  ;;  %525 = vmatpush.bf16.msrb.mxu3 %v4645_v29  ;;  %v4569_v60 = vor.u32 %v5869_v55, %v4568_v47  ;;  %v4597_v61 = vor.u32 %v5872_v56, %v4594_v57  ;;  %v4552_v63 = vld [vmem:[#allocation7 + $0x40] sm:$0xf]  ;;  %v5865_v0 = vld [vmem:[#allocation7 + $0x4c] sm:$0xf0]  ;;  %v4576_v2 = vld [vmem:[#allocation7 + $0x68] sm:$0xf] }
  0x1d   :  { %v4553_v1 = vor.u32 %v5865_v0, %v4552_v63  ;;  %v5870_v3 = vld [vmem:[#allocation7 + $0x74] sm:$0xf0]  ;;  %v5868_v4 = vld [vmem:[#allocation7 + $0x6c] sm:$0xf]  ;;  %v4536_v5 = vld [vmem:[#allocation7 + $0x20] sm:$0xf] }
  0x1e   :  { %499 = vmatpush.bf16.msra.mxu1 %v4637_v22  ;;  %487 = vmatpush.bf16.msrb.mxu0 %v4617_v25  ;;  %v5861_v6 = vld [vmem:[#allocation7 + $0x2c] sm:$0xf0]  ;;  %v4577_v8 = vor.u32 %v5870_v3, %v4576_v2  ;;  %v4578_v9 = vld [vmem:[#allocation7 + $0x78] sm:$0xf0]  ;;  %v5867_v10 = vld [vmem:[#allocation7 + $0x64] sm:$0xf] }
  0x1f   :  { %v4570_v11 = vld [vmem:[#allocation7 + $0x70] sm:$0xf0]  ;;  %v4581_v12 = vor.u32 %v5868_v4, %v4578_v9  ;;  %v4560_v13 = vld [vmem:[#allocation7 + $0x48] sm:$0xf]  ;;  %v4520_v14 = vld [vmem:[#allocation7] sm:$0xf]  ;;  %v4537_v20 = vor.u32 %v5861_v6, %v4536_v5 }
  0x20   :  { %513 = vmatpush.bf16.msrb.mxu2 %v4625_v33  ;;  %526 = vmatpush.bf16.msrb.mxu3 %v4629_v43  ;;  %v5857_v15 = vld [vmem:[#allocation7 + $0xc] sm:$0xf0]  ;;  %v4573_v16 = vor.u32 %v5867_v10, %v4570_v11  ;;  %v5866_v17 = vld [vmem:[#allocation7 + $0x54] sm:$0xf0]  ;;  %v4562_v19 = vld [vmem:[#allocation7 + $0x58] sm:$0xf0] }
  0x21   :  { %v4561_v21 = vor.u32 %v5866_v17, %v4560_v13  ;;  %v5863_v23 = vld [vmem:[#allocation7 + $0x44] sm:$0xf]  ;;  %v4554_v24 = vld [vmem:[#allocation7 + $0x50] sm:$0xf0]  ;;  %v4544_v25 = vld [vmem:[#allocation7 + $0x28] sm:$0xf]  ;;  %v4521_v31 = vor.u32 %v5857_v15, %v4520_v14 }
  0x22   :  { %500 = vmatpush.bf16.msra.mxu1 %v4621_v32  ;;  %488 = vmatpush.bf16.msrb.mxu0 %v4601_v37  ;;  %v4557_v26 = vor.u32 %v5863_v23, %v4554_v24  ;;  %v5862_v27 = vld [vmem:[#allocation7 + $0x34] sm:$0xf0]  ;;  %v5860_v28 = vld [vmem:[#allocation7 + $0x2c] sm:$0xf]  ;;  %v4546_v29 = vld [vmem:[#allocation7 + $0x38] sm:$0xf0] }
  0x23   :  { %v4545_v30 = vor.u32 %v5862_v27, %v4544_v25  ;;  %v4549_v32 = vor.u32 %v5860_v28, %v4546_v29  ;;  %v4528_v33 = vld [vmem:[#allocation7 + $0x8] sm:$0xf]  ;;  %v5858_v34 = vld [vmem:[#allocation7 + $0x14] sm:$0xf0]  ;;  %v5856_v35 = vld [vmem:[#allocation7 + $0xc] sm:$0xf] }
  0x24   :  { %514 = vmatpush.bf16.msrb.mxu2 %v4609_v48  ;;  %527 = vmatpush.bf16.msrb.mxu3 %v4613_v52  ;;  %v4530_v36 = vld [vmem:[#allocation7 + $0x18] sm:$0xf0]  ;;  %v4529_v37 = vor.u32 %v5858_v34, %v4528_v33  ;;  %v5853_v39 = vld [vmem:[%s7350_s0 + $0x10] sm:$0xff]  ;;  %v5859_v40 = vld [vmem:[#allocation7 + $0x24] sm:$0xf] }
  0x25   :  { %v4533_v38 = vor.u32 %v5856_v35, %v4530_v36  ;;  %v4538_v41 = vld [vmem:[#allocation7 + $0x30] sm:$0xf0]  ;;  %v5855_v43 = vld [vmem:[#allocation7 + $0x4] sm:$0xf]  ;;  %v78_v48 = vld [vmem:[%s7356_s6] sm:$0xf] }
  0x26   :  { %501 = vmatpush.bf16.msra.mxu1 %v4605_v46  ;;  %489 = vmatpush.bf16.msrb.mxu0 %v4585_v50  ;;  %v4541_v42 = vor.u32 %v5859_v40, %v4538_v41  ;;  %v4522_v44 = vld [vmem:[#allocation7 + $0x10] sm:$0xf0]  ;;  %v284_v46 = vld [vmem:[%s7351_s1] sm:$0x3]  ;;  %v6646_v49 = vperm.slane %v78_v48, 0  ;;  %v6650_v54 = vperm.slane %v78_v48, 2 }
  0x27   :  { %v4525_v45 = vor.u32 %v5855_v43, %v4522_v44  ;;  %v293_v47 = vpack.c.bf16 %v284_v46, %v284_v46  ;;  %v6658_v63 = vperm.slane %v78_v48, 1 }
  0x28   :  { %515 = vmatpush.bf16.msrb.mxu2 %v4593_v59  ;;  %528 = vmatpush.bf16.msrb.mxu3 %v4597_v61 }
  0x29   :  { %4503 = vmatmul.msk.bf16.gmra.mxu0 %vm114_vm1, %v6615_v62  ;;  %4506 = vmatmul.msk.bf16.vlgmr.msrb.gmra.mxu1 %vm114_vm1, %v6593_v7  ;;  %v5864_v7 = vld [vmem:[#allocation7 + $0x4c] sm:$0xf] }
  0x2a   :  { %502 = vmatpush.bf16.msra.mxu1 %v4589_v58  ;;  %490 = vmatpush.bf16.msrb.mxu0 %v4569_v60  ;;  %v4565_v22 = vor.u32 %v5864_v7, %v4562_v19 }
  0x2b   :  { %4511 = vmatmul.msk.bf16.gmra.mxu2 %vm114_vm1, %v6615_v62  ;;  %4515 = vmatmul.msk.bf16.gmra.mxu3 %vm114_vm1, %v6615_v62 }
  0x2c   :  { %516 = vmatpush.bf16.msrb.mxu2 %v4577_v8  ;;  %529 = vmatpush.bf16.msrb.mxu3 %v4581_v12 }
  0x2e   :  { %491 = vmatpush.bf16.msrb.mxu0 %v4553_v1  ;;  %503 = vmatpush.bf16.msra.mxu1 %v4573_v16 }
  0x30   :  { %517 = vmatpush.bf16.msrb.mxu2 %v4561_v21  ;;  %530 = vmatpush.bf16.msrb.mxu3 %v4565_v22 }
  0x32   :  { %492 = vmatpush.bf16.msrb.mxu0 %v4537_v20  ;;  %504 = vmatpush.bf16.msra.mxu1 %v4557_v26 }
  0x34   :  { %518 = vmatpush.bf16.msrb.mxu2 %v4545_v30  ;;  %531 = vmatpush.bf16.msrb.mxu3 %v4549_v32 }
  0x36   :  { %493 = vmatpush.bf16.msrb.mxu0 %v4521_v31  ;;  %505 = vmatpush.bf16.msra.mxu1 %v4541_v42 }
  0x38   :  { %519 = vmatpush.bf16.msrb.mxu2 %v4529_v37  ;;  %532 = vmatpush.bf16.msrb.mxu3 %v4533_v38 }
  0x39   :  { %4504 = vmatmul.msk.bf16.gmra.mxu0 %vm114_vm1, %v5853_v39  ;;  %4507 = vmatmul.msk.bf16.gmra.mxu1 %vm114_vm1, %v6615_v62 }
  0x3a   :  { %506 = vmatpush.bf16.msra.mxu1 %v4525_v45 }
  0x3b   :  { %4512 = vmatmul.msk.bf16.gmra.mxu2 %vm114_vm1, %v5853_v39  ;;  %4516 = vmatmul.msk.bf16.gmra.mxu3 %vm114_vm1, %v5853_v39 }
  0x49   :  { %4508 = vmatmul.msk.bf16.gmra.mxu1 %vm114_vm1, %v5853_v39  ;;  %494 = vmatmul.bf16.vlgmr.msrb.gmra.mxu0 %v293_v47 }
  0x4b   :  { %4513 = vmatmul.msk.bf16.gmra.mxu2 %vm114_vm1, %v6600_v18  ;;  %4517 = vmatmul.msk.bf16.gmra.mxu3 %vm114_vm1, %v6600_v18 }
  0x59   :  { %4509 = vmatmul.msk.bf16.gmra.mxu1 %vm114_vm1, %v6600_v18  ;;  %v6652_v18 = vperm.slane %v78_v48, 3 }
  0x5b   :  { %520 = vmatmul.bf16.vlgmr.msrb.gmra.mxu2 %v293_v47  ;;  %533 = vmatmul.bf16.vlgmr.msrb.gmra.mxu3 %v293_v47 }
  0x69   :  { %507 = vmatmul.bf16.vlgmr.msra.gmra.mxu1 %v293_v47 }
  0x96   :  { %v145_v50 = vpop.f32.mrf.mxu0  ;;  %v160_v51 = vpop.f32.mrf.mxu1 }
  0x97   :  { %v146_v52 = vadd.f32 %v145_v50, %v6646_v49  ;;  %v161_v53 = vadd.f32 %v160_v51, %v6646_v49  ;;  %v4763_v50 = vld [vmem:[#allocation7 + $0xe0] sm:$0xf] }
  0x99   :  { %252 = vst [vmem:[#allocation2 + $0xb0] sm:$0xff] %v146_v52 }
  0x9a   :  { %276 = vst [vmem:[#allocation2 + $0xa8] sm:$0xff] %v161_v53  ;;  %v5917_v53 = vld [vmem:[#allocation7 + $0xec] sm:$0xf0] }
  0x9e   :  { %v203_v55 = vpop.f32.mrf.mxu2  ;;  %v232_v56 = vpop.f32.mrf.mxu3 }
  0x9f   :  { %v204_v57 = vadd.f32 %v203_v55, %v6650_v54  ;;  %v233_v58 = vadd.f32 %v232_v56, %v6652_v18  ;;  %v147_v59 = vpop.f32.mrf.mxu0  ;;  %v162_v60 = vpop.f32.mrf.mxu1  ;;  %v5915_v55 = vld [vmem:[#allocation7 + $0xe4] sm:$0xf]  ;;  %v4765_v56 = vld [vmem:[#allocation7 + $0xf0] sm:$0xf0] }
  0xa0   :  { %v148_v61 = vadd.f32 %v147_v59, %v6646_v49  ;;  %v163_v62 = vadd.f32 %v162_v60, %v6646_v49  ;;  %v289_v46 = vld [vmem:[#allocation2 + $0xb0] sm:$0x3]  ;;  %v4771_v60 = vld [vmem:[#allocation7 + $0xe8] sm:$0xf] }
  0xa1   :  { %254 = vst [vmem:[#allocation2 + $0xd8] sm:$0xff] %v204_v57 }
  0xa2   :  { %255 = vst [vmem:[#allocation2 + $0x18] sm:$0xff] %v233_v58 }
  0xa3   :  { %256 = vst [vmem:[#allocation2 + $0x50] sm:$0xff] %v148_v61 }
  0xa4   :  { %280 = vst [vmem:[#allocation2 + $0xa0] sm:$0xff] %v163_v62  ;;  %v4764_v62 = vor.u32 %v5917_v53, %v4763_v50  ;;  %v4699_v50 = vld [vmem:[#allocation7 + $0x60] sm:$0xf] }
  0xa6   :  { %v205_v0 = vpop.f32.mrf.mxu2  ;;  %v234_v1 = vpop.f32.mrf.mxu3  ;;  %806 = vmatpush.bf16.msra.mxu0 %v4764_v62 }
  0xa7   :  { %v206_v2 = vadd.f32 %v205_v0, %v6650_v54  ;;  %v235_v3 = vadd.f32 %v234_v1, %v6652_v18  ;;  %v150_v4 = vpop.f32.mrf.mxu0  ;;  %v174_v5 = vpop.f32.mrf.mxu1  ;;  %v4768_v0 = vor.u32 %v5915_v55, %v4765_v56  ;;  %v5918_v1 = vld [vmem:[#allocation7 + $0xf4] sm:$0xf0] }
  0xa8   :  { %v151_v6 = vadd.f32 %v150_v4, %v6646_v49  ;;  %v175_v8 = vadd.f32 %v174_v5, %v6658_v63  ;;  %v4772_v4 = vor.u32 %v5918_v1, %v4771_v60  ;;  %v4709_v1 = vld [vmem:[#allocation7 + $0x78] sm:$0xf0] }
  0xa9   :  { %258 = vst [vmem:[#allocation2 + $0x30] sm:$0xff] %v206_v2  ;;  %v5916_v2 = vld [vmem:[#allocation7 + $0xec] sm:$0xf]  ;;  %819 = vmatpush.bf16.msrb.mxu1 %v4768_v0 }
  0xaa   :  { %259 = vst [vmem:[#allocation2 + $0x48] sm:$0xff] %v235_v3  ;;  %v4773_v3 = vld [vmem:[#allocation7 + $0xf8] sm:$0xf0]  ;;  %832 = vmatpush.bf16.msra.mxu2 %v4772_v4  ;;  %v5900_v0 = vld [vmem:[#allocation7 + $0x6c] sm:$0xf] }
  0xab   :  { %260 = vst [vmem:[#allocation2 + $0x80] sm:$0xff] %v151_v6  ;;  %v4776_v5 = vor.u32 %v5916_v2, %v4773_v3  ;;  %v4747_v6 = vld [vmem:[#allocation7 + $0xc0] sm:$0xf]  ;;  %v4712_v4 = vor.u32 %v5900_v0, %v4709_v1 }
  0xac   :  { %253 = vst [vmem:[#allocation2] sm:$0xff] %v175_v8  ;;  %v5913_v8 = vld [vmem:[#allocation7 + $0xcc] sm:$0xf0]  ;;  %v4683_v2 = vld [vmem:[#allocation7 + $0x40] sm:$0xf] }
  0xad   :  { %845 = vmatpush.bf16.msra.mxu3 %v4776_v5  ;;  %v5897_v5 = vld [vmem:[#allocation7 + $0x4c] sm:$0xf0] }
  0xae   :  { %v208_v9 = vpop.f32.mrf.mxu2  ;;  %v237_v10 = vpop.f32.mrf.mxu3 }
  0xaf   :  { %v209_v11 = vadd.f32 %v208_v9, %v6650_v54  ;;  %v238_v12 = vadd.f32 %v237_v10, %v6652_v18  ;;  %v152_v13 = vpop.f32.mrf.mxu0  ;;  %v176_v14 = vpop.f32.mrf.mxu1  ;;  %v4749_v9 = vld [vmem:[#allocation7 + $0xd0] sm:$0xf0] }
  0xb0   :  { %v153_v15 = vadd.f32 %v152_v13, %v6646_v49  ;;  %v177_v16 = vadd.f32 %v176_v14, %v6658_v63  ;;  %v5912_v14 = vld [vmem:[#allocation7 + $0xcc] sm:$0xf] }
  0xb1   :  { %262 = vst [vmem:[#allocation2 + $0xe8] sm:$0xff] %v209_v11  ;;  %v4755_v11 = vld [vmem:[#allocation7 + $0xc8] sm:$0xf] }
  0xb2   :  { %263 = vst [vmem:[#allocation2 + $0xb8] sm:$0xff] %v238_v12  ;;  %v5914_v12 = vld [vmem:[#allocation7 + $0xd4] sm:$0xf0] }
  0xb3   :  { %264 = vst [vmem:[#allocation2 + $0x60] sm:$0xff] %v153_v15  ;;  %v4756_v13 = vor.u32 %v5914_v12, %v4755_v11  ;;  %v4757_v15 = vld [vmem:[#allocation7 + $0xd8] sm:$0xf0]  ;;  %v4684_v11 = vor.u32 %v5897_v5, %v4683_v2 }
  0xb4   :  { %257 = vst [vmem:[#allocation2 + $0x68] sm:$0xff] %v177_v16  ;;  %v4760_v16 = vor.u32 %v5912_v14, %v4757_v15 }
  0xb5   :  { %833 = vmatpush.bf16.msra.mxu2 %v4756_v13  ;;  %v4693_v13 = vld [vmem:[#allocation7 + $0x58] sm:$0xf0] }
  0xb6   :  { %v210_v17 = vpop.f32.mrf.mxu2  ;;  %v239_v7 = vpop.f32.mrf.mxu3  ;;  %846 = vmatpush.bf16.msra.mxu3 %v4760_v16  ;;  %v4667_v16 = vld [vmem:[#allocation7 + $0x20] sm:$0xf] }
  0xb7   :  { %v211_v19 = vadd.f32 %v210_v17, %v6650_v54  ;;  %v240_v20 = vadd.f32 %v239_v7, %v6652_v18  ;;  %v155_v21 = vpop.f32.mrf.mxu0  ;;  %v179_v22 = vpop.f32.mrf.mxu1  ;;  %v4731_v17 = vld [vmem:[#allocation7 + $0xa0] sm:$0xf]  ;;  %v5909_v7 = vld [vmem:[#allocation7 + $0xac] sm:$0xf0] }
  0xb8   :  { %v156_v23 = vadd.f32 %v155_v21, %v6646_v49  ;;  %v180_v24 = vadd.f32 %v179_v22, %v6658_v63  ;;  %v4732_v22 = vor.u32 %v5909_v7, %v4731_v17  ;;  %v5893_v17 = vld [vmem:[#allocation7 + $0x2c] sm:$0xf0]  ;;  %v5891_v7 = vld [vmem:[#allocation7 + $0x24] sm:$0xf] }
  0xb9   :  { %266 = vst [vmem:[#allocation2 + $0x8] sm:$0xff] %v211_v19  ;;  %v291_v19 = vld [vmem:[#allocation2 + $0xd8] sm:$0x3] }
  0xba   :  { %267 = vst [vmem:[#allocation2 + $0x78] sm:$0xff] %v240_v20 }
  0xbb   :  { %268 = vst [vmem:[#allocation2 + $0x38] sm:$0xff] %v156_v23  ;;  %v5907_v23 = vld [vmem:[#allocation7 + $0xa4] sm:$0xf] }
  0xbc   :  { %261 = vst [vmem:[#allocation2 + $0x88] sm:$0xff] %v180_v24  ;;  %v4733_v24 = vld [vmem:[#allocation7 + $0xb0] sm:$0xf0] }
  0xbe   :  { %v213_v25 = vpop.f32.mrf.mxu2  ;;  %v242_v26 = vpop.f32.mrf.mxu3 }
  0xbf   :  { %v214_v27 = vadd.f32 %v213_v25, %v6650_v54  ;;  %v243_v28 = vadd.f32 %v242_v26, %v6652_v18  ;;  %v157_v29 = vpop.f32.mrf.mxu0  ;;  %v181_v30 = vpop.f32.mrf.mxu1 }
  0xc0   :  { %v158_v31 = vadd.f32 %v157_v29, %v6646_v49  ;;  %v182_v32 = vadd.f32 %v181_v30, %v6658_v63  ;;  %v5910_v29 = vld [vmem:[#allocation7 + $0xb4] sm:$0xf0]  ;;  %v5908_v30 = vld [vmem:[#allocation7 + $0xac] sm:$0xf] }
  0xc1   :  { %270 = vst [vmem:[#allocation2 + $0x40] sm:$0xff] %v214_v27  ;;  %v4736_v27 = vor.u32 %v5907_v23, %v4733_v24  ;;  %v5892_v24 = vld [vmem:[#allocation7 + $0x2c] sm:$0xf] }
  0xc2   :  { %271 = vst [vmem:[#allocation2 + $0xc8] sm:$0xff] %v243_v28  ;;  %v4739_v28 = vld [vmem:[#allocation7 + $0xa8] sm:$0xf] }
  0xc3   :  { %272 = vst [vmem:[#allocation2 + $0xe0] sm:$0xff] %v158_v31 }
  0xc4   :  { %265 = vst [vmem:[#allocation2 + $0xf0] sm:$0xff] %v182_v32 }
  0xc6   :  { %v215_v33 = vpop.f32.mrf.mxu2  ;;  %v244_v34 = vpop.f32.mrf.mxu3 }
  0xc7   :  { %v216_v35 = vadd.f32 %v215_v33, %v6650_v54  ;;  %v245_v36 = vadd.f32 %v244_v34, %v6652_v18  ;;  %v184_v37 = vpop.f32.mrf.mxu1  ;;  %v495_v38 = vpop.f32.mrf.mxu0  ;;  %v4740_v33 = vor.u32 %v5910_v29, %v4739_v28  ;;  %v4741_v34 = vld [vmem:[#allocation7 + $0xb8] sm:$0xf0]  ;;  %v4651_v29 = vld [vmem:[#allocation7] sm:$0xf] }
  0xc8   :  { %v185_v39 = vadd.f32 %v184_v37, %v6658_v63  ;;  %v538_v48 = vadd.f32 %v495_v38, %v289_v46  ;;  %v5905_v37 = vld [vmem:[#allocation7 + $0x8c] sm:$0xf0] }
  0xc9   :  { %274 = vst [vmem:[#allocation2 + $0x70] sm:$0xff] %v216_v35  ;;  %v4744_v35 = vor.u32 %v5908_v30, %v4741_v34  ;;  %834 = vmatpush.bf16.msra.mxu2 %v4740_v33  ;;  %v5889_v30 = vld [vmem:[#allocation7 + $0xc] sm:$0xf0]  ;;  %v5887_v34 = vld [vmem:[#allocation7 + $0x4] sm:$0xf] }
  0xca   :  { %275 = vst [vmem:[#allocation2 + $0xc0] sm:$0xff] %v245_v36  ;;  %v4646_v49 = vmul.f32 -1.442695, %v538_v48  ;;  %v4715_v36 = vld [vmem:[#allocation7 + $0x80] sm:$0xf] }
  0xcb   :  { %269 = vst [vmem:[#allocation2 + $0x58] sm:$0xff] %v185_v39  ;;  %v4716_v39 = vor.u32 %v5905_v37, %v4715_v36  ;;  %847 = vmatpush.bf16.msra.mxu3 %v4744_v35  ;;  %v290_v48 = vld [vmem:[#allocation2] sm:$0x3]  ;;  %v4653_v35 = vld [vmem:[#allocation7 + $0x10] sm:$0xf0] }
  0xcc   :  { %6182 = vpow2.f32 %v4646_v49  ;;  %v4659_v36 = vld [vmem:[#allocation7 + $0x8] sm:$0xf]  ;;  %v5890_v37 = vld [vmem:[#allocation7 + $0x14] sm:$0xf0] }
  0xce   :  { %v218_v40 = vpop.f32.mrf.mxu2  ;;  %v247_v41 = vpop.f32.mrf.mxu3 }
  0xcf   :  { %v219_v42 = vadd.f32 %v218_v40, %v6650_v54  ;;  %v248_v43 = vadd.f32 %v247_v41, %v6652_v18  ;;  %v186_v44 = vpop.f32.mrf.mxu1  ;;  %v497_v45 = vpop.f32.mrf.mxu0  ;;  %v5903_v40 = vld [vmem:[#allocation7 + $0x84] sm:$0xf]  ;;  %v4717_v41 = vld [vmem:[#allocation7 + $0x90] sm:$0xf0] }
  0xd0   :  { %v187_v47 = vadd.f32 %v186_v44, %v6658_v63  ;;  %v5906_v44 = vld [vmem:[#allocation7 + $0x94] sm:$0xf0]  ;;  %v5904_v45 = vld [vmem:[#allocation7 + $0x8c] sm:$0xf] }
  0xd1   :  { %278 = vst [vmem:[#allocation2 + $0x10] sm:$0xff] %v219_v42  ;;  %v4720_v42 = vor.u32 %v5903_v40, %v4717_v41  ;;  %v4661_v40 = vld [vmem:[#allocation7 + $0x18] sm:$0xf0] }
  0xd2   :  { %279 = vst [vmem:[#allocation2 + $0x28] sm:$0xff] %v248_v43  ;;  %v6183_v25 = vpop.eup %6182  ;;  %v4723_v43 = vld [vmem:[#allocation7 + $0x88] sm:$0xf] }
  0xd3   :  { %273 = vst [vmem:[#allocation2 + $0x90] sm:$0xff] %v187_v47  ;;  %v6688_v38 = vadd.f32 1.0, %v6183_v25  ;;  %v4724_v46 = vor.u32 %v5906_v44, %v4723_v43  ;;  %v4725_v47 = vld [vmem:[#allocation7 + $0x98] sm:$0xf0]  ;;  %v4652_v43 = vor.u32 %v5889_v30, %v4651_v29  ;;  %v4656_v44 = vor.u32 %v5887_v34, %v4653_v35  ;;  %v4878_v34 = vld [vmem:[#allocation7 + $0xc0] sm:$0xf] }
  0xd4   :  { %v4728_v49 = vor.u32 %v5904_v45, %v4725_v47  ;;  %v4677_v25 = vld [vmem:[#allocation7 + $0x38] sm:$0xf0]  ;;  %v5945_v35 = vld [vmem:[#allocation7 + $0xcc] sm:$0xf0] }
  0xd5   :  { %6184 = vrcp.f32 %v6688_v38  ;;  %835 = vmatpush.bf16.msra.mxu2 %v4724_v46  ;;  %v4680_v33 = vor.u32 %v5892_v24, %v4677_v25  ;;  %vm559_vm3 = vweird.f32 %v6688_v38  ;;  %v5947_v24 = vld [vmem:[#allocation7 + $0xe4] sm:$0xf] }
  0xd6   :  { %v220_v51 = vpop.f32.mrf.mxu2  ;;  %v249_v52 = vpop.f32.mrf.mxu3  ;;  %848 = vmatpush.bf16.msra.mxu3 %v4728_v49  ;;  %v292_v49 = vld [vmem:[#allocation2 + $0x18] sm:$0x3] }
  0xd7   :  { %v221_v57 = vadd.f32 %v220_v51, %v6650_v54  ;;  %v250_v58 = vadd.f32 %v249_v52, %v6652_v18  ;;  %v189_v59 = vpop.f32.mrf.mxu1  ;;  %v4748_v54 = vor.u32 %v5913_v8, %v4747_v6  ;;  %v5911_v18 = vld [vmem:[#allocation7 + $0xc4] sm:$0xf]  ;;  %v5901_v51 = vld [vmem:[#allocation7 + $0x6c] sm:$0xf0]  ;;  %v4685_v8 = vld [vmem:[#allocation7 + $0x50] sm:$0xf0] }
  0xd8   :  { %v190_v61 = vadd.f32 %v189_v59, %v6658_v63  ;;  %v4752_v10 = vor.u32 %v5911_v18, %v4749_v9  ;;  %v5899_v52 = vld [vmem:[#allocation7 + $0x64] sm:$0xf]  ;;  %v4700_v56 = vor.u32 %v5901_v51, %v4699_v50  ;;  %v5902_v59 = vld [vmem:[#allocation7 + $0x74] sm:$0xf0]  ;;  %v5896_v9 = vld [vmem:[#allocation7 + $0x4c] sm:$0xf] }
  0xd9   :  { %282 = vst [vmem:[#allocation2 + $0x20] sm:$0xff] %v221_v57  ;;  %807 = vmatpush.bf16.msra.mxu0 %v4748_v54  ;;  %v4701_v57 = vld [vmem:[#allocation7 + $0x70] sm:$0xf0]  ;;  %v5895_v6 = vld [vmem:[#allocation7 + $0x44] sm:$0xf]  ;;  %v4696_v15 = vor.u32 %v5896_v9, %v4693_v13 }
  0xda   :  { %283 = vst [vmem:[#allocation2 + $0x98] sm:$0xff] %v250_v58  ;;  %820 = vmatpush.bf16.msrb.mxu1 %v4752_v10  ;;  %v4707_v58 = vld [vmem:[#allocation7 + $0x68] sm:$0xf]  ;;  %v5898_v18 = vld [vmem:[#allocation7 + $0x54] sm:$0xf0]  ;;  %v4688_v12 = vor.u32 %v5895_v6, %v4685_v8  ;;  %849 = vmatpush.bf16.msra.mxu3 %v4712_v4 }
  0xdb   :  { %277 = vst [vmem:[#allocation2 + $0xd0] sm:$0xff] %v190_v61  ;;  %v4704_v61 = vor.u32 %v5899_v52, %v4701_v57  ;;  %v4708_v62 = vor.u32 %v5902_v59, %v4707_v58  ;;  %v4691_v54 = vld [vmem:[#allocation7 + $0x48] sm:$0xf]  ;;  %v6691_v23 = vpop.eup %6184  ;;  %v565_v58 = vand.u32 2147483648, %v6688_v38  ;;  %v563_v59 = vand.u32 2147483647, %v6688_v38 }
  0xdc   :  { %v4692_v14 = vor.u32 %v5898_v18, %v4691_v54  ;;  %v555_v41 = vmul.f32 %v6691_v23, %v6688_v38  ;;  %vm560_vm2 = vweird.f32 %v6691_v23  ;;  %v285_v6 = vld [vmem:[%s7352_s2] sm:$0x3] }
  0xdd   :  { %808 = vmatpush.bf16.msra.mxu0 %v4732_v22  ;;  %836 = vmatpush.bf16.msra.mxu2 %v4708_v62  ;;  %v5894_v22 = vld [vmem:[#allocation7 + $0x34] sm:$0xf0]  ;;  %vm561_vm4 = vmor %vm559_vm3, %vm560_vm2  ;;  %v566_v2 = vor.u32 1.1754944e-38, %v565_v58  ;;  %vm564_vm6 = vcmp.eq.f32.partialorder %v563_v59, 8.507059e+37  ;;  %v4846_v59 = vld [vmem:[#allocation7 + $0x80] sm:$0xf] }
  0xde   :  { %v521_v20 = vpop.f32.mrf.mxu2  ;;  %v6685_v21 = vpop.f32.mrf.mxu3  ;;  %821 = vmatpush.bf16.msrb.mxu1 %v4736_v27  ;;  %v4668_v27 = vor.u32 %v5893_v17, %v4667_v16  ;;  %850 = vmatpush.bf16.msra.mxu3 %v4696_v15 }
  0xdf   :  { %v191_v26 = vpop.f32.mrf.mxu1  ;;  %v540_v31 = vadd.f32 %v521_v20, %v291_v19  ;;  %v4669_v19 = vld [vmem:[#allocation7 + $0x30] sm:$0xf0]  ;;  %v4675_v20 = vld [vmem:[#allocation7 + $0x28] sm:$0xf]  ;;  %v541_v51 = vadd.f32 %v6685_v21, %v292_v49 }
  0xe0   :  { %v192_v32 = vadd.f32 %v191_v26, %v6658_v63  ;;  %v4672_v28 = vor.u32 %v5891_v7, %v4669_v19 }
  0xe1   :  { %v4648_v63 = vmul.f32 -1.442695, %v540_v31  ;;  %809 = vmatpush.bf16.msra.mxu0 %v4716_v39  ;;  %837 = vmatpush.bf16.msra.mxu2 %v4692_v14  ;;  %v5888_v39 = vld [vmem:[#allocation7 + $0xc] sm:$0xf] }
  0xe2   :  { %281 = vst [vmem:[#allocation2 + $0xf8] sm:$0xff] %v192_v32  ;;  %822 = vmatpush.bf16.msrb.mxu1 %v4720_v42  ;;  %v4676_v32 = vor.u32 %v5894_v22, %v4675_v20  ;;  %851 = vmatpush.bf16.msra.mxu3 %v4680_v33  ;;  %v4664_v46 = vor.u32 %v5888_v39, %v4661_v40  ;;  %v4894_v22 = vld [vmem:[#allocation7 + $0xe0] sm:$0xf]  ;;  %v4880_v39 = vld [vmem:[#allocation7 + $0xd0] sm:$0xf0] }
  0xe3   :  { %6186 = vpow2.f32 %v4648_v63  ;;  %v4660_v63 = vor.u32 %v5890_v37, %v4659_v36  ;;  %v5943_v36 = vld [vmem:[#allocation7 + $0xc4] sm:$0xf]  ;;  %v4879_v37 = vor.u32 %v5945_v35, %v4878_v34  ;;  %v4886_v40 = vld [vmem:[#allocation7 + $0xc8] sm:$0xf]  ;;  %v5930_v34 = vld [vmem:[#allocation7 + $0x54] sm:$0xf0] }
  0xe5   :  { %810 = vmatpush.bf16.msra.mxu0 %v4700_v56  ;;  %838 = vmatpush.bf16.msra.mxu2 %v4676_v32  ;;  %v4904_v32 = vld [vmem:[#allocation7 + $0xf8] sm:$0xf0] }
  0xe6   :  { %v523_v53 = vpop.f32.mrf.mxu2  ;;  %v536_v55 = vpop.f32.mrf.mxu3  ;;  %823 = vmatpush.bf16.msrb.mxu1 %v4704_v61  ;;  %852 = vmatpush.bf16.msra.mxu3 %v4664_v46  ;;  %v4862_v46 = vld [vmem:[#allocation7 + $0xa0] sm:$0xf] }
  0xe7   :  { %v508_v60 = vpop.f32.mrf.mxu1 }
  0xe8   :  { %v539_v3 = vadd.f32 %v508_v60, %v290_v48  ;;  %v556_v48 = vsub.f32 1.0, %v555_v41  ;;  %v5946_v41 = vld [vmem:[#allocation7 + $0xd4] sm:$0xf0] }
  0xe9   :  { %v6187_v26 = vpop.eup %6186  ;;  %811 = vmatpush.bf16.msra.mxu0 %v4684_v11  ;;  %839 = vmatpush.bf16.msra.mxu2 %v4660_v63 }
  0xea   :  { %v4647_v10 = vmul.f32 -1.442695, %v539_v3  ;;  %824 = vmatpush.bf16.msrb.mxu1 %v4688_v12  ;;  %v6695_v42 = vadd.f32 1.0, %v6187_v26  ;;  %v557_v50 = vmul.f32 %v6691_v23, %v556_v48  ;;  %v4896_v26 = vld [vmem:[#allocation7 + $0xf0] sm:$0xf0] }
  0xeb   :  { %v4899_v29 = vor.u32 %v5947_v24, %v4896_v26  ;;  %v5939_v48 = vld [vmem:[#allocation7 + $0xa4] sm:$0xf] }
  0xec   :  { %6188 = vpow2.f32 %v4647_v10  ;;  %v558_v55 = vadd.f32 %v6691_v23, %v557_v50  ;;  %v595_v13 = vand.u32 2147483648, %v6695_v42  ;;  %vm589_vm11 = vweird.f32 %v6695_v42  ;;  %v4864_v50 = vld [vmem:[#allocation7 + $0xb0] sm:$0xf0] }
  0xed   :  { %812 = vmatpush.bf16.msra.mxu0 %v4668_v27  ;;  %6190 = vrcp.f32 %v6695_v42  ;;  %v593_v14 = vand.u32 2147483647, %v6695_v42  ;;  %v4902_v27 = vld [vmem:[#allocation7 + $0xe8] sm:$0xf] }
  0xee   :  { %825 = vmatpush.bf16.msrb.mxu1 %v4672_v28  ;;  %v562_v21 = vsel %vm561_vm4, %v6691_v23, %v558_v55  ;;  %v596_v16 = vor.u32 1.1754944e-38, %v595_v13  ;;  %v5949_v23 = vld [vmem:[#allocation7 + $0xec] sm:$0xf0]  ;;  %v5950_v28 = vld [vmem:[#allocation7 + $0xf4] sm:$0xf0] }
  0xef   :  { %v510_v31 = vpop.f32.mrf.mxu1  ;;  %v567_v5 = vsel %vm564_vm6, %v566_v2, %v562_v21  ;;  %vm594_vm13 = vcmp.eq.f32.partialorder %v593_v14, 8.507059e+37  ;;  %v4895_v25 = vor.u32 %v5949_v23, %v4894_v22  ;;  %v4903_v30 = vor.u32 %v5950_v28, %v4902_v27  ;;  %v5932_v22 = vld [vmem:[#allocation7 + $0x6c] sm:$0xf]  ;;  %v4840_v23 = vld [vmem:[#allocation7 + $0x78] sm:$0xf0] }
  0xf0   :  { %v5948_v31 = vld [vmem:[#allocation7 + $0xec] sm:$0xf]  ;;  %v4843_v26 = vor.u32 %v5932_v22, %v4840_v23  ;;  %v4814_v27 = vld [vmem:[#allocation7 + $0x40] sm:$0xf]  ;;  %v5929_v28 = vld [vmem:[#allocation7 + $0x4c] sm:$0xf0] }
  0xf1   :  { %813 = vmatpush.bf16.msra.mxu0 %v4652_v43  ;;  %v4907_v33 = vor.u32 %v5948_v31, %v4904_v32  ;;  %1153 = vmatpush.bf16.msrb.mxu2 %v4903_v30  ;;  %v4887_v43 = vor.u32 %v5946_v41, %v4886_v40  ;;  %v611_v30 = vld [vmem:[#allocation2 + $0x30] sm:$0x3]  ;;  %v4815_v31 = vor.u32 %v5929_v28, %v4814_v27  ;;  %v4816_v32 = vld [vmem:[#allocation7 + $0x50] sm:$0xf0]  ;;  %v4798_v40 = vld [vmem:[#allocation7 + $0x20] sm:$0xf] }
  0xf2   :  { %v6189_v45 = vpop.eup %6188  ;;  %826 = vmatpush.bf16.msrb.mxu1 %v4656_v44  ;;  %v5944_v44 = vld [vmem:[#allocation7 + $0xcc] sm:$0xf] }
  0xf3   :  { %v552_v47 = vadd.f32 1.0, %v6189_v45  ;;  %v6191_v52 = vpop.eup %6190  ;;  %1166 = vmatpush.bf16.msrb.mxu3 %v4907_v33  ;;  %v4888_v45 = vld [vmem:[#allocation7 + $0xd8] sm:$0xf0]  ;;  %v4822_v33 = vld [vmem:[#allocation7 + $0x48] sm:$0xf] }
  0xf4   :  { %v585_v57 = vmul.f32 %v6191_v52, %v6695_v42  ;;  %vm590_vm10 = vweird.f32 %v6191_v52  ;;  %v4883_v42 = vor.u32 %v5943_v36, %v4880_v39  ;;  %v4891_v63 = vor.u32 %v5944_v44, %v4888_v45  ;;  %v4824_v39 = vld [vmem:[#allocation7 + $0x58] sm:$0xf0]  ;;  %v5925_v44 = vld [vmem:[#allocation7 + $0x2c] sm:$0xf0]  ;;  %v5923_v45 = vld [vmem:[#allocation7 + $0x24] sm:$0xf] }
  0xf5   :  { %6192 = vrcp.f32 %v552_v47  ;;  %v580_v61 = vand.u32 2147483648, %v552_v47  ;;  %v578_v0 = vand.u32 2147483647, %v552_v47  ;;  %vm574_vm7 = vweird.f32 %v552_v47  ;;  %vm591_vm12 = vmor %vm589_vm11, %vm590_vm10  ;;  %1127 = vmatpush.bf16.msrb.mxu0 %v4895_v25  ;;  %1154 = vmatpush.bf16.msrb.mxu2 %v4887_v43 }
  0xf6   :  { %6194 = vtanh.f32 %v541_v51  ;;  %v586_v1 = vsub.f32 1.0, %v585_v57  ;;  %1140 = vmatpush.bf16.msra.mxu1 %v4899_v29  ;;  %v4870_v51 = vld [vmem:[#allocation7 + $0xa8] sm:$0xf]  ;;  %v4872_v57 = vld [vmem:[#allocation7 + $0xb8] sm:$0xf0]  ;;  %v4823_v36 = vor.u32 %v5930_v34, %v4822_v33 }
  0xf7   :  { %v581_v38 = vor.u32 1.1754944e-38, %v580_v61  ;;  %vm579_vm9 = vcmp.eq.f32.partialorder %v578_v0, 8.507059e+37  ;;  %1167 = vmatpush.bf16.msrb.mxu3 %v4891_v63  ;;  %v5935_v61 = vld [vmem:[#allocation7 + $0x84] sm:$0xf]  ;;  %v4854_v0 = vld [vmem:[#allocation7 + $0x88] sm:$0xf] }
  0xf8   :  { %v587_v54 = vmul.f32 %v6191_v52, %v586_v1  ;;  %v5938_v1 = vld [vmem:[#allocation7 + $0x94] sm:$0xf0]  ;;  %v5927_v29 = vld [vmem:[#allocation7 + $0x44] sm:$0xf]  ;;  %v4800_v63 = vld [vmem:[#allocation7 + $0x30] sm:$0xf0] }
  0xf9   :  { %1128 = vmatpush.bf16.msrb.mxu0 %v4879_v37  ;;  %v4819_v35 = vor.u32 %v5927_v29, %v4816_v32  ;;  %v5928_v37 = vld [vmem:[#allocation7 + $0x4c] sm:$0xf] }
  0xfa   :  { %v588_v12 = vadd.f32 %v6191_v52, %v587_v54  ;;  %1141 = vmatpush.bf16.msra.mxu1 %v4883_v42  ;;  %v4827_v43 = vor.u32 %v5928_v37, %v4824_v39 }
  0xfb   :  { %v6193_v53 = vpop.eup %6192 }
  0xfc   :  { %v570_v56 = vmul.f32 %v6193_v53, %v552_v47  ;;  %vm575_vm5 = vweird.f32 %v6193_v53  ;;  %v6195_v4 = vpop.eup %6194  ;;  %v592_v15 = vsel %vm591_vm12, %v6191_v52, %v588_v12  ;;  %v5941_v47 = vld [vmem:[#allocation7 + $0xac] sm:$0xf0]  ;;  %v5942_v52 = vld [vmem:[#allocation7 + $0xb4] sm:$0xf0]  ;;  %v5931_v12 = vld [vmem:[#allocation7 + $0x64] sm:$0xf] }
  0xfd   :  { %vm576_vm8 = vmor %vm574_vm7, %vm575_vm5  ;;  %v601_v9 = vmul.f32 %v6195_v4, %v567_v5  ;;  %v597_v7 = vsel %vm594_vm13, %v596_v16, %v592_v15  ;;  %v4863_v49 = vor.u32 %v5941_v47, %v4862_v46  ;;  %v4871_v55 = vor.u32 %v5942_v52, %v4870_v51  ;;  %v5936_v4 = vld [vmem:[#allocation7 + $0x8c] sm:$0xf]  ;;  %v4856_v5 = vld [vmem:[#allocation7 + $0x98] sm:$0xf0] }
  0xfe   :  { %v571_v60 = vsub.f32 1.0, %v570_v56  ;;  %v5940_v56 = vld [vmem:[#allocation7 + $0xac] sm:$0xf]  ;;  %v4832_v16 = vld [vmem:[#allocation7 + $0x70] sm:$0xf0] }
  0xff   :  { %1129 = vmatpush.bf16.msrb.mxu0 %v4863_v49  ;;  %v4875_v58 = vor.u32 %v5940_v56, %v4872_v57  ;;  %1155 = vmatpush.bf16.msrb.mxu2 %v4871_v55  ;;  %v4799_v49 = vor.u32 %v5925_v44, %v4798_v40  ;;  %v5926_v51 = vld [vmem:[#allocation7 + $0x34] sm:$0xf0]  ;;  %v5924_v52 = vld [vmem:[#allocation7 + $0x2c] sm:$0xf]  ;;  %v4808_v56 = vld [vmem:[#allocation7 + $0x38] sm:$0xf0] }
 0x100   :  { %v572_v62 = vmul.f32 %v6193_v53, %v571_v60  ;;  %v5937_v60 = vld [vmem:[#allocation7 + $0x8c] sm:$0xf0]  ;;  %v4782_v57 = vld [vmem:[#allocation7] sm:$0xf] }
 0x101   :  { %1168 = vmatpush.bf16.msrb.mxu3 %v4875_v58  ;;  %v4847_v21 = vor.u32 %v5937_v60, %v4846_v59  ;;  %v5921_v58 = vld [vmem:[#allocation7 + $0xc] sm:$0xf0]  ;;  %v4811_v60 = vor.u32 %v5924_v52, %v4808_v56  ;;  %v5979_v56 = vld [vmem:[#allocation7 + $0xe4] sm:$0xf] }
 0x102   :  { %v573_v3 = vadd.f32 %v6193_v53, %v572_v62  ;;  %v4848_v62 = vld [vmem:[#allocation7 + $0x90] sm:$0xf0] }
 0x103   :  { %v4851_v2 = vor.u32 %v5935_v61, %v4848_v62  ;;  %1130 = vmatpush.bf16.msrb.mxu0 %v4847_v21  ;;  %v5919_v61 = vld [vmem:[#allocation7 + $0x4] sm:$0xf]  ;;  %v4784_v21 = vld [vmem:[#allocation7 + $0x10] sm:$0xf0] }
 0x104   :  { %v577_v8 = vsel %vm576_vm8, %v6193_v53, %v573_v3  ;;  %v4867_v53 = vor.u32 %v5939_v48, %v4864_v50  ;;  %v4855_v3 = vor.u32 %v5938_v1, %v4854_v0  ;;  %v4806_v50 = vld [vmem:[#allocation7 + $0x28] sm:$0xf]  ;;  %v4783_v0 = vor.u32 %v5921_v58, %v4782_v57  ;;  %v5027_v58 = vld [vmem:[#allocation7 + $0xf0] sm:$0xf0] }
 0x105   :  { %v582_v18 = vsel %vm579_vm9, %v581_v38, %v577_v8  ;;  %v610_v38 = vld [vmem:[#allocation2 + $0x68] sm:$0x3]  ;;  %v4859_v8 = vor.u32 %v5936_v4, %v4856_v5  ;;  %v4807_v55 = vor.u32 %v5926_v51, %v4806_v50 }
 0x106   :  { %v600_v10 = vmul.f32 %v582_v18, %v285_v6  ;;  %1142 = vmatpush.bf16.msra.mxu1 %v4867_v53  ;;  %v609_v6 = vld [vmem:[#allocation2 + $0x50] sm:$0x3]  ;;  %1156 = vmatpush.bf16.msrb.mxu2 %v4855_v3  ;;  %v4803_v53 = vor.u32 %v5923_v45, %v4800_v63  ;;  %v4790_v1 = vld [vmem:[#allocation7 + $0x8] sm:$0xf]  ;;  %v5920_v3 = vld [vmem:[#allocation7 + $0xc] sm:$0xf] }
 0x107   :  { %1169 = vmatpush.bf16.msrb.mxu3 %v4859_v8  ;;  %v4792_v8 = vld [vmem:[#allocation7 + $0x18] sm:$0xf0] }
 0x108   :  { %v6710_v11 = vadd.f32 %v601_v9, %v600_v10  ;;  %v4830_v9 = vld [vmem:[#allocation7 + $0x60] sm:$0xf]  ;;  %v5933_v10 = vld [vmem:[#allocation7 + $0x6c] sm:$0xf0] }
 0x109   :  { %v4831_v15 = vor.u32 %v5933_v10, %v4830_v9 }
 0x10a   :  { %6196 = vtanh.f32 %v6710_v11  ;;  %1143 = vmatpush.bf16.msra.mxu1 %v4851_v2  ;;  %v5922_v2 = vld [vmem:[#allocation7 + $0x14] sm:$0xf0] }
 0x10b   :  { %1131 = vmatpush.bf16.msrb.mxu0 %v4831_v15  ;;  %1170 = vmatpush.bf16.msrb.mxu3 %v4843_v26 }
 0x10f   :  { %1132 = vmatpush.bf16.msrb.mxu0 %v4815_v31  ;;  %1171 = vmatpush.bf16.msrb.mxu3 %v4827_v43 }
 0x110   :  { %v6197_v17 = vpop.eup %6196 }
 0x111   :  { %v604_v19 = vmul.f32 %v6197_v17, %v597_v7  ;;  %v4838_v17 = vld [vmem:[#allocation7 + $0x68] sm:$0xf]  ;;  %v5934_v7 = vld [vmem:[#allocation7 + $0x74] sm:$0xf0] }
 0x113   :  { %605 = vst [vmem:[#allocation3] sm:$0x3] %v604_v19  ;;  %v613_v20 = vpack.c.bf16 %v604_v19, %v604_v19  ;;  %v4835_v19 = vor.u32 %v5931_v12, %v4832_v16  ;;  %1133 = vmatpush.bf16.msrb.mxu0 %v4799_v49  ;;  %1172 = vmatpush.bf16.msrb.mxu3 %v4811_v60  ;;  %v5982_v60 = vld [vmem:[#allocation7 + $0xf4] sm:$0xf0] }
 0x115   :  { %814 = vmatmul.bf16.vlgmr.msra.gmra.mxu0 %v613_v20  ;;  %827 = vmatmul.bf16.vlgmr.msrb.gmra.mxu1 %v613_v20 }
 0x116   :  { %840 = vmatmul.bf16.vlgmr.msra.gmra.mxu2 %v613_v20  ;;  %853 = vmatmul.bf16.vlgmr.msra.gmra.mxu3 %v613_v20  ;;  %v4839_v20 = vor.u32 %v5934_v7, %v4838_v17 }
 0x117   :  { %1144 = vmatpush.bf16.msra.mxu1 %v4835_v19  ;;  %1134 = vmatpush.bf16.msrb.mxu0 %v4783_v0  ;;  %v5035_v0 = vld [vmem:[#allocation7 + $0xf8] sm:$0xf0] }
 0x118   :  { %1157 = vmatpush.bf16.msrb.mxu2 %v4839_v20 }
 0x11b   :  { %1145 = vmatpush.bf16.msra.mxu1 %v4819_v35 }
 0x11c   :  { %1158 = vmatpush.bf16.msrb.mxu2 %v4823_v36 }
 0x11f   :  { %1146 = vmatpush.bf16.msra.mxu1 %v4803_v53 }
 0x120   :  { %1159 = vmatpush.bf16.msrb.mxu2 %v4807_v55  ;;  %v5981_v55 = vld [vmem:[#allocation7 + $0xec] sm:$0xf0] }
 0x192   :  { %v815_v54 = vpop.f32.mrf.mxu0  ;;  %v828_v18 = vpop.f32.mrf.mxu1 }
 0x193   :  { %v858_v13 = vadd.f32 %v815_v54, %v609_v6  ;;  %v859_v14 = vadd.f32 %v828_v18, %v610_v38  ;;  %v4787_v6 = vor.u32 %v5919_v61, %v4784_v21  ;;  %v4791_v38 = vor.u32 %v5922_v2, %v4790_v1  ;;  %v5009_v2 = vld [vmem:[#allocation7 + $0xc0] sm:$0xf] }
 0x194   :  { %v4795_v18 = vor.u32 %v5920_v3, %v4792_v8  ;;  %v5030_v61 = vor.u32 %v5979_v56, %v5027_v58  ;;  %v5977_v3 = vld [vmem:[#allocation7 + $0xcc] sm:$0xf0]  ;;  %v5978_v8 = vld [vmem:[#allocation7 + $0xd4] sm:$0xf0] }
 0x195   :  { %v4777_v24 = vmul.f32 -1.442695, %v858_v13  ;;  %v4778_v25 = vmul.f32 -1.442695, %v859_v14  ;;  %1147 = vmatpush.bf16.msra.mxu1 %v4787_v6  ;;  %1160 = vmatpush.bf16.msrb.mxu2 %v4791_v38  ;;  %v612_v14 = vld [vmem:[#allocation2 + $0x48] sm:$0x3] }
 0x196   :  { %1173 = vmatpush.bf16.msrb.mxu3 %v4795_v18  ;;  %v5011_v6 = vld [vmem:[#allocation7 + $0xd0] sm:$0xf0]  ;;  %v5017_v38 = vld [vmem:[#allocation7 + $0xc8] sm:$0xf] }
 0x197   :  { %6198 = vpow2.f32 %v4777_v24  ;;  %v5018_v18 = vor.u32 %v5978_v8, %v5017_v38  ;;  %v4929_v38 = vld [vmem:[#allocation7 + $0x20] sm:$0xf]  ;;  %v5957_v8 = vld [vmem:[#allocation7 + $0x2c] sm:$0xf0] }
 0x198   :  { %6200 = vpow2.f32 %v4778_v25 }
 0x199   :  { %v841_v41 = vpop.f32.mrf.mxu2  ;;  %v854_v42 = vpop.f32.mrf.mxu3  ;;  %1461 = vmatpush.bf16.msrb.mxu1 %v5030_v61  ;;  %v5959_v61 = vld [vmem:[#allocation7 + $0x44] sm:$0xf] }
 0x19a   :  { %v860_v46 = vadd.f32 %v841_v41, %v611_v30  ;;  %v817_v47 = vpop.f32.mrf.mxu0  ;;  %v830_v48 = vpop.f32.mrf.mxu1  ;;  %v861_v16 = vadd.f32 %v854_v42, %v612_v14  ;;  %v5973_v14 = vld [vmem:[#allocation7 + $0xac] sm:$0xf0] }
 0x19c   :  { %v4779_v59 = vmul.f32 -1.442695, %v860_v46 }
 0x19d   :  { %v6199_v62 = vpop.eup %6198 }
 0x19e   :  { %v6201_v4 = vpop.eup %6200  ;;  %v871_v5 = vadd.f32 1.0, %v6199_v62  ;;  %6202 = vpow2.f32 %v4779_v59  ;;  %v5033_v59 = vld [vmem:[#allocation7 + $0xe8] sm:$0xf]  ;;  %v5980_v62 = vld [vmem:[#allocation7 + $0xec] sm:$0xf] }
 0x19f   :  { %v872_v54 = vadd.f32 1.0, %v6201_v4  ;;  %v5034_v21 = vor.u32 %v5982_v60, %v5033_v59  ;;  %v5038_v1 = vor.u32 %v5980_v62, %v5035_v0  ;;  %v5975_v4 = vld [vmem:[#allocation7 + $0xc4] sm:$0xf]  ;;  %v4945_v59 = vld [vmem:[#allocation7 + $0x40] sm:$0xf] }
 0x1a0   :  { %6204 = vrcp.f32 %v871_v5  ;;  %v885_v23 = vand.u32 2147483648, %v871_v5  ;;  %v883_v26 = vand.u32 2147483647, %v871_v5  ;;  %vm879_vm0 = vweird.f32 %v871_v5  ;;  %v5961_v60 = vld [vmem:[#allocation7 + $0x4c] sm:$0xf0] }
 0x1a1   :  { %6206 = vrcp.f32 %v872_v54  ;;  %v843_v9 = vpop.f32.mrf.mxu2  ;;  %v856_v10 = vpop.f32.mrf.mxu3  ;;  %v900_v24 = vand.u32 2147483648, %v872_v54  ;;  %v898_v28 = vand.u32 2147483647, %v872_v54  ;;  %vm894_vm1 = vweird.f32 %v872_v54  ;;  %1474 = vmatpush.bf16.msra.mxu2 %v5034_v21  ;;  %1487 = vmatpush.bf16.msra.mxu3 %v5038_v1  ;;  %v4947_v21 = vld [vmem:[#allocation7 + $0x50] sm:$0xf0] }
 0x1a2   :  { %v886_v32 = vor.u32 1.1754944e-38, %v885_v23  ;;  %vm884_vm4 = vcmp.eq.f32.partialorder %v883_v26, 8.507059e+37  ;;  %v5976_v9 = vld [vmem:[#allocation7 + $0xcc] sm:$0xf]  ;;  %v5019_v10 = vld [vmem:[#allocation7 + $0xd8] sm:$0xf0]  ;;  %v4946_v0 = vor.u32 %v5961_v60, %v4945_v59  ;;  %v4950_v1 = vor.u32 %v5959_v61, %v4947_v21 }
 0x1a3   :  { %v901_v34 = vor.u32 1.1754944e-38, %v900_v24  ;;  %vm899_vm5 = vcmp.eq.f32.partialorder %v898_v28, 8.507059e+37  ;;  %v5972_v23 = vld [vmem:[#allocation7 + $0xac] sm:$0xf]  ;;  %v5003_v24 = vld [vmem:[#allocation7 + $0xb8] sm:$0xf0] }
 0x1a4   :  { %v6203_v12 = vpop.eup %6202  ;;  %v4977_v26 = vld [vmem:[#allocation7 + $0x80] sm:$0xf]  ;;  %v5967_v28 = vld [vmem:[#allocation7 + $0x84] sm:$0xf]  ;;  %v932_v62 = vld [vmem:[#allocation2 + $0xe8] sm:$0x3] }
 0x1a5   :  { %v873_v13 = vadd.f32 1.0, %v6203_v12  ;;  %v5022_v12 = vor.u32 %v5976_v9, %v5019_v10  ;;  %1475 = vmatpush.bf16.msra.mxu2 %v5018_v18  ;;  %v4930_v10 = vor.u32 %v5957_v8, %v4929_v38 }
 0x1a6   :  { %v6205_v15 = vpop.eup %6204 }
 0x1a7   :  { %v6207_v17 = vpop.eup %6206  ;;  %v875_v7 = vmul.f32 %v6205_v15, %v871_v5  ;;  %6208 = vrcp.f32 %v873_v13  ;;  %vm880_vm14 = vweird.f32 %v6205_v15  ;;  %v915_v46 = vand.u32 2147483648, %v873_v13  ;;  %1488 = vmatpush.bf16.msra.mxu3 %v5022_v12  ;;  %v5955_v12 = vld [vmem:[#allocation7 + $0x24] sm:$0xf] }
 0x1a8   :  { %v890_v19 = vmul.f32 %v6207_v17, %v872_v54  ;;  %6210 = vtanh.f32 %v861_v16  ;;  %vm895_vm15 = vweird.f32 %v6207_v17  ;;  %vm881_vm2 = vmor %vm879_vm0, %vm880_vm14  ;;  %vm909_vm7 = vweird.f32 %v873_v13 }
 0x1a9   :  { %v876_v20 = vsub.f32 1.0, %v875_v7  ;;  %vm896_vm3 = vmor %vm894_vm1, %vm895_vm15  ;;  %v913_v47 = vand.u32 2147483647, %v873_v13  ;;  %v916_v49 = vor.u32 1.1754944e-38, %v915_v46  ;;  %v5010_v5 = vor.u32 %v5977_v3, %v5009_v2  ;;  %v5001_v7 = vld [vmem:[#allocation7 + $0xa8] sm:$0xf] }
 0x1aa   :  { %v891_v22 = vsub.f32 1.0, %v890_v19  ;;  %v5014_v54 = vor.u32 %v5975_v4, %v5011_v6  ;;  %v5974_v19 = vld [vmem:[#allocation7 + $0xb4] sm:$0xf0]  ;;  %v4953_v2 = vld [vmem:[#allocation7 + $0x48] sm:$0xf] }
 0x1ab   :  { %v877_v25 = vmul.f32 %v6205_v15, %v876_v20  ;;  %vm914_vm9 = vcmp.eq.f32.partialorder %v913_v47, 8.507059e+37  ;;  %v4963_v47 = vld [vmem:[#allocation7 + $0x70] sm:$0xf0]  ;;  %v5962_v3 = vld [vmem:[#allocation7 + $0x54] sm:$0xf0] }
 0x1ac   :  { %v892_v27 = vmul.f32 %v6207_v17, %v891_v22  ;;  %1462 = vmatpush.bf16.msrb.mxu1 %v5014_v54  ;;  %v5002_v22 = vor.u32 %v5974_v19, %v5001_v7  ;;  %v5960_v4 = vld [vmem:[#allocation7 + $0x4c] sm:$0xf]  ;;  %v4955_v6 = vld [vmem:[#allocation7 + $0x58] sm:$0xf0]  ;;  %v5958_v19 = vld [vmem:[#allocation7 + $0x34] sm:$0xf0] }
 0x1ad   :  { %v6209_v29 = vpop.eup %6208  ;;  %v878_v30 = vadd.f32 %v6205_v15, %v877_v25  ;;  %v5006_v25 = vor.u32 %v5972_v23, %v5003_v24  ;;  %v4958_v9 = vor.u32 %v5960_v4, %v4955_v6 }
 0x1ae   :  { %v905_v31 = vmul.f32 %v6209_v29, %v873_v13  ;;  %v893_v33 = vadd.f32 %v6207_v17, %v892_v27  ;;  %v6211_v36 = vpop.eup %6210  ;;  %vm910_vm6 = vweird.f32 %v6209_v29  ;;  %v4993_v13 = vld [vmem:[#allocation7 + $0xa0] sm:$0xf]  ;;  %1476 = vmatpush.bf16.msra.mxu2 %v5002_v22  ;;  %v5969_v27 = vld [vmem:[#allocation7 + $0x8c] sm:$0xf0]  ;;  %v4939_v22 = vld [vmem:[#allocation7 + $0x38] sm:$0xf0] }
 0x1af   :  { %v882_v35 = vsel %vm881_vm2, %v6205_v15, %v878_v30  ;;  %vm911_vm8 = vmor %vm909_vm7, %vm910_vm6  ;;  %v5971_v15 = vld [vmem:[#allocation7 + $0xa4] sm:$0xf]  ;;  %v4994_v16 = vor.u32 %v5973_v14, %v4993_v13  ;;  %1489 = vmatpush.bf16.msra.mxu3 %v5006_v25  ;;  %v4979_v30 = vld [vmem:[#allocation7 + $0x90] sm:$0xf0] }
 0x1b0   :  { %v906_v37 = vsub.f32 1.0, %v905_v31  ;;  %v887_v39 = vsel %vm884_vm4, %v886_v32, %v882_v35  ;;  %v897_v40 = vsel %vm896_vm3, %v6207_v17, %v893_v33  ;;  %v4995_v17 = vld [vmem:[#allocation7 + $0xb0] sm:$0xf0]  ;;  %v4985_v31 = vld [vmem:[#allocation7 + $0x88] sm:$0xf]  ;;  %v4982_v33 = vor.u32 %v5967_v28, %v4979_v30 }
 0x1b1   :  { %v902_v41 = vsel %vm899_vm5, %v901_v34, %v897_v40  ;;  %v921_v42 = vmul.f32 %v6211_v36, %v887_v39  ;;  %v4998_v20 = vor.u32 %v5971_v15, %v4995_v17  ;;  %v5970_v32 = vld [vmem:[#allocation7 + $0x94] sm:$0xf0]  ;;  %v5968_v35 = vld [vmem:[#allocation7 + $0x8c] sm:$0xf]  ;;  %v4987_v36 = vld [vmem:[#allocation7 + $0x98] sm:$0xf0] }
 0x1b2   :  { %v907_v43 = vmul.f32 %v6209_v29, %v906_v37  ;;  %v920_v44 = vmul.f32 %v902_v41, %v6710_v11  ;;  %v5025_v11 = vld [vmem:[#allocation7 + $0xe0] sm:$0xf]  ;;  %v4986_v34 = vor.u32 %v5970_v32, %v4985_v31  ;;  %v931_v39 = vld [vmem:[#allocation2 + $0x88] sm:$0x3]  ;;  %v4990_v40 = vor.u32 %v5968_v35, %v4987_v36  ;;  %v4931_v13 = vld [vmem:[#allocation7 + $0x30] sm:$0xf0] }
 0x1b3   :  { %v5026_v57 = vor.u32 %v5981_v55, %v5025_v11  ;;  %1463 = vmatpush.bf16.msrb.mxu1 %v4998_v20  ;;  %v930_v37 = vld [vmem:[#allocation2 + $0x80] sm:$0x3]  ;;  %v5964_v11 = vld [vmem:[#allocation7 + $0x6c] sm:$0xf]  ;;  %v4971_v55 = vld [vmem:[#allocation7 + $0x78] sm:$0xf0]  ;;  %v4934_v7 = vor.u32 %v5955_v12, %v4931_v13 }
 0x1b4   :  { %v6717_v45 = vadd.f32 %v921_v42, %v920_v44  ;;  %v908_v63 = vadd.f32 %v6209_v29, %v907_v43  ;;  %1477 = vmatpush.bf16.msra.mxu2 %v4986_v34  ;;  %v4961_v41 = vld [vmem:[#allocation7 + $0x60] sm:$0xf]  ;;  %v5965_v42 = vld [vmem:[#allocation7 + $0x6c] sm:$0xf0]  ;;  %v5963_v43 = vld [vmem:[#allocation7 + $0x64] sm:$0xf]  ;;  %1490 = vmatpush.bf16.msra.mxu3 %v4990_v40  ;;  %v4974_v56 = vor.u32 %v5964_v11, %v4971_v55 }
 0x1b5   :  { %1448 = vmatpush.bf16.msra.mxu0 %v5026_v57  ;;  %v4962_v46 = vor.u32 %v5965_v42, %v4961_v41  ;;  %v4937_v14 = vld [vmem:[#allocation7 + $0x28] sm:$0xf]  ;;  %v5956_v20 = vld [vmem:[#allocation7 + $0x2c] sm:$0xf]  ;;  %v4913_v25 = vld [vmem:[#allocation7] sm:$0xf] }
 0x1b6   :  { %6212 = vtanh.f32 %v6717_v45  ;;  %v912_v48 = vsel %vm911_vm8, %v6209_v29, %v908_v63  ;;  %v4978_v29 = vor.u32 %v5969_v27, %v4977_v26  ;;  %v4938_v23 = vor.u32 %v5958_v19, %v4937_v14  ;;  %v5953_v26 = vld [vmem:[#allocation7 + $0xc] sm:$0xf0]  ;;  %v5951_v27 = vld [vmem:[#allocation7 + $0x4] sm:$0xf]  ;;  %v4921_v30 = vld [vmem:[#allocation7 + $0x8] sm:$0xf] }
 0x1b7   :  { %v917_v51 = vsel %vm914_vm9, %v916_v49, %v912_v48  ;;  %1464 = vmatpush.bf16.msrb.mxu1 %v4982_v33  ;;  %v4969_v48 = vld [vmem:[#allocation7 + $0x68] sm:$0xf]  ;;  %v5966_v49 = vld [vmem:[#allocation7 + $0x74] sm:$0xf0]  ;;  %v4942_v24 = vor.u32 %v5956_v20, %v4939_v22  ;;  %v4914_v32 = vor.u32 %v5953_v26, %v4913_v25  ;;  %v5952_v35 = vld [vmem:[#allocation7 + $0xc] sm:$0xf] }
 0x1b8   :  { %1491 = vmatpush.bf16.msra.mxu3 %v4974_v56  ;;  %v5954_v34 = vld [vmem:[#allocation7 + $0x14] sm:$0xf0]  ;;  %v4923_v36 = vld [vmem:[#allocation7 + $0x18] sm:$0xf0]  ;;  %v6013_v22 = vld [vmem:[#allocation7 + $0xec] sm:$0xf0] }
 0x1b9   :  { %1449 = vmatpush.bf16.msra.mxu0 %v5010_v5  ;;  %v4954_v5 = vor.u32 %v5962_v3, %v4953_v2  ;;  %v4922_v40 = vor.u32 %v5954_v34, %v4921_v30  ;;  %v4926_v42 = vor.u32 %v5952_v35, %v4923_v36  ;;  %v5158_v25 = vld [vmem:[#allocation7 + $0xf0] sm:$0xf0]  ;;  %v5164_v26 = vld [vmem:[#allocation7 + $0xe8] sm:$0xf]  ;;  %v6012_v30 = vld [vmem:[#allocation7 + $0xec] sm:$0xf] }
 0x1ba   :  { %v6009_v34 = vld [vmem:[#allocation7 + $0xcc] sm:$0xf0]  ;;  %v6007_v35 = vld [vmem:[#allocation7 + $0xc4] sm:$0xf] }
 0x1bc   :  { %v6213_v50 = vpop.eup %6212  ;;  %1492 = vmatpush.bf16.msra.mxu3 %v4958_v9 }
 0x1bd   :  { %v924_v52 = vmul.f32 %v6213_v50, %v917_v51  ;;  %1450 = vmatpush.bf16.msra.mxu0 %v4994_v16 }
 0x1bf   :  { %926 = vst [vmem:[#allocation3 + $0x8] sm:$0x3] %v924_v52  ;;  %v934_v53 = vpack.c.bf16 %v924_v52, %v924_v52  ;;  %v4966_v52 = vor.u32 %v5963_v43, %v4963_v47  ;;  %v933_v47 = vld [vmem:[#allocation2 + $0xb8] sm:$0x3] }
 0x1c0   :  { %1493 = vmatpush.bf16.msra.mxu3 %v4942_v24 }
 0x1c1   :  { %1135 = vmatmul.bf16.vlgmr.msrb.gmra.mxu0 %v934_v53  ;;  %1148 = vmatmul.bf16.vlgmr.msra.gmra.mxu1 %v934_v53 }
 0x1c2   :  { %1161 = vmatmul.bf16.vlgmr.msrb.gmra.mxu2 %v934_v53  ;;  %1174 = vmatmul.bf16.vlgmr.msrb.gmra.mxu3 %v934_v53  ;;  %v4970_v53 = vor.u32 %v5966_v49, %v4969_v48 }
 0x1c3   :  { %1451 = vmatpush.bf16.msra.mxu0 %v4978_v29  ;;  %1465 = vmatpush.bf16.msrb.mxu1 %v4966_v52  ;;  %v4915_v29 = vld [vmem:[#allocation7 + $0x10] sm:$0xf0] }
 0x1c4   :  { %1478 = vmatpush.bf16.msra.mxu2 %v4970_v53  ;;  %v4918_v33 = vor.u32 %v5951_v27, %v4915_v29  ;;  %1494 = vmatpush.bf16.msra.mxu3 %v4926_v42  ;;  %v6014_v27 = vld [vmem:[#allocation7 + $0xf4] sm:$0xf0] }
 0x1c5   :  { %v5165_v29 = vor.u32 %v6014_v27, %v5164_v26  ;;  %v5991_v26 = vld [vmem:[#allocation7 + $0x44] sm:$0xf] }
 0x1c7   :  { %1452 = vmatpush.bf16.msra.mxu0 %v4962_v46  ;;  %1466 = vmatpush.bf16.msrb.mxu1 %v4950_v1 }
 0x1c8   :  { %1479 = vmatpush.bf16.msra.mxu2 %v4954_v5 }
 0x1cb   :  { %1453 = vmatpush.bf16.msra.mxu0 %v4946_v0  ;;  %1467 = vmatpush.bf16.msrb.mxu1 %v4934_v7 }
 0x1cc   :  { %1480 = vmatpush.bf16.msra.mxu2 %v4938_v23  ;;  %v6011_v23 = vld [vmem:[#allocation7 + $0xe4] sm:$0xf] }
 0x1cf   :  { %1454 = vmatpush.bf16.msra.mxu0 %v4930_v10  ;;  %1468 = vmatpush.bf16.msrb.mxu1 %v4918_v33  ;;  %v5140_v33 = vld [vmem:[#allocation7 + $0xc0] sm:$0xf] }
 0x1d0   :  { %1481 = vmatpush.bf16.msra.mxu2 %v4922_v40  ;;  %v5141_v36 = vor.u32 %v6009_v34, %v5140_v33  ;;  %v6010_v40 = vld [vmem:[#allocation7 + $0xd4] sm:$0xf0]  ;;  %v5992_v34 = vld [vmem:[#allocation7 + $0x4c] sm:$0xf] }
 0x1d1   :  { %v5994_v33 = vld [vmem:[#allocation7 + $0x54] sm:$0xf0] }
 0x1d3   :  { %1455 = vmatpush.bf16.msra.mxu0 %v4914_v32 }
 0x1d4   :  { %1795 = vmatpush.bf16.msrb.mxu2 %v5165_v29 }
 0x23e   :  { %v1136_v44 = vpop.f32.mrf.mxu0  ;;  %v1149_v63 = vpop.f32.mrf.mxu1 }
 0x23f   :  { %v1179_v50 = vadd.f32 %v1136_v44, %v930_v37  ;;  %v1180_v51 = vadd.f32 %v1149_v63, %v931_v39 }
 0x241   :  { %v4908_v57 = vmul.f32 -1.442695, %v1179_v50  ;;  %v4909_v58 = vmul.f32 -1.442695, %v1180_v51 }
 0x243   :  { %6214 = vpow2.f32 %v4908_v57 }
 0x244   :  { %6216 = vpow2.f32 %v4909_v58 }
 0x245   :  { %v1162_v54 = vpop.f32.mrf.mxu2  ;;  %v1175_v18 = vpop.f32.mrf.mxu3 }
 0x246   :  { %v1181_v15 = vadd.f32 %v1162_v54, %v932_v62  ;;  %v1138_v16 = vpop.f32.mrf.mxu0  ;;  %v1151_v17 = vpop.f32.mrf.mxu1  ;;  %v1182_v49 = vadd.f32 %v1175_v18, %v933_v47  ;;  %v6005_v47 = vld [vmem:[#allocation7 + $0xac] sm:$0xf0] }
 0x248   :  { %v4910_v28 = vmul.f32 -1.442695, %v1181_v15 }
 0x249   :  { %v6215_v31 = vpop.eup %6214 }
 0x24a   :  { %v6217_v37 = vpop.eup %6216  ;;  %v1192_v39 = vadd.f32 1.0, %v6215_v31  ;;  %6218 = vpow2.f32 %v4910_v28  ;;  %v5161_v28 = vor.u32 %v6011_v23, %v5158_v25  ;;  %v5166_v31 = vld [vmem:[#allocation7 + $0xf8] sm:$0xf0]  ;;  %v5993_v25 = vld [vmem:[#allocation7 + $0x4c] sm:$0xf0] }
 0x24b   :  { %v1193_v41 = vadd.f32 1.0, %v6217_v37  ;;  %v5169_v32 = vor.u32 %v6012_v30, %v5166_v31  ;;  %v5142_v37 = vld [vmem:[#allocation7 + $0xd0] sm:$0xf0] }
 0x24c   :  { %6220 = vrcp.f32 %v1192_v39  ;;  %v1206_v55 = vand.u32 2147483648, %v1192_v39  ;;  %v1204_v58 = vand.u32 2147483647, %v1192_v39  ;;  %vm1200_vm12 = vweird.f32 %v1192_v39  ;;  %1782 = vmatpush.bf16.msra.mxu1 %v5161_v28  ;;  %v5078_v30 = vld [vmem:[#allocation7 + $0x50] sm:$0xf0] }
 0x24d   :  { %6222 = vrcp.f32 %v1193_v41  ;;  %v1164_v43 = vpop.f32.mrf.mxu2  ;;  %v1177_v44 = vpop.f32.mrf.mxu3  ;;  %v1221_v56 = vand.u32 2147483648, %v1193_v41  ;;  %v1219_v60 = vand.u32 2147483647, %v1193_v41  ;;  %vm1215_vm13 = vweird.f32 %v1193_v41  ;;  %1808 = vmatpush.bf16.msrb.mxu3 %v5169_v32  ;;  %v5084_v32 = vld [vmem:[#allocation7 + $0x48] sm:$0xf] }
 0x24e   :  { %v1207_v0 = vor.u32 1.1754944e-38, %v1206_v55  ;;  %vm1205_vm0 = vcmp.eq.f32.partialorder %v1204_v58, 8.507059e+37  ;;  %v6008_v43 = vld [vmem:[#allocation7 + $0xcc] sm:$0xf]  ;;  %v5150_v44 = vld [vmem:[#allocation7 + $0xd8] sm:$0xf0]  ;;  %v5081_v31 = vor.u32 %v5991_v26, %v5078_v30 }
 0x24f   :  { %v1222_v2 = vor.u32 1.1754944e-38, %v1221_v56  ;;  %vm1220_vm1 = vcmp.eq.f32.partialorder %v1219_v60, 8.507059e+37  ;;  %v6004_v55 = vld [vmem:[#allocation7 + $0xac] sm:$0xf]  ;;  %v5134_v56 = vld [vmem:[#allocation7 + $0xb8] sm:$0xf0] }
 0x250   :  { %v6219_v63 = vpop.eup %6218  ;;  %v5108_v58 = vld [vmem:[#allocation7 + $0x80] sm:$0xf]  ;;  %v5999_v60 = vld [vmem:[#allocation7 + $0x84] sm:$0xf] }
 0x251   :  { %v1194_v46 = vadd.f32 1.0, %v6219_v63  ;;  %v5153_v63 = vor.u32 %v6008_v43, %v5150_v44  ;;  %v5987_v43 = vld [vmem:[#allocation7 + $0x24] sm:$0xf]  ;;  %v5062_v44 = vld [vmem:[#allocation7 + $0x30] sm:$0xf0] }
 0x252   :  { %v6221_v48 = vpop.eup %6220 }
 0x253   :  { %v6223_v50 = vpop.eup %6222  ;;  %v1196_v51 = vmul.f32 %v6221_v48, %v1192_v39  ;;  %6224 = vrcp.f32 %v1194_v46  ;;  %vm1201_vm10 = vweird.f32 %v6221_v48  ;;  %v1236_v13 = vand.u32 2147483648, %v1194_v46  ;;  %v5148_v39 = vld [vmem:[#allocation7 + $0xc8] sm:$0xf]  ;;  %1809 = vmatpush.bf16.msrb.mxu3 %v5153_v63 }
 0x254   :  { %v1211_v52 = vmul.f32 %v6223_v50, %v1193_v41  ;;  %6226 = vtanh.f32 %v1182_v49  ;;  %vm1216_vm11 = vweird.f32 %v6223_v50  ;;  %vm1202_vm14 = vmor %vm1200_vm12, %vm1201_vm10  ;;  %vm1230_vm3 = vweird.f32 %v1194_v46  ;;  %v5068_v63 = vld [vmem:[#allocation7 + $0x28] sm:$0xf] }
 0x255   :  { %v1197_v53 = vsub.f32 1.0, %v1196_v51  ;;  %vm1217_vm15 = vmor %vm1215_vm13, %vm1216_vm11  ;;  %v1234_v14 = vand.u32 2147483647, %v1194_v46  ;;  %v1237_v16 = vor.u32 1.1754944e-38, %v1236_v13  ;;  %v5145_v41 = vor.u32 %v6007_v35, %v5142_v37  ;;  %v5132_v51 = vld [vmem:[#allocation7 + $0xa8] sm:$0xf] }
 0x256   :  { %v1212_v11 = vsub.f32 1.0, %v1211_v52  ;;  %v5149_v42 = vor.u32 %v6010_v40, %v5148_v39  ;;  %v6006_v52 = vld [vmem:[#allocation7 + $0xb4] sm:$0xf0]  ;;  %v1253_v35 = vld [vmem:[#allocation2 + $0x8] sm:$0x3] }
 0x257   :  { %v1198_v57 = vmul.f32 %v6221_v48, %v1197_v53  ;;  %vm1235_vm5 = vcmp.eq.f32.partialorder %v1234_v14, 8.507059e+37  ;;  %1783 = vmatpush.bf16.msra.mxu1 %v5145_v41  ;;  %v5998_v13 = vld [vmem:[#allocation7 + $0x74] sm:$0xf0]  ;;  %v5086_v37 = vld [vmem:[#allocation7 + $0x58] sm:$0xf0] }
 0x258   :  { %v1213_v59 = vmul.f32 %v6223_v50, %v1212_v11  ;;  %1796 = vmatpush.bf16.msrb.mxu2 %v5149_v42  ;;  %v5133_v11 = vor.u32 %v6006_v52, %v5132_v51  ;;  %v5060_v39 = vld [vmem:[#allocation7 + $0x20] sm:$0xf]  ;;  %v5989_v40 = vld [vmem:[#allocation7 + $0x2c] sm:$0xf0]  ;;  %v5089_v41 = vor.u32 %v5992_v34, %v5086_v37  ;;  %v5070_v51 = vld [vmem:[#allocation7 + $0x38] sm:$0xf0] }
 0x259   :  { %v6225_v61 = vpop.eup %6224  ;;  %v1199_v21 = vadd.f32 %v6221_v48, %v1198_v57  ;;  %v5137_v57 = vor.u32 %v6004_v55, %v5134_v56  ;;  %v5061_v42 = vor.u32 %v5989_v40, %v5060_v39 }
 0x25a   :  { %v1226_v62 = vmul.f32 %v6225_v61, %v1194_v46  ;;  %v1214_v1 = vadd.f32 %v6223_v50, %v1213_v59  ;;  %v6227_v4 = vpop.eup %6226  ;;  %vm1231_vm2 = vweird.f32 %v6225_v61  ;;  %v5124_v46 = vld [vmem:[#allocation7 + $0xa0] sm:$0xf]  ;;  %v6001_v59 = vld [vmem:[#allocation7 + $0x8c] sm:$0xf0] }
 0x25b   :  { %v1203_v3 = vsel %vm1202_vm14, %v6221_v48, %v1199_v21  ;;  %vm1232_vm4 = vmor %vm1230_vm3, %vm1231_vm2  ;;  %v6003_v48 = vld [vmem:[#allocation7 + $0xa4] sm:$0xf]  ;;  %v5125_v49 = vor.u32 %v6005_v47, %v5124_v46  ;;  %1810 = vmatpush.bf16.msrb.mxu3 %v5137_v57  ;;  %v5110_v21 = vld [vmem:[#allocation7 + $0x90] sm:$0xf0] }
 0x25c   :  { %v1227_v5 = vsub.f32 1.0, %v1226_v62  ;;  %v1208_v6 = vsel %vm1205_vm0, %v1207_v0, %v1203_v3  ;;  %v1218_v38 = vsel %vm1217_vm15, %v6223_v50, %v1214_v1  ;;  %v5126_v50 = vld [vmem:[#allocation7 + $0xb0] sm:$0xf0]  ;;  %1797 = vmatpush.bf16.msrb.mxu2 %v5133_v11  ;;  %v5116_v62 = vld [vmem:[#allocation7 + $0x88] sm:$0xf]  ;;  %v5113_v1 = vor.u32 %v5999_v60, %v5110_v21 }
 0x25d   :  { %v1223_v8 = vsel %vm1220_vm1, %v1222_v2, %v1218_v38  ;;  %v1242_v54 = vmul.f32 %v6227_v4, %v1208_v6  ;;  %v5129_v53 = vor.u32 %v6003_v48, %v5126_v50  ;;  %v6002_v0 = vld [vmem:[#allocation7 + $0x94] sm:$0xf0]  ;;  %v6000_v3 = vld [vmem:[#allocation7 + $0x8c] sm:$0xf]  ;;  %v5118_v4 = vld [vmem:[#allocation7 + $0x98] sm:$0xf0]  ;;  %v5065_v48 = vor.u32 %v5987_v43, %v5062_v44 }
 0x25e   :  { %v1228_v18 = vmul.f32 %v6225_v61, %v1227_v5  ;;  %v1241_v9 = vmul.f32 %v1223_v8, %v6717_v45  ;;  %v5156_v45 = vld [vmem:[#allocation7 + $0xe0] sm:$0xf]  ;;  %v5117_v2 = vor.u32 %v6002_v0, %v5116_v62  ;;  %v5121_v5 = vor.u32 %v6000_v3, %v5118_v4  ;;  %v5997_v8 = vld [vmem:[#allocation7 + $0x6c] sm:$0xf0]  ;;  %v5988_v50 = vld [vmem:[#allocation7 + $0x2c] sm:$0xf] }
 0x25f   :  { %v5157_v24 = vor.u32 %v6013_v22, %v5156_v45  ;;  %1784 = vmatpush.bf16.msra.mxu1 %v5129_v53  ;;  %v1251_v6 = vld [vmem:[#allocation2 + $0x60] sm:$0x3]  ;;  %v5073_v56 = vor.u32 %v5988_v50, %v5070_v51  ;;  %v5052_v21 = vld [vmem:[#allocation7 + $0x8] sm:$0xf]  ;;  %v5986_v62 = vld [vmem:[#allocation7 + $0x14] sm:$0xf0] }
 0x260   :  { %v6721_v10 = vadd.f32 %v1242_v54, %v1241_v9  ;;  %v1229_v12 = vadd.f32 %v6225_v61, %v1228_v18  ;;  %1798 = vmatpush.bf16.msrb.mxu2 %v5117_v2  ;;  %v5092_v38 = vld [vmem:[#allocation7 + $0x60] sm:$0xf]  ;;  %v5995_v54 = vld [vmem:[#allocation7 + $0x64] sm:$0xf]  ;;  %1811 = vmatpush.bf16.msrb.mxu3 %v5121_v5  ;;  %v5094_v9 = vld [vmem:[#allocation7 + $0x70] sm:$0xf0]  ;;  %v5053_v5 = vor.u32 %v5986_v62, %v5052_v21 }
 0x261   :  { %1769 = vmatpush.bf16.msrb.mxu0 %v5157_v24  ;;  %v5093_v18 = vor.u32 %v5997_v8, %v5092_v38  ;;  %v5076_v24 = vld [vmem:[#allocation7 + $0x40] sm:$0xf]  ;;  %v5984_v2 = vld [vmem:[#allocation7 + $0xc] sm:$0xf]  ;;  %v5054_v3 = vld [vmem:[#allocation7 + $0x18] sm:$0xf0] }
 0x262   :  { %6228 = vtanh.f32 %v6721_v10  ;;  %v1233_v15 = vsel %vm1232_vm4, %v6225_v61, %v1229_v12  ;;  %v5109_v61 = vor.u32 %v6001_v59, %v5108_v58  ;;  %v5100_v12 = vld [vmem:[#allocation7 + $0x68] sm:$0xf]  ;;  %v5077_v29 = vor.u32 %v5993_v25, %v5076_v24  ;;  %v5044_v57 = vld [vmem:[#allocation7] sm:$0xf]  ;;  %v5985_v58 = vld [vmem:[#allocation7 + $0xc] sm:$0xf0] }
 0x263   :  { %v1238_v7 = vsel %vm1235_vm5, %v1237_v16, %v1233_v15  ;;  %1785 = vmatpush.bf16.msra.mxu1 %v5113_v1  ;;  %v1252_v15 = vld [vmem:[#allocation2 + $0xf0] sm:$0x3]  ;;  %v5983_v59 = vld [vmem:[#allocation7 + $0x4] sm:$0xf]  ;;  %v5045_v60 = vor.u32 %v5985_v58, %v5044_v57  ;;  %v5057_v8 = vor.u32 %v5984_v2, %v5054_v3  ;;  %v5289_v57 = vld [vmem:[#allocation7 + $0xf0] sm:$0xf0] }
 0x264   :  { %v5295_v58 = vld [vmem:[#allocation7 + $0xe8] sm:$0xf]  ;;  %v6044_v21 = vld [vmem:[#allocation7 + $0xec] sm:$0xf]  ;;  %v5297_v62 = vld [vmem:[#allocation7 + $0xf8] sm:$0xf0] }
 0x265   :  { %1770 = vmatpush.bf16.msrb.mxu0 %v5141_v36  ;;  %v5085_v36 = vor.u32 %v5994_v33, %v5084_v32  ;;  %v6041_v2 = vld [vmem:[#allocation7 + $0xcc] sm:$0xf0]  ;;  %v6039_v3 = vld [vmem:[#allocation7 + $0xc4] sm:$0xf] }
 0x268   :  { %v6229_v17 = vpop.eup %6228 }
 0x269   :  { %v1245_v19 = vmul.f32 %v6229_v17, %v1238_v7  ;;  %1771 = vmatpush.bf16.msrb.mxu0 %v5125_v49  ;;  %v5097_v17 = vor.u32 %v5995_v54, %v5094_v9  ;;  %v5101_v7 = vor.u32 %v5998_v13, %v5100_v12  ;;  %v5990_v49 = vld [vmem:[#allocation7 + $0x34] sm:$0xf0] }
 0x26a   :  { %v5069_v55 = vor.u32 %v5990_v49, %v5068_v63 }
 0x26b   :  { %1247 = vst [vmem:[#allocation3 + $0x28] sm:$0x3] %v1245_v19  ;;  %v1255_v20 = vpack.c.bf16 %v1245_v19, %v1245_v19  ;;  %v5996_v19 = vld [vmem:[#allocation7 + $0x6c] sm:$0xf]  ;;  %1786 = vmatpush.bf16.msra.mxu1 %v5097_v17  ;;  %1799 = vmatpush.bf16.msrb.mxu2 %v5101_v7 }
 0x26d   :  { %1456 = vmatmul.bf16.vlgmr.msra.gmra.mxu0 %v1255_v20  ;;  %1469 = vmatmul.bf16.vlgmr.msrb.gmra.mxu1 %v1255_v20 }
 0x26e   :  { %1482 = vmatmul.bf16.vlgmr.msra.gmra.mxu2 %v1255_v20  ;;  %1495 = vmatmul.bf16.vlgmr.msra.gmra.mxu3 %v1255_v20  ;;  %v5102_v20 = vld [vmem:[#allocation7 + $0x78] sm:$0xf0] }
 0x26f   :  { %1772 = vmatpush.bf16.msrb.mxu0 %v5109_v61  ;;  %v5105_v23 = vor.u32 %v5996_v19, %v5102_v20  ;;  %1787 = vmatpush.bf16.msra.mxu1 %v5081_v31  ;;  %v5046_v61 = vld [vmem:[#allocation7 + $0x10] sm:$0xf0] }
 0x270   :  { %1800 = vmatpush.bf16.msrb.mxu2 %v5085_v36  ;;  %v5049_v1 = vor.u32 %v5983_v59, %v5046_v61  ;;  %v6046_v59 = vld [vmem:[#allocation7 + $0xf4] sm:$0xf0] }
 0x271   :  { %1812 = vmatpush.bf16.msrb.mxu3 %v5105_v23  ;;  %v5296_v61 = vor.u32 %v6046_v59, %v5295_v58  ;;  %v6023_v58 = vld [vmem:[#allocation7 + $0x44] sm:$0xf] }
 0x273   :  { %1773 = vmatpush.bf16.msrb.mxu0 %v5093_v18  ;;  %1788 = vmatpush.bf16.msra.mxu1 %v5065_v48 }
 0x274   :  { %1801 = vmatpush.bf16.msrb.mxu2 %v5069_v55  ;;  %v6043_v55 = vld [vmem:[#allocation7 + $0xe4] sm:$0xf] }
 0x275   :  { %1813 = vmatpush.bf16.msrb.mxu3 %v5089_v41 }
 0x277   :  { %1774 = vmatpush.bf16.msrb.mxu0 %v5077_v29  ;;  %1789 = vmatpush.bf16.msra.mxu1 %v5049_v1  ;;  %v5271_v1 = vld [vmem:[#allocation7 + $0xc0] sm:$0xf] }
 0x278   :  { %1802 = vmatpush.bf16.msrb.mxu2 %v5053_v5  ;;  %v5273_v5 = vld [vmem:[#allocation7 + $0xd0] sm:$0xf0] }
 0x279   :  { %1814 = vmatpush.bf16.msrb.mxu3 %v5073_v56 }
 0x27b   :  { %1775 = vmatpush.bf16.msrb.mxu0 %v5061_v42 }
 0x27c   :  { %2116 = vmatpush.bf16.msra.mxu2 %v5296_v61  ;;  %v5215_v61 = vld [vmem:[#allocation7 + $0x48] sm:$0xf] }
 0x27d   :  { %1815 = vmatpush.bf16.msrb.mxu3 %v5057_v8  ;;  %v5276_v8 = vor.u32 %v6039_v3, %v5273_v5  ;;  %v6024_v3 = vld [vmem:[#allocation7 + $0x4c] sm:$0xf]  ;;  %v5191_v5 = vld [vmem:[#allocation7 + $0x20] sm:$0xf] }
 0x27f   :  { %1776 = vmatpush.bf16.msrb.mxu0 %v5045_v60  ;;  %v5292_v60 = vor.u32 %v6043_v55, %v5289_v57  ;;  %v6025_v57 = vld [vmem:[#allocation7 + $0x4c] sm:$0xf0] }
 0x281   :  { %2103 = vmatpush.bf16.msrb.mxu1 %v5292_v60  ;;  %v5209_v60 = vld [vmem:[#allocation7 + $0x50] sm:$0xf0] }
 0x285   :  { %2104 = vmatpush.bf16.msrb.mxu1 %v5276_v8 }
 0x2ea   :  { %v1457_v14 = vpop.f32.mrf.mxu0  ;;  %v1470_v16 = vpop.f32.mrf.mxu1 }
 0x2eb   :  { %v1500_v45 = vadd.f32 %v1457_v14, %v1251_v6  ;;  %v1501_v22 = vadd.f32 %v1470_v16, %v1252_v15  ;;  %v1254_v14 = vld [vmem:[#allocation2 + $0x78] sm:$0x3] }
 0x2ed   :  { %v5039_v27 = vmul.f32 -1.442695, %v1500_v45  ;;  %v5040_v28 = vmul.f32 -1.442695, %v1501_v22 }
 0x2ef   :  { %6230 = vpow2.f32 %v5039_v27 }
 0x2f0   :  { %6232 = vpow2.f32 %v5040_v28 }
 0x2f1   :  { %v1483_v46 = vpop.f32.mrf.mxu2  ;;  %v1496_v47 = vpop.f32.mrf.mxu3 }
 0x2f2   :  { %v1502_v52 = vadd.f32 %v1483_v46, %v1253_v35  ;;  %v1459_v53 = vpop.f32.mrf.mxu0  ;;  %v1472_v11 = vpop.f32.mrf.mxu1  ;;  %v1503_v16 = vadd.f32 %v1496_v47, %v1254_v14  ;;  %v6037_v14 = vld [vmem:[#allocation7 + $0xac] sm:$0xf0] }
 0x2f3   :  { %v6045_v11 = vld [vmem:[#allocation7 + $0xec] sm:$0xf0] }
 0x2f4   :  { %v5041_v0 = vmul.f32 -1.442695, %v1502_v52 }
 0x2f5   :  { %v6231_v4 = vpop.eup %6230 }
 0x2f6   :  { %v6233_v6 = vpop.eup %6232  ;;  %v1513_v38 = vadd.f32 1.0, %v6231_v4  ;;  %6234 = vpow2.f32 %v5041_v0  ;;  %v5300_v0 = vor.u32 %v6044_v21, %v5297_v62  ;;  %v5272_v4 = vor.u32 %v6041_v2, %v5271_v1  ;;  %v6026_v21 = vld [vmem:[#allocation7 + $0x54] sm:$0xf0] }
 0x2f7   :  { %v1514_v54 = vadd.f32 1.0, %v6233_v6  ;;  %v5279_v6 = vld [vmem:[#allocation7 + $0xc8] sm:$0xf]  ;;  %v5212_v1 = vor.u32 %v6023_v58, %v5209_v60  ;;  %v5216_v2 = vor.u32 %v6026_v21, %v5215_v61 }
 0x2f8   :  { %6236 = vrcp.f32 %v1513_v38  ;;  %v1527_v22 = vand.u32 2147483648, %v1513_v38  ;;  %v1525_v25 = vand.u32 2147483647, %v1513_v38  ;;  %vm1521_vm8 = vweird.f32 %v1513_v38  ;;  %2129 = vmatpush.bf16.msra.mxu3 %v5300_v0 }
 0x2f9   :  { %6238 = vrcp.f32 %v1514_v54  ;;  %v1485_v18 = vpop.f32.mrf.mxu2  ;;  %v1498_v9 = vpop.f32.mrf.mxu3  ;;  %v1542_v23 = vand.u32 2147483648, %v1514_v54  ;;  %v1540_v27 = vand.u32 2147483647, %v1514_v54  ;;  %vm1536_vm9 = vweird.f32 %v1514_v54 }
 0x2fa   :  { %v1528_v31 = vor.u32 1.1754944e-38, %v1527_v22  ;;  %vm1526_vm12 = vcmp.eq.f32.partialorder %v1525_v25, 8.507059e+37  ;;  %v6040_v18 = vld [vmem:[#allocation7 + $0xcc] sm:$0xf]  ;;  %v5281_v9 = vld [vmem:[#allocation7 + $0xd8] sm:$0xf0] }
 0x2fb   :  { %v1543_v33 = vor.u32 1.1754944e-38, %v1542_v23  ;;  %vm1541_vm13 = vcmp.eq.f32.partialorder %v1540_v27, 8.507059e+37  ;;  %v6036_v22 = vld [vmem:[#allocation7 + $0xac] sm:$0xf]  ;;  %v5265_v23 = vld [vmem:[#allocation7 + $0xb8] sm:$0xf0] }
 0x2fc   :  { %v6235_v12 = vpop.eup %6234  ;;  %v5239_v25 = vld [vmem:[#allocation7 + $0x80] sm:$0xf]  ;;  %v6031_v27 = vld [vmem:[#allocation7 + $0x84] sm:$0xf] }
 0x2fd   :  { %v1515_v13 = vadd.f32 1.0, %v6235_v12  ;;  %v5284_v12 = vor.u32 %v6040_v18, %v5281_v9  ;;  %v6019_v18 = vld [vmem:[#allocation7 + $0x24] sm:$0xf]  ;;  %v5193_v9 = vld [vmem:[#allocation7 + $0x30] sm:$0xf0] }
 0x2fe   :  { %v6237_v15 = vpop.eup %6236 }
 0x2ff   :  { %v6239_v17 = vpop.eup %6238  ;;  %v1517_v7 = vmul.f32 %v6237_v15, %v1513_v38  ;;  %6240 = vrcp.f32 %v1515_v13  ;;  %vm1522_vm6 = vweird.f32 %v6237_v15  ;;  %v1557_v46 = vand.u32 2147483648, %v1515_v13  ;;  %v6042_v38 = vld [vmem:[#allocation7 + $0xd4] sm:$0xf0]  ;;  %2130 = vmatpush.bf16.msra.mxu3 %v5284_v12  ;;  %v5199_v12 = vld [vmem:[#allocation7 + $0x28] sm:$0xf] }
 0x300   :  { %v1532_v19 = vmul.f32 %v6239_v17, %v1514_v54  ;;  %6242 = vtanh.f32 %v1503_v16  ;;  %vm1537_vm7 = vweird.f32 %v6239_v17  ;;  %vm1523_vm10 = vmor %vm1521_vm8, %vm1522_vm6  ;;  %vm1551_vm15 = vweird.f32 %v1515_v13 }
 0x301   :  { %v1518_v20 = vsub.f32 1.0, %v1517_v7  ;;  %vm1538_vm11 = vmor %vm1536_vm9, %vm1537_vm7  ;;  %v1555_v47 = vand.u32 2147483647, %v1515_v13  ;;  %v1558_v49 = vor.u32 1.1754944e-38, %v1557_v46  ;;  %v5280_v54 = vor.u32 %v6042_v38, %v5279_v6  ;;  %v5263_v7 = vld [vmem:[#allocation7 + $0xa8] sm:$0xf] }
 0x302   :  { %v1533_v45 = vsub.f32 1.0, %v1532_v19  ;;  %v6038_v19 = vld [vmem:[#allocation7 + $0xb4] sm:$0xf0]  ;;  %v6021_v6 = vld [vmem:[#allocation7 + $0x2c] sm:$0xf0] }
 0x303   :  { %v1519_v24 = vmul.f32 %v6237_v15, %v1518_v20  ;;  %vm1556_vm1 = vcmp.eq.f32.partialorder %v1555_v47, 8.507059e+37  ;;  %2117 = vmatpush.bf16.msra.mxu2 %v5280_v54  ;;  %v1574_v38 = vld [vmem:[#allocation2 + $0x40] sm:$0x3]  ;;  %v5192_v54 = vor.u32 %v6021_v6, %v5191_v5 }
 0x304   :  { %v1534_v26 = vmul.f32 %v6239_v17, %v1533_v45  ;;  %v5264_v45 = vor.u32 %v6038_v19, %v5263_v7 }
 0x305   :  { %v6241_v28 = vpop.eup %6240  ;;  %v1520_v29 = vadd.f32 %v6237_v15, %v1519_v24  ;;  %v5268_v24 = vor.u32 %v6036_v22, %v5265_v23  ;;  %v6017_v22 = vld [vmem:[#allocation7 + $0xc] sm:$0xf0]  ;;  %v6015_v23 = vld [vmem:[#allocation7 + $0x4] sm:$0xf] }
 0x306   :  { %v1547_v30 = vmul.f32 %v6241_v28, %v1515_v13  ;;  %v1535_v32 = vadd.f32 %v6239_v17, %v1534_v26  ;;  %v6243_v35 = vpop.eup %6242  ;;  %vm1552_vm14 = vweird.f32 %v6241_v28  ;;  %v5255_v13 = vld [vmem:[#allocation7 + $0xa0] sm:$0xf]  ;;  %v6033_v26 = vld [vmem:[#allocation7 + $0x8c] sm:$0xf0] }
 0x307   :  { %v1524_v34 = vsel %vm1523_vm10, %v6237_v15, %v1520_v29  ;;  %vm1553_vm0 = vmor %vm1551_vm15, %vm1552_vm14  ;;  %v6035_v15 = vld [vmem:[#allocation7 + $0xa4] sm:$0xf]  ;;  %v5256_v16 = vor.u32 %v6037_v14, %v5255_v13  ;;  %2118 = vmatpush.bf16.msra.mxu2 %v5264_v45  ;;  %2131 = vmatpush.bf16.msra.mxu3 %v5268_v24  ;;  %v5241_v29 = vld [vmem:[#allocation7 + $0x90] sm:$0xf0]  ;;  %v5196_v13 = vor.u32 %v6019_v18, %v5193_v9 }
 0x308   :  { %v1548_v36 = vsub.f32 1.0, %v1547_v30  ;;  %v1529_v37 = vsel %vm1526_vm12, %v1528_v31, %v1524_v34  ;;  %v1539_v39 = vsel %vm1538_vm11, %v6239_v17, %v1535_v32  ;;  %v5257_v17 = vld [vmem:[#allocation7 + $0xb0] sm:$0xf0]  ;;  %v5247_v30 = vld [vmem:[#allocation7 + $0x88] sm:$0xf]  ;;  %v5244_v32 = vor.u32 %v6031_v27, %v5241_v29 }
 0x309   :  { %v1544_v40 = vsel %vm1541_vm13, %v1543_v33, %v1539_v39  ;;  %v1563_v41 = vmul.f32 %v6243_v35, %v1529_v37  ;;  %v5260_v20 = vor.u32 %v6035_v15, %v5257_v17  ;;  %v6034_v31 = vld [vmem:[#allocation7 + $0x94] sm:$0xf0]  ;;  %v6032_v34 = vld [vmem:[#allocation7 + $0x8c] sm:$0xf]  ;;  %v5249_v35 = vld [vmem:[#allocation7 + $0x98] sm:$0xf0] }
 0x30a   :  { %v1549_v42 = vmul.f32 %v6241_v28, %v1548_v36  ;;  %v1562_v43 = vmul.f32 %v1544_v40, %v6721_v10  ;;  %v5287_v10 = vld [vmem:[#allocation7 + $0xe0] sm:$0xf]  ;;  %v5248_v33 = vor.u32 %v6034_v31, %v5247_v30  ;;  %v5252_v36 = vor.u32 %v6032_v34, %v5249_v35  ;;  %v6029_v39 = vld [vmem:[#allocation7 + $0x6c] sm:$0xf0]  ;;  %v6027_v40 = vld [vmem:[#allocation7 + $0x64] sm:$0xf] }
 0x30b   :  { %v5288_v56 = vor.u32 %v6045_v11, %v5287_v10  ;;  %2105 = vmatpush.bf16.msrb.mxu1 %v5260_v20  ;;  %v5223_v37 = vld [vmem:[#allocation7 + $0x60] sm:$0xf]  ;;  %v6022_v14 = vld [vmem:[#allocation7 + $0x34] sm:$0xf0]  ;;  %v6020_v15 = vld [vmem:[#allocation7 + $0x2c] sm:$0xf] }
 0x30c   :  { %v6725_v44 = vadd.f32 %v1563_v41, %v1562_v43  ;;  %v1550_v63 = vadd.f32 %v6241_v28, %v1549_v42  ;;  %2119 = vmatpush.bf16.msra.mxu2 %v5248_v33  ;;  %2132 = vmatpush.bf16.msra.mxu3 %v5252_v36  ;;  %v5224_v41 = vor.u32 %v6029_v39, %v5223_v37  ;;  %v5225_v42 = vld [vmem:[#allocation7 + $0x70] sm:$0xf0]  ;;  %v5231_v43 = vld [vmem:[#allocation7 + $0x68] sm:$0xf]  ;;  %v5175_v45 = vld [vmem:[#allocation7] sm:$0xf] }
 0x30d   :  { %2090 = vmatpush.bf16.msra.mxu0 %v5288_v56  ;;  %v5228_v46 = vor.u32 %v6027_v40, %v5225_v42  ;;  %v5207_v56 = vld [vmem:[#allocation7 + $0x40] sm:$0xf]  ;;  %v5200_v19 = vor.u32 %v6022_v14, %v5199_v12  ;;  %v5176_v27 = vor.u32 %v6017_v22, %v5175_v45  ;;  %v5183_v29 = vld [vmem:[#allocation7 + $0x8] sm:$0xf]  ;;  %v6018_v30 = vld [vmem:[#allocation7 + $0x14] sm:$0xf0] }
 0x30e   :  { %6244 = vtanh.f32 %v6725_v44  ;;  %v1554_v48 = vsel %vm1553_vm0, %v6241_v28, %v1550_v63  ;;  %v5240_v28 = vor.u32 %v6033_v26, %v5239_v25  ;;  %v6030_v63 = vld [vmem:[#allocation7 + $0x74] sm:$0xf0]  ;;  %v5208_v59 = vor.u32 %v6025_v57, %v5207_v56  ;;  %v6016_v33 = vld [vmem:[#allocation7 + $0xc] sm:$0xf]  ;;  %v5185_v34 = vld [vmem:[#allocation7 + $0x18] sm:$0xf0] }
 0x30f   :  { %v1559_v51 = vsel %vm1556_vm1, %v1558_v49, %v1554_v48  ;;  %2106 = vmatpush.bf16.msrb.mxu1 %v5244_v32  ;;  %v5232_v47 = vor.u32 %v6030_v63, %v5231_v43  ;;  %v6028_v48 = vld [vmem:[#allocation7 + $0x6c] sm:$0xf]  ;;  %v5233_v49 = vld [vmem:[#allocation7 + $0x78] sm:$0xf0]  ;;  %v5184_v32 = vor.u32 %v6018_v30, %v5183_v29  ;;  %v5188_v37 = vor.u32 %v6016_v33, %v5185_v34  ;;  %v6077_v45 = vld [vmem:[#allocation7 + $0xec] sm:$0xf0] }
 0x310   :  { %v5236_v10 = vor.u32 %v6028_v48, %v5233_v49  ;;  %v6075_v22 = vld [vmem:[#allocation7 + $0xe4] sm:$0xf]  ;;  %v6076_v29 = vld [vmem:[#allocation7 + $0xec] sm:$0xf]  ;;  %v5428_v30 = vld [vmem:[#allocation7 + $0xf8] sm:$0xf0] }
 0x311   :  { %2091 = vmatpush.bf16.msra.mxu0 %v5272_v4  ;;  %2120 = vmatpush.bf16.msra.mxu2 %v5232_v47  ;;  %v5217_v4 = vld [vmem:[#allocation7 + $0x58] sm:$0xf0]  ;;  %v1575_v47 = vld [vmem:[#allocation2 + $0xc8] sm:$0x3]  ;;  %v6073_v33 = vld [vmem:[#allocation7 + $0xcc] sm:$0xf0] }
 0x312   :  { %2133 = vmatpush.bf16.msra.mxu3 %v5236_v10  ;;  %v5220_v8 = vor.u32 %v6024_v3, %v5217_v4  ;;  %v6071_v34 = vld [vmem:[#allocation7 + $0xc4] sm:$0xf] }
 0x313   :  { %2107 = vmatpush.bf16.msrb.mxu1 %v5228_v46 }
 0x314   :  { %v6245_v50 = vpop.eup %6244 }
 0x315   :  { %v1566_v52 = vmul.f32 %v6245_v50, %v1559_v51  ;;  %2092 = vmatpush.bf16.msra.mxu0 %v5256_v16  ;;  %v1572_v50 = vld [vmem:[#allocation2 + $0x38] sm:$0x3]  ;;  %2121 = vmatpush.bf16.msra.mxu2 %v5216_v2  ;;  %v5201_v16 = vld [vmem:[#allocation7 + $0x38] sm:$0xf0] }
 0x316   :  { %2134 = vmatpush.bf16.msra.mxu3 %v5220_v8  ;;  %v5204_v20 = vor.u32 %v6020_v15, %v5201_v16 }
 0x317   :  { %1568 = vst [vmem:[#allocation3 + $0x38] sm:$0x3] %v1566_v52  ;;  %v1576_v53 = vpack.c.bf16 %v1566_v52, %v1566_v52  ;;  %v1573_v52 = vld [vmem:[#allocation2 + $0x58] sm:$0x3]  ;;  %2108 = vmatpush.bf16.msrb.mxu1 %v5212_v1 }
 0x319   :  { %1777 = vmatmul.bf16.vlgmr.msrb.gmra.mxu0 %v1576_v53  ;;  %1790 = vmatmul.bf16.vlgmr.msra.gmra.mxu1 %v1576_v53 }
 0x31a   :  { %1803 = vmatmul.bf16.vlgmr.msrb.gmra.mxu2 %v1576_v53  ;;  %1816 = vmatmul.bf16.vlgmr.msrb.gmra.mxu3 %v1576_v53 }
 0x31b   :  { %2093 = vmatpush.bf16.msra.mxu0 %v5240_v28  ;;  %v5177_v28 = vld [vmem:[#allocation7 + $0x10] sm:$0xf0]  ;;  %2109 = vmatpush.bf16.msrb.mxu1 %v5196_v13 }
 0x31c   :  { %2122 = vmatpush.bf16.msra.mxu2 %v5200_v19  ;;  %v5180_v31 = vor.u32 %v6015_v23, %v5177_v28  ;;  %2135 = vmatpush.bf16.msra.mxu3 %v5204_v20 }
 0x31f   :  { %2094 = vmatpush.bf16.msra.mxu0 %v5224_v41  ;;  %2110 = vmatpush.bf16.msrb.mxu1 %v5180_v31  ;;  %v5431_v31 = vor.u32 %v6076_v29, %v5428_v30  ;;  %v6058_v29 = vld [vmem:[#allocation7 + $0x54] sm:$0xf0] }
 0x320   :  { %2123 = vmatpush.bf16.msra.mxu2 %v5184_v32  ;;  %2136 = vmatpush.bf16.msra.mxu3 %v5188_v37  ;;  %v5402_v32 = vld [vmem:[#allocation7 + $0xc0] sm:$0xf]  ;;  %v5410_v37 = vld [vmem:[#allocation7 + $0xc8] sm:$0xf] }
 0x323   :  { %2095 = vmatpush.bf16.msra.mxu0 %v5208_v59 }
 0x324   :  { %2450 = vmatpush.bf16.msrb.mxu3 %v5431_v31 }
 0x327   :  { %2096 = vmatpush.bf16.msra.mxu0 %v5192_v54 }
 0x32b   :  { %2097 = vmatpush.bf16.msra.mxu0 %v5176_v27 }
 0x396   :  { %v1778_v51 = vpop.f32.mrf.mxu0  ;;  %v1791_v53 = vpop.f32.mrf.mxu1 }
 0x397   :  { %v1821_v11 = vadd.f32 %v1778_v51, %v1572_v50  ;;  %v1822_v55 = vadd.f32 %v1791_v53, %v1573_v52 }
 0x399   :  { %v5170_v62 = vmul.f32 -1.442695, %v1821_v11  ;;  %v5171_v0 = vmul.f32 -1.442695, %v1822_v55 }
 0x39b   :  { %6246 = vpow2.f32 %v5170_v62 }
 0x39c   :  { %6248 = vpow2.f32 %v5171_v0 }
 0x39d   :  { %v1804_v17 = vpop.f32.mrf.mxu2  ;;  %v1817_v7 = vpop.f32.mrf.mxu3 }
 0x39e   :  { %v1823_v24 = vadd.f32 %v1804_v17, %v1574_v38  ;;  %v1780_v25 = vpop.f32.mrf.mxu0  ;;  %v1793_v26 = vpop.f32.mrf.mxu1  ;;  %v1824_v49 = vadd.f32 %v1817_v7, %v1575_v47  ;;  %v6069_v47 = vld [vmem:[#allocation7 + $0xac] sm:$0xf0] }
 0x39f   :  { %v5426_v25 = vld [vmem:[#allocation7 + $0xe8] sm:$0xf]  ;;  %v6078_v26 = vld [vmem:[#allocation7 + $0xf4] sm:$0xf0] }
 0x3a0   :  { %v5172_v35 = vmul.f32 -1.442695, %v1823_v24  ;;  %v5420_v24 = vld [vmem:[#allocation7 + $0xf0] sm:$0xf0]  ;;  %v5427_v28 = vor.u32 %v6078_v26, %v5426_v25  ;;  %v6055_v25 = vld [vmem:[#allocation7 + $0x44] sm:$0xf] }
 0x3a1   :  { %v6247_v36 = vpop.eup %6246  ;;  %v5423_v27 = vor.u32 %v6075_v22, %v5420_v24  ;;  %v6057_v24 = vld [vmem:[#allocation7 + $0x4c] sm:$0xf0] }
 0x3a2   :  { %v6249_v39 = vpop.eup %6248  ;;  %v1834_v40 = vadd.f32 1.0, %v6247_v36  ;;  %6250 = vpow2.f32 %v5172_v35  ;;  %2437 = vmatpush.bf16.msrb.mxu2 %v5427_v28  ;;  %v5403_v35 = vor.u32 %v6073_v33, %v5402_v32  ;;  %v5404_v36 = vld [vmem:[#allocation7 + $0xd0] sm:$0xf0]  ;;  %v5346_v28 = vld [vmem:[#allocation7 + $0x48] sm:$0xf] }
 0x3a3   :  { %v1835_v41 = vadd.f32 1.0, %v6249_v39  ;;  %2424 = vmatpush.bf16.msra.mxu1 %v5423_v27  ;;  %v6074_v39 = vld [vmem:[#allocation7 + $0xd4] sm:$0xf0]  ;;  %v5340_v27 = vld [vmem:[#allocation7 + $0x50] sm:$0xf0]  ;;  %v5347_v33 = vor.u32 %v6058_v29, %v5346_v28 }
 0x3a4   :  { %6252 = vrcp.f32 %v1834_v40  ;;  %v1848_v11 = vand.u32 2147483648, %v1834_v40  ;;  %v1846_v57 = vand.u32 2147483647, %v1834_v40  ;;  %vm1842_vm4 = vweird.f32 %v1834_v40 }
 0x3a5   :  { %6254 = vrcp.f32 %v1835_v41  ;;  %v1806_v42 = vpop.f32.mrf.mxu2  ;;  %v1819_v43 = vpop.f32.mrf.mxu3  ;;  %v1863_v55 = vand.u32 2147483648, %v1835_v41  ;;  %v1861_v59 = vand.u32 2147483647, %v1835_v41  ;;  %vm1857_vm5 = vweird.f32 %v1835_v41 }
 0x3a6   :  { %v1849_v62 = vor.u32 1.1754944e-38, %v1848_v11  ;;  %vm1847_vm8 = vcmp.eq.f32.partialorder %v1846_v57, 8.507059e+37  ;;  %v6072_v42 = vld [vmem:[#allocation7 + $0xcc] sm:$0xf]  ;;  %v5412_v43 = vld [vmem:[#allocation7 + $0xd8] sm:$0xf0]  ;;  %v5343_v32 = vor.u32 %v6055_v25, %v5340_v27 }
 0x3a7   :  { %v1864_v1 = vor.u32 1.1754944e-38, %v1863_v55  ;;  %vm1862_vm9 = vcmp.eq.f32.partialorder %v1861_v59, 8.507059e+37  ;;  %v6068_v11 = vld [vmem:[#allocation7 + $0xac] sm:$0xf]  ;;  %v5396_v55 = vld [vmem:[#allocation7 + $0xb8] sm:$0xf0] }
 0x3a8   :  { %v6251_v63 = vpop.eup %6250  ;;  %v5370_v57 = vld [vmem:[#allocation7 + $0x80] sm:$0xf]  ;;  %v6063_v59 = vld [vmem:[#allocation7 + $0x84] sm:$0xf] }
 0x3a9   :  { %v1836_v46 = vadd.f32 1.0, %v6251_v63  ;;  %v5415_v63 = vor.u32 %v6072_v42, %v5412_v43  ;;  %v6051_v42 = vld [vmem:[#allocation7 + $0x24] sm:$0xf]  ;;  %v5324_v43 = vld [vmem:[#allocation7 + $0x30] sm:$0xf0] }
 0x3aa   :  { %v6253_v48 = vpop.eup %6252 }
 0x3ab   :  { %v6255_v50 = vpop.eup %6254  ;;  %v1838_v51 = vmul.f32 %v6253_v48, %v1834_v40  ;;  %6256 = vrcp.f32 %v1836_v46  ;;  %vm1843_vm2 = vweird.f32 %v6253_v48  ;;  %v1878_v13 = vand.u32 2147483648, %v1836_v46  ;;  %2451 = vmatpush.bf16.msrb.mxu3 %v5415_v63  ;;  %v5330_v63 = vld [vmem:[#allocation7 + $0x28] sm:$0xf] }
 0x3ac   :  { %v1853_v52 = vmul.f32 %v6255_v50, %v1835_v41  ;;  %6258 = vtanh.f32 %v1824_v49  ;;  %vm1858_vm3 = vweird.f32 %v6255_v50  ;;  %vm1844_vm6 = vmor %vm1842_vm4, %vm1843_vm2  ;;  %vm1872_vm11 = vweird.f32 %v1836_v46 }
 0x3ad   :  { %v1839_v53 = vsub.f32 1.0, %v1838_v51  ;;  %vm1859_vm7 = vmor %vm1857_vm5, %vm1858_vm3  ;;  %v1876_v14 = vand.u32 2147483647, %v1836_v46  ;;  %v1879_v16 = vor.u32 1.1754944e-38, %v1878_v13  ;;  %v5407_v40 = vor.u32 %v6071_v34, %v5404_v36  ;;  %v5394_v51 = vld [vmem:[#allocation7 + $0xa8] sm:$0xf] }
 0x3ae   :  { %v1854_v10 = vsub.f32 1.0, %v1853_v52  ;;  %v5411_v41 = vor.u32 %v6074_v39, %v5410_v37  ;;  %v6070_v52 = vld [vmem:[#allocation7 + $0xb4] sm:$0xf0]  ;;  %v6056_v34 = vld [vmem:[#allocation7 + $0x4c] sm:$0xf] }
 0x3af   :  { %v1840_v56 = vmul.f32 %v6253_v48, %v1839_v53  ;;  %vm1877_vm13 = vcmp.eq.f32.partialorder %v1876_v14, 8.507059e+37  ;;  %2425 = vmatpush.bf16.msra.mxu1 %v5407_v40  ;;  %v5322_v36 = vld [vmem:[#allocation7 + $0x20] sm:$0xf]  ;;  %v6053_v37 = vld [vmem:[#allocation7 + $0x2c] sm:$0xf0] }
 0x3b0   :  { %v1855_v58 = vmul.f32 %v6255_v50, %v1854_v10  ;;  %2438 = vmatpush.bf16.msrb.mxu2 %v5411_v41  ;;  %v5395_v10 = vor.u32 %v6070_v52, %v5394_v51  ;;  %v1895_v39 = vld [vmem:[#allocation2 + $0x70] sm:$0x3]  ;;  %v5323_v41 = vor.u32 %v6053_v37, %v5322_v36 }
 0x3b1   :  { %v6257_v60 = vpop.eup %6256  ;;  %v1841_v61 = vadd.f32 %v6253_v48, %v1840_v56  ;;  %v5399_v56 = vor.u32 %v6068_v11, %v5396_v55  ;;  %v6049_v11 = vld [vmem:[#allocation7 + $0xc] sm:$0xf0]  ;;  %v6047_v55 = vld [vmem:[#allocation7 + $0x4] sm:$0xf] }
 0x3b2   :  { %v1868_v21 = vmul.f32 %v6257_v60, %v1836_v46  ;;  %v1856_v0 = vadd.f32 %v6255_v50, %v1855_v58  ;;  %v6259_v3 = vpop.eup %6258  ;;  %vm1873_vm10 = vweird.f32 %v6257_v60  ;;  %v5386_v46 = vld [vmem:[#allocation7 + $0xa0] sm:$0xf]  ;;  %v6065_v58 = vld [vmem:[#allocation7 + $0x8c] sm:$0xf0] }
 0x3b3   :  { %v1845_v2 = vsel %vm1844_vm6, %v6253_v48, %v1841_v61  ;;  %vm1874_vm12 = vmor %vm1872_vm11, %vm1873_vm10  ;;  %v6067_v48 = vld [vmem:[#allocation7 + $0xa4] sm:$0xf]  ;;  %v5387_v49 = vor.u32 %v6069_v47, %v5386_v46  ;;  %2452 = vmatpush.bf16.msrb.mxu3 %v5399_v56  ;;  %v5372_v61 = vld [vmem:[#allocation7 + $0x90] sm:$0xf0]  ;;  %v5327_v46 = vor.u32 %v6051_v42, %v5324_v43 }
 0x3b4   :  { %v1869_v4 = vsub.f32 1.0, %v1868_v21  ;;  %v1850_v5 = vsel %vm1847_vm8, %v1849_v62, %v1845_v2  ;;  %v1860_v6 = vsel %vm1859_vm7, %v6255_v50, %v1856_v0  ;;  %v5388_v50 = vld [vmem:[#allocation7 + $0xb0] sm:$0xf0]  ;;  %2439 = vmatpush.bf16.msrb.mxu2 %v5395_v10  ;;  %v5378_v21 = vld [vmem:[#allocation7 + $0x88] sm:$0xf]  ;;  %v5375_v0 = vor.u32 %v6063_v59, %v5372_v61 }
 0x3b5   :  { %v1865_v38 = vsel %vm1862_vm9, %v1864_v1, %v1860_v6  ;;  %v1884_v8 = vmul.f32 %v6259_v3, %v1850_v5  ;;  %v5391_v53 = vor.u32 %v6067_v48, %v5388_v50  ;;  %v6066_v62 = vld [vmem:[#allocation7 + $0x94] sm:$0xf0]  ;;  %v6064_v2 = vld [vmem:[#allocation7 + $0x8c] sm:$0xf]  ;;  %v5380_v3 = vld [vmem:[#allocation7 + $0x98] sm:$0xf0] }
 0x3b6   :  { %v1870_v54 = vmul.f32 %v6257_v60, %v1869_v4  ;;  %v1883_v18 = vmul.f32 %v1865_v38, %v6725_v44  ;;  %v5418_v44 = vld [vmem:[#allocation7 + $0xe0] sm:$0xf]  ;;  %v5379_v1 = vor.u32 %v6066_v62, %v5378_v21  ;;  %v5383_v4 = vor.u32 %v6064_v2, %v5380_v3  ;;  %v6061_v6 = vld [vmem:[#allocation7 + $0x6c] sm:$0xf0]  ;;  %v6059_v38 = vld [vmem:[#allocation7 + $0x64] sm:$0xf] }
 0x3b7   :  { %v5419_v23 = vor.u32 %v6077_v45, %v5418_v44  ;;  %2426 = vmatpush.bf16.msra.mxu1 %v5391_v53  ;;  %v5354_v5 = vld [vmem:[#allocation7 + $0x60] sm:$0xf]  ;;  %v6054_v47 = vld [vmem:[#allocation7 + $0x34] sm:$0xf0]  ;;  %v6052_v48 = vld [vmem:[#allocation7 + $0x2c] sm:$0xf] }
 0x3b8   :  { %v6729_v9 = vadd.f32 %v1884_v8, %v1883_v18  ;;  %v1871_v12 = vadd.f32 %v6257_v60, %v1870_v54  ;;  %2440 = vmatpush.bf16.msrb.mxu2 %v5379_v1  ;;  %2453 = vmatpush.bf16.msrb.mxu3 %v5383_v4  ;;  %v5355_v8 = vor.u32 %v6061_v6, %v5354_v5  ;;  %v5356_v54 = vld [vmem:[#allocation7 + $0x70] sm:$0xf0]  ;;  %v5362_v18 = vld [vmem:[#allocation7 + $0x68] sm:$0xf]  ;;  %v5306_v10 = vld [vmem:[#allocation7] sm:$0xf] }
 0x3b9   :  { %2411 = vmatpush.bf16.msrb.mxu0 %v5419_v23  ;;  %v5359_v13 = vor.u32 %v6059_v38, %v5356_v54  ;;  %v5338_v23 = vld [vmem:[#allocation7 + $0x40] sm:$0xf]  ;;  %v5331_v52 = vor.u32 %v6054_v47, %v5330_v63  ;;  %v5307_v59 = vor.u32 %v6049_v11, %v5306_v10  ;;  %v5314_v61 = vld [vmem:[#allocation7 + $0x8] sm:$0xf]  ;;  %v6050_v21 = vld [vmem:[#allocation7 + $0x14] sm:$0xf0] }
 0x3ba   :  { %6260 = vtanh.f32 %v6729_v9  ;;  %v1875_v15 = vsel %vm1874_vm12, %v6257_v60, %v1871_v12  ;;  %v5371_v60 = vor.u32 %v6065_v58, %v5370_v57  ;;  %v6062_v12 = vld [vmem:[#allocation7 + $0x74] sm:$0xf0]  ;;  %v5339_v26 = vor.u32 %v6057_v24, %v5338_v23  ;;  %v6048_v1 = vld [vmem:[#allocation7 + $0xc] sm:$0xf]  ;;  %v5316_v2 = vld [vmem:[#allocation7 + $0x18] sm:$0xf0] }
 0x3bb   :  { %v1880_v7 = vsel %vm1877_vm13, %v1879_v16, %v1875_v15  ;;  %2427 = vmatpush.bf16.msra.mxu1 %v5375_v0  ;;  %v5363_v14 = vor.u32 %v6062_v12, %v5362_v18  ;;  %v6060_v15 = vld [vmem:[#allocation7 + $0x6c] sm:$0xf]  ;;  %v5364_v16 = vld [vmem:[#allocation7 + $0x78] sm:$0xf0]  ;;  %v5315_v0 = vor.u32 %v6050_v21, %v5314_v61  ;;  %v5319_v5 = vor.u32 %v6048_v1, %v5316_v2  ;;  %v6109_v10 = vld [vmem:[#allocation7 + $0xec] sm:$0xf0] }
 0x3bc   :  { %v5367_v44 = vor.u32 %v6060_v15, %v5364_v16  ;;  %v6107_v11 = vld [vmem:[#allocation7 + $0xe4] sm:$0xf]  ;;  %v6108_v61 = vld [vmem:[#allocation7 + $0xec] sm:$0xf]  ;;  %v5559_v21 = vld [vmem:[#allocation7 + $0xf8] sm:$0xf0] }
 0x3bd   :  { %2412 = vmatpush.bf16.msrb.mxu0 %v5403_v35  ;;  %2441 = vmatpush.bf16.msrb.mxu2 %v5363_v14  ;;  %v5348_v35 = vld [vmem:[#allocation7 + $0x58] sm:$0xf0]  ;;  %v1896_v14 = vld [vmem:[#allocation2 + $0xc0] sm:$0x3]  ;;  %v6105_v1 = vld [vmem:[#allocation7 + $0xcc] sm:$0xf0] }
 0x3be   :  { %2454 = vmatpush.bf16.msrb.mxu3 %v5367_v44  ;;  %v5351_v40 = vor.u32 %v6056_v34, %v5348_v35  ;;  %v6103_v2 = vld [vmem:[#allocation7 + $0xc4] sm:$0xf] }
 0x3bf   :  { %2428 = vmatpush.bf16.msra.mxu1 %v5359_v13 }
 0x3c0   :  { %v6261_v17 = vpop.eup %6260 }
 0x3c1   :  { %v1887_v19 = vmul.f32 %v6261_v17, %v1880_v7  ;;  %2413 = vmatpush.bf16.msrb.mxu0 %v5387_v49  ;;  %v1893_v17 = vld [vmem:[#allocation2 + $0xe0] sm:$0x3]  ;;  %2442 = vmatpush.bf16.msrb.mxu2 %v5347_v33  ;;  %v5332_v49 = vld [vmem:[#allocation7 + $0x38] sm:$0xf0] }
 0x3c2   :  { %2455 = vmatpush.bf16.msrb.mxu3 %v5351_v40  ;;  %v5335_v53 = vor.u32 %v6052_v48, %v5332_v49 }
 0x3c3   :  { %1889 = vst [vmem:[#allocation3 + $0x10] sm:$0x3] %v1887_v19  ;;  %v1897_v20 = vpack.c.bf16 %v1887_v19, %v1887_v19  ;;  %v1894_v19 = vld [vmem:[#allocation2 + $0x90] sm:$0x3]  ;;  %2429 = vmatpush.bf16.msra.mxu1 %v5343_v32 }
 0x3c5   :  { %2098 = vmatmul.bf16.vlgmr.msra.gmra.mxu0 %v1897_v20  ;;  %2111 = vmatmul.bf16.vlgmr.msrb.gmra.mxu1 %v1897_v20 }
 0x3c6   :  { %2124 = vmatmul.bf16.vlgmr.msra.gmra.mxu2 %v1897_v20  ;;  %2137 = vmatmul.bf16.vlgmr.msra.gmra.mxu3 %v1897_v20 }
 0x3c7   :  { %2414 = vmatpush.bf16.msrb.mxu0 %v5371_v60  ;;  %v5308_v60 = vld [vmem:[#allocation7 + $0x10] sm:$0xf0]  ;;  %2430 = vmatpush.bf16.msra.mxu1 %v5327_v46 }
 0x3c8   :  { %2443 = vmatpush.bf16.msrb.mxu2 %v5331_v52  ;;  %v5311_v62 = vor.u32 %v6047_v55, %v5308_v60  ;;  %2456 = vmatpush.bf16.msrb.mxu3 %v5335_v53 }
 0x3cb   :  { %2415 = vmatpush.bf16.msrb.mxu0 %v5355_v8  ;;  %2431 = vmatpush.bf16.msra.mxu1 %v5311_v62  ;;  %v5562_v62 = vor.u32 %v6108_v61, %v5559_v21  ;;  %v5453_v61 = vld [vmem:[#allocation7 + $0x20] sm:$0xf]  ;;  %v6085_v21 = vld [vmem:[#allocation7 + $0x2c] sm:$0xf0] }
 0x3cc   :  { %2444 = vmatpush.bf16.msrb.mxu2 %v5315_v0  ;;  %2457 = vmatpush.bf16.msrb.mxu3 %v5319_v5  ;;  %v5533_v0 = vld [vmem:[#allocation7 + $0xc0] sm:$0xf]  ;;  %v5541_v5 = vld [vmem:[#allocation7 + $0xc8] sm:$0xf] }
 0x3cf   :  { %2416 = vmatpush.bf16.msrb.mxu0 %v5339_v26 }
 0x3d0   :  { %2771 = vmatpush.bf16.msra.mxu3 %v5562_v62  ;;  %v6083_v62 = vld [vmem:[#allocation7 + $0x24] sm:$0xf] }
 0x3d3   :  { %2417 = vmatpush.bf16.msrb.mxu0 %v5323_v41 }
 0x3d7   :  { %2418 = vmatpush.bf16.msrb.mxu0 %v5307_v59 }
 0x442   :  { %v2099_v7 = vpop.f32.mrf.mxu0  ;;  %v2112_v20 = vpop.f32.mrf.mxu1 }
 0x443   :  { %v2142_v45 = vadd.f32 %v2099_v7, %v1893_v17  ;;  %v2143_v22 = vadd.f32 %v2112_v20, %v1894_v19 }
 0x445   :  { %v5301_v30 = vmul.f32 -1.442695, %v2142_v45  ;;  %v5302_v31 = vmul.f32 -1.442695, %v2143_v22 }
 0x447   :  { %6262 = vpow2.f32 %v5301_v30 }
 0x448   :  { %6264 = vpow2.f32 %v5302_v31 }
 0x449   :  { %v2125_v50 = vpop.f32.mrf.mxu2  ;;  %v2138_v51 = vpop.f32.mrf.mxu3 }
 0x44a   :  { %v2144_v56 = vadd.f32 %v2125_v50, %v1895_v39  ;;  %v2101_v57 = vpop.f32.mrf.mxu0  ;;  %v2114_v58 = vpop.f32.mrf.mxu1  ;;  %v2145_v16 = vadd.f32 %v2138_v51, %v1896_v14  ;;  %v6101_v14 = vld [vmem:[#allocation7 + $0xac] sm:$0xf0] }
 0x44b   :  { %v5557_v57 = vld [vmem:[#allocation7 + $0xe8] sm:$0xf]  ;;  %v6110_v58 = vld [vmem:[#allocation7 + $0xf4] sm:$0xf0] }
 0x44c   :  { %v5303_v3 = vmul.f32 -1.442695, %v2144_v56  ;;  %v5551_v56 = vld [vmem:[#allocation7 + $0xf0] sm:$0xf0]  ;;  %v5558_v60 = vor.u32 %v6110_v58, %v5557_v57  ;;  %v6088_v58 = vld [vmem:[#allocation7 + $0x4c] sm:$0xf] }
 0x44d   :  { %v6263_v4 = vpop.eup %6262  ;;  %v5554_v59 = vor.u32 %v6107_v11, %v5551_v56  ;;  %v5477_v11 = vld [vmem:[#allocation7 + $0x48] sm:$0xf] }
 0x44e   :  { %v6265_v6 = vpop.eup %6264  ;;  %v2155_v38 = vadd.f32 1.0, %v6263_v4  ;;  %6266 = vpow2.f32 %v5303_v3  ;;  %2758 = vmatpush.bf16.msra.mxu2 %v5558_v60  ;;  %v5534_v3 = vor.u32 %v6105_v1, %v5533_v0  ;;  %v5535_v4 = vld [vmem:[#allocation7 + $0xd0] sm:$0xf0]  ;;  %v5454_v0 = vor.u32 %v6085_v21, %v5453_v61  ;;  %v5657_v61 = vld [vmem:[#allocation4 + $0xa8] sm:$0xf] }
 0x44f   :  { %v2156_v8 = vadd.f32 1.0, %v6265_v6  ;;  %2745 = vmatpush.bf16.msrb.mxu1 %v5554_v59  ;;  %v6106_v6 = vld [vmem:[#allocation7 + $0xd4] sm:$0xf0]  ;;  %v5479_v59 = vld [vmem:[#allocation7 + $0x58] sm:$0xf0] }
 0x450   :  { %6268 = vrcp.f32 %v2155_v38  ;;  %v2169_v45 = vand.u32 2147483648, %v2155_v38  ;;  %v2167_v24 = vand.u32 2147483647, %v2155_v38  ;;  %vm2163_vm0 = vweird.f32 %v2155_v38  ;;  %v5455_v1 = vld [vmem:[#allocation7 + $0x30] sm:$0xf0] }
 0x451   :  { %6270 = vrcp.f32 %v2156_v8  ;;  %v2127_v54 = vpop.f32.mrf.mxu2  ;;  %v2140_v18 = vpop.f32.mrf.mxu3  ;;  %v2184_v22 = vand.u32 2147483648, %v2156_v8  ;;  %v2182_v26 = vand.u32 2147483647, %v2156_v8  ;;  %vm2178_vm1 = vweird.f32 %v2156_v8  ;;  %v6134_v21 = vld [vmem:[#allocation4 + $0xb4] sm:$0xf0] }
 0x452   :  { %v2170_v30 = vor.u32 1.1754944e-38, %v2169_v45  ;;  %vm2168_vm4 = vcmp.eq.f32.partialorder %v2167_v24, 8.507059e+37  ;;  %v6104_v54 = vld [vmem:[#allocation7 + $0xcc] sm:$0xf]  ;;  %v5543_v18 = vld [vmem:[#allocation7 + $0xd8] sm:$0xf0]  ;;  %v5482_v60 = vor.u32 %v6088_v58, %v5479_v59 }
 0x453   :  { %v2185_v32 = vor.u32 1.1754944e-38, %v2184_v22  ;;  %vm2183_vm5 = vcmp.eq.f32.partialorder %v2182_v26, 8.507059e+37  ;;  %v6100_v45 = vld [vmem:[#allocation7 + $0xac] sm:$0xf]  ;;  %v5527_v22 = vld [vmem:[#allocation7 + $0xb8] sm:$0xf0] }
 0x454   :  { %v6267_v12 = vpop.eup %6266  ;;  %v5501_v24 = vld [vmem:[#allocation7 + $0x80] sm:$0xf]  ;;  %v6095_v26 = vld [vmem:[#allocation7 + $0x84] sm:$0xf]  ;;  %v5651_v58 = vld [vmem:[#allocation4 + $0xb0] sm:$0xf0] }
 0x455   :  { %v2157_v13 = vadd.f32 1.0, %v6267_v12  ;;  %v5546_v12 = vor.u32 %v6104_v54, %v5543_v18  ;;  %v5437_v54 = vld [vmem:[#allocation7] sm:$0xf]  ;;  %v6081_v18 = vld [vmem:[#allocation7 + $0xc] sm:$0xf0] }
 0x456   :  { %v6269_v15 = vpop.eup %6268 }
 0x457   :  { %v6271_v17 = vpop.eup %6270  ;;  %v2159_v7 = vmul.f32 %v6269_v15, %v2155_v38  ;;  %6272 = vrcp.f32 %v2157_v13  ;;  %vm2164_vm14 = vweird.f32 %v6269_v15  ;;  %v2199_v46 = vand.u32 2147483648, %v2157_v13  ;;  %2772 = vmatpush.bf16.msra.mxu3 %v5546_v12  ;;  %v6079_v12 = vld [vmem:[#allocation7 + $0x4] sm:$0xf] }
 0x458   :  { %v2174_v19 = vmul.f32 %v6271_v17, %v2156_v8  ;;  %6274 = vtanh.f32 %v2145_v16  ;;  %vm2179_vm15 = vweird.f32 %v6271_v17  ;;  %vm2165_vm2 = vmor %vm2163_vm0, %vm2164_vm14  ;;  %vm2193_vm7 = vweird.f32 %v2157_v13 }
 0x459   :  { %v2160_v20 = vsub.f32 1.0, %v2159_v7  ;;  %vm2180_vm3 = vmor %vm2178_vm1, %vm2179_vm15  ;;  %v2197_v47 = vand.u32 2147483647, %v2157_v13  ;;  %v2200_v49 = vor.u32 1.1754944e-38, %v2199_v46  ;;  %v5538_v38 = vor.u32 %v6103_v2, %v5535_v4  ;;  %v5525_v7 = vld [vmem:[#allocation7 + $0xa8] sm:$0xf] }
 0x45a   :  { %v2175_v44 = vsub.f32 1.0, %v2174_v19  ;;  %v5542_v8 = vor.u32 %v6106_v6, %v5541_v5  ;;  %v6102_v19 = vld [vmem:[#allocation7 + $0xb4] sm:$0xf0]  ;;  %v5461_v2 = vld [vmem:[#allocation7 + $0x28] sm:$0xf]  ;;  %v5458_v4 = vor.u32 %v6083_v62, %v5455_v1 }
 0x45b   :  { %v2161_v23 = vmul.f32 %v6269_v15, %v2160_v20  ;;  %vm2198_vm9 = vcmp.eq.f32.partialorder %v2197_v47, 8.507059e+37  ;;  %2746 = vmatpush.bf16.msrb.mxu1 %v5538_v38  ;;  %v6084_v6 = vld [vmem:[#allocation7 + $0x2c] sm:$0xf]  ;;  %v5463_v38 = vld [vmem:[#allocation7 + $0x38] sm:$0xf0] }
 0x45c   :  { %v2176_v25 = vmul.f32 %v6271_v17, %v2175_v44  ;;  %2759 = vmatpush.bf16.msra.mxu2 %v5542_v8  ;;  %v5526_v44 = vor.u32 %v6102_v19, %v5525_v7  ;;  %v5466_v8 = vor.u32 %v6084_v6, %v5463_v38  ;;  %v2215_v7 = vld [vmem:[#allocation2 + $0xd0] sm:$0x3]  ;;  %v6132_v62 = vld [vmem:[#allocation4 + $0xac] sm:$0xf] }
 0x45d   :  { %v6273_v27 = vpop.eup %6272  ;;  %v2162_v28 = vadd.f32 %v6269_v15, %v2161_v23  ;;  %v5530_v23 = vor.u32 %v6100_v45, %v5527_v22  ;;  %v5447_v45 = vld [vmem:[#allocation7 + $0x18] sm:$0xf0]  ;;  %v5681_v22 = vld [vmem:[#allocation4 + $0xe0] sm:$0xf] }
 0x45e   :  { %v2189_v29 = vmul.f32 %v6273_v27, %v2157_v13  ;;  %v2177_v31 = vadd.f32 %v6271_v17, %v2176_v25  ;;  %v6275_v34 = vpop.eup %6274  ;;  %vm2194_vm6 = vweird.f32 %v6273_v27  ;;  %v5517_v13 = vld [vmem:[#allocation7 + $0xa0] sm:$0xf]  ;;  %v6097_v25 = vld [vmem:[#allocation7 + $0x8c] sm:$0xf0] }
 0x45f   :  { %v2166_v33 = vsel %vm2165_vm2, %v6269_v15, %v2162_v28  ;;  %vm2195_vm8 = vmor %vm2193_vm7, %vm2194_vm6  ;;  %v6099_v15 = vld [vmem:[#allocation7 + $0xa4] sm:$0xf]  ;;  %v5518_v16 = vor.u32 %v6101_v14, %v5517_v13  ;;  %2773 = vmatpush.bf16.msra.mxu3 %v5530_v23  ;;  %v5503_v28 = vld [vmem:[#allocation7 + $0x90] sm:$0xf0]  ;;  %v5438_v13 = vor.u32 %v6081_v18, %v5437_v54 }
 0x460   :  { %v2190_v35 = vsub.f32 1.0, %v2189_v29  ;;  %v2171_v36 = vsel %vm2168_vm4, %v2170_v30, %v2166_v33  ;;  %v2181_v37 = vsel %vm2180_vm3, %v6271_v17, %v2177_v31  ;;  %v5519_v17 = vld [vmem:[#allocation7 + $0xb0] sm:$0xf0]  ;;  %2760 = vmatpush.bf16.msra.mxu2 %v5526_v44  ;;  %v5509_v29 = vld [vmem:[#allocation7 + $0x88] sm:$0xf]  ;;  %v5506_v31 = vor.u32 %v6095_v26, %v5503_v28 }
 0x461   :  { %v2186_v39 = vsel %vm2183_vm5, %v2185_v32, %v2181_v37  ;;  %v2205_v40 = vmul.f32 %v6275_v34, %v2171_v36  ;;  %v5522_v20 = vor.u32 %v6099_v15, %v5519_v17  ;;  %v6098_v30 = vld [vmem:[#allocation7 + $0x94] sm:$0xf0]  ;;  %v6096_v33 = vld [vmem:[#allocation7 + $0x8c] sm:$0xf]  ;;  %v5511_v34 = vld [vmem:[#allocation7 + $0x98] sm:$0xf0] }
 0x462   :  { %v2191_v41 = vmul.f32 %v6273_v27, %v2190_v35  ;;  %v2204_v42 = vmul.f32 %v2186_v39, %v6729_v9  ;;  %v5549_v9 = vld [vmem:[#allocation7 + $0xe0] sm:$0xf]  ;;  %v5510_v32 = vor.u32 %v6098_v30, %v5509_v29  ;;  %v5514_v35 = vor.u32 %v6096_v33, %v5511_v34  ;;  %v6093_v37 = vld [vmem:[#allocation7 + $0x6c] sm:$0xf0]  ;;  %v6091_v39 = vld [vmem:[#allocation7 + $0x64] sm:$0xf] }
 0x463   :  { %v5550_v55 = vor.u32 %v6109_v10, %v5549_v9  ;;  %2747 = vmatpush.bf16.msrb.mxu1 %v5522_v20  ;;  %v5485_v36 = vld [vmem:[#allocation7 + $0x60] sm:$0xf]  ;;  %v5471_v10 = vld [vmem:[#allocation7 + $0x50] sm:$0xf0]  ;;  %v5445_v15 = vld [vmem:[#allocation7 + $0x8] sm:$0xf] }
 0x464   :  { %v6733_v43 = vadd.f32 %v2205_v40, %v2204_v42  ;;  %v2192_v63 = vadd.f32 %v6273_v27, %v2191_v41  ;;  %2761 = vmatpush.bf16.msra.mxu2 %v5510_v32  ;;  %2774 = vmatpush.bf16.msra.mxu3 %v5514_v35  ;;  %v5486_v40 = vor.u32 %v6093_v37, %v5485_v36  ;;  %v5487_v41 = vld [vmem:[#allocation7 + $0x70] sm:$0xf0]  ;;  %v5493_v42 = vld [vmem:[#allocation7 + $0x68] sm:$0xf]  ;;  %v6080_v44 = vld [vmem:[#allocation7 + $0xc] sm:$0xf] }
 0x465   :  { %2732 = vmatpush.bf16.msra.mxu0 %v5550_v55  ;;  %v5490_v46 = vor.u32 %v6091_v39, %v5487_v41  ;;  %v6090_v55 = vld [vmem:[#allocation7 + $0x54] sm:$0xf0]  ;;  %v5439_v14 = vld [vmem:[#allocation7 + $0x10] sm:$0xf0]  ;;  %v2214_v17 = vld [vmem:[#allocation2 + $0xa8] sm:$0x3]  ;;  %v5450_v23 = vor.u32 %v6080_v44, %v5447_v45 }
 0x466   :  { %6276 = vtanh.f32 %v6733_v43  ;;  %v2196_v48 = vsel %vm2195_vm8, %v6273_v27, %v2192_v63  ;;  %v5502_v27 = vor.u32 %v6097_v25, %v5501_v24  ;;  %v6094_v63 = vld [vmem:[#allocation7 + $0x74] sm:$0xf0]  ;;  %v5478_v57 = vor.u32 %v6090_v55, %v5477_v11  ;;  %v6141_v24 = vld [vmem:[#allocation4 + $0xec] sm:$0xf0]  ;;  %v6139_v25 = vld [vmem:[#allocation4 + $0xe4] sm:$0xf] }
 0x467   :  { %v2201_v51 = vsel %vm2198_vm9, %v2200_v49, %v2196_v48  ;;  %2748 = vmatpush.bf16.msrb.mxu1 %v5506_v31  ;;  %v5494_v47 = vor.u32 %v6094_v63, %v5493_v42  ;;  %v6092_v48 = vld [vmem:[#allocation7 + $0x6c] sm:$0xf]  ;;  %v5495_v49 = vld [vmem:[#allocation7 + $0x78] sm:$0xf0]  ;;  %v5442_v19 = vor.u32 %v6079_v12, %v5439_v14  ;;  %v5683_v26 = vld [vmem:[#allocation4 + $0xf0] sm:$0xf0]  ;;  %v5682_v29 = vor.u32 %v6141_v24, %v5681_v22 }
 0x468   :  { %v5686_v30 = vor.u32 %v6139_v25, %v5683_v26  ;;  %v5689_v31 = vld [vmem:[#allocation4 + $0xe8] sm:$0xf]  ;;  %v6142_v32 = vld [vmem:[#allocation4 + $0xf4] sm:$0xf0]  ;;  %v6140_v33 = vld [vmem:[#allocation4 + $0xec] sm:$0xf] }
 0x469   :  { %2733 = vmatpush.bf16.msra.mxu0 %v5534_v3  ;;  %2762 = vmatpush.bf16.msra.mxu2 %v5494_v47  ;;  %v6086_v3 = vld [vmem:[#allocation7 + $0x34] sm:$0xf0]  ;;  %v5690_v36 = vor.u32 %v6142_v32, %v5689_v31  ;;  %v5691_v37 = vld [vmem:[#allocation4 + $0xf8] sm:$0xf0]  ;;  %v5665_v39 = vld [vmem:[#allocation4 + $0xc0] sm:$0xf] }
 0x46a   :  { %v5462_v5 = vor.u32 %v6086_v3, %v5461_v2  ;;  %v5694_v41 = vor.u32 %v6140_v33, %v5691_v37  ;;  %v6135_v63 = vld [vmem:[#allocation4 + $0xc4] sm:$0xf]  ;;  %v5673_v47 = vld [vmem:[#allocation4 + $0xc8] sm:$0xf]  ;;  %v2216_v11 = vld [vmem:[#allocation2 + $0x10] sm:$0x3]  ;;  %v5658_v2 = vor.u32 %v6134_v21, %v5657_v61 }
 0x46b   :  { %2749 = vmatpush.bf16.msrb.mxu1 %v5490_v46  ;;  %v5667_v46 = vld [vmem:[#allocation4 + $0xd0] sm:$0xf0]  ;;  %v5659_v3 = vld [vmem:[#allocation4 + $0xb8] sm:$0xf0]  ;;  %v6127_v18 = vld [vmem:[#allocation4 + $0x84] sm:$0xf] }
 0x46c   :  { %v6277_v50 = vpop.eup %6276  ;;  %v5662_v54 = vor.u32 %v6132_v62, %v5659_v3  ;;  %v5635_v12 = vld [vmem:[#allocation4 + $0x90] sm:$0xf0]  ;;  %v6130_v14 = vld [vmem:[#allocation4 + $0x94] sm:$0xf0]  ;;  %v5617_v25 = vld [vmem:[#allocation4 + $0x60] sm:$0xf] }
 0x46d   :  { %v2208_v52 = vmul.f32 %v6277_v50, %v2201_v51  ;;  %2734 = vmatpush.bf16.msra.mxu0 %v5518_v16  ;;  %v5498_v50 = vor.u32 %v6092_v48, %v5495_v49  ;;  %v5469_v51 = vld [vmem:[#allocation7 + $0x40] sm:$0xf]  ;;  %2763 = vmatpush.bf16.msra.mxu2 %v5478_v57  ;;  %v6082_v16 = vld [vmem:[#allocation7 + $0x14] sm:$0xf0]  ;;  %v6131_v57 = vld [vmem:[#allocation4 + $0xa4] sm:$0xf] }
 0x46e   :  { %v5446_v20 = vor.u32 %v6082_v16, %v5445_v15  ;;  %v6128_v15 = vld [vmem:[#allocation4 + $0x8c] sm:$0xf]  ;;  %v5643_v16 = vld [vmem:[#allocation4 + $0x98] sm:$0xf0]  ;;  %v6123_v31 = vld [vmem:[#allocation4 + $0x64] sm:$0xf] }
 0x46f   :  { %2210 = vst [vmem:[#allocation3 + $0x30] sm:$0x3] %v2208_v52  ;;  %v2218_v53 = vpack.c.bf16 %v2208_v52, %v2208_v52  ;;  %v6089_v52 = vld [vmem:[#allocation7 + $0x4c] sm:$0xf0]  ;;  %2775 = vmatpush.bf16.msra.mxu3 %v5498_v50  ;;  %v5670_v50 = vor.u32 %v6135_v63, %v5667_v46  ;;  %v5619_v32 = vld [vmem:[#allocation4 + $0x70] sm:$0xf0] }
 0x470   :  { %v5470_v9 = vor.u32 %v6089_v52, %v5469_v51  ;;  %v6138_v51 = vld [vmem:[#allocation4 + $0xd4] sm:$0xf0]  ;;  %v5601_v63 = vld [vmem:[#allocation4 + $0x40] sm:$0xf]  ;;  %v6117_v61 = vld [vmem:[#allocation4 + $0x2c] sm:$0xf0] }
 0x471   :  { %2419 = vmatmul.bf16.vlgmr.msrb.gmra.mxu0 %v2218_v53  ;;  %2432 = vmatmul.bf16.vlgmr.msra.gmra.mxu1 %v2218_v53  ;;  %v5674_v52 = vor.u32 %v6138_v51, %v5673_v47  ;;  %v5587_v3 = vld [vmem:[#allocation4 + $0x30] sm:$0xf0] }
 0x472   :  { %2445 = vmatmul.bf16.vlgmr.msrb.gmra.mxu2 %v2218_v53  ;;  %2458 = vmatmul.bf16.vlgmr.msrb.gmra.mxu3 %v2218_v53  ;;  %v6087_v53 = vld [vmem:[#allocation7 + $0x44] sm:$0xf] }
 0x473   :  { %2735 = vmatpush.bf16.msra.mxu0 %v5502_v27  ;;  %v5474_v56 = vor.u32 %v6087_v53, %v5471_v10  ;;  %2776 = vmatpush.bf16.msra.mxu3 %v5482_v60  ;;  %v6136_v53 = vld [vmem:[#allocation4 + $0xcc] sm:$0xf]  ;;  %v5649_v10 = vld [vmem:[#allocation4 + $0xa0] sm:$0xf]  ;;  %v5654_v60 = vor.u32 %v6131_v57, %v5651_v58 }
 0x474   :  { %2764 = vmatpush.bf16.msra.mxu2 %v5462_v5  ;;  %v6129_v5 = vld [vmem:[#allocation4 + $0x8c] sm:$0xf0]  ;;  %v5585_v57 = vld [vmem:[#allocation4 + $0x20] sm:$0xf] }
 0x475   :  { %2750 = vmatpush.bf16.msrb.mxu1 %v5474_v56  ;;  %v6133_v56 = vld [vmem:[#allocation4 + $0xac] sm:$0xf0] }
 0x476   :  { %v5650_v59 = vor.u32 %v6133_v56, %v5649_v10  ;;  %v5611_v56 = vld [vmem:[#allocation4 + $0x58] sm:$0xf0] }
 0x477   :  { %2736 = vmatpush.bf16.msra.mxu0 %v5486_v40  ;;  %2777 = vmatpush.bf16.msra.mxu3 %v5466_v8  ;;  %v6137_v40 = vld [vmem:[#allocation4 + $0xcc] sm:$0xf0] }
 0x478   :  { %2765 = vmatpush.bf16.msra.mxu2 %v5446_v20  ;;  %v5666_v42 = vor.u32 %v6137_v40, %v5665_v39 }
 0x479   :  { %2751 = vmatpush.bf16.msrb.mxu1 %v5458_v4  ;;  %v5633_v4 = vld [vmem:[#allocation4 + $0x80] sm:$0xf] }
 0x47b   :  { %2737 = vmatpush.bf16.msra.mxu0 %v5470_v9  ;;  %2778 = vmatpush.bf16.msra.mxu3 %v5450_v23  ;;  %v5675_v9 = vld [vmem:[#allocation4 + $0xd8] sm:$0xf0]  ;;  %v5646_v23 = vor.u32 %v6128_v15, %v5643_v16 }
 0x47c   :  { %3128 = vmatpush.bf16.msrb.mxu2 %v5690_v36  ;;  %v5678_v55 = vor.u32 %v6136_v53, %v5675_v9  ;;  %v6126_v36 = vld [vmem:[#allocation4 + $0x74] sm:$0xf0]  ;;  %v5609_v53 = vld [vmem:[#allocation4 + $0x48] sm:$0xf] }
 0x47d   :  { %2752 = vmatpush.bf16.msrb.mxu1 %v5442_v19  ;;  %v5638_v19 = vor.u32 %v6127_v18, %v5635_v12  ;;  %v6122_v9 = vld [vmem:[#allocation4 + $0x54] sm:$0xf0] }
 0x47e   :  { %v6118_v12 = vld [vmem:[#allocation4 + $0x34] sm:$0xf0] }
 0x47f   :  { %2738 = vmatpush.bf16.msra.mxu0 %v5454_v0  ;;  %3157 = vmatpush.bf16.msrb.mxu3 %v5694_v41  ;;  %v6124_v41 = vld [vmem:[#allocation4 + $0x6c] sm:$0xf] }
 0x480   :  { %3129 = vmatpush.bf16.msrb.mxu2 %v5674_v52  ;;  %v5603_v52 = vld [vmem:[#allocation4 + $0x50] sm:$0xf0] }
 0x481   :  { %3099 = vmatpush.bf16.msra.mxu1 %v5686_v30 }
 0x483   :  { %2739 = vmatpush.bf16.msra.mxu0 %v5438_v13  ;;  %3158 = vmatpush.bf16.msrb.mxu3 %v5678_v55  ;;  %v5641_v13 = vld [vmem:[#allocation4 + $0x88] sm:$0xf]  ;;  %v6120_v55 = vld [vmem:[#allocation4 + $0x4c] sm:$0xf] }
 0x484   :  { %3130 = vmatpush.bf16.msrb.mxu2 %v5658_v2  ;;  %v5642_v44 = vor.u32 %v6130_v14, %v5641_v13  ;;  %v6115_v2 = vld [vmem:[#allocation4 + $0x24] sm:$0xf]  ;;  %v6116_v13 = vld [vmem:[#allocation4 + $0x2c] sm:$0xf]  ;;  %v5595_v14 = vld [vmem:[#allocation4 + $0x38] sm:$0xf0] }
 0x485   :  { %3100 = vmatpush.bf16.msra.mxu1 %v5670_v50  ;;  %v5590_v18 = vor.u32 %v6115_v2, %v5587_v3 }
 0x487   :  { %3070 = vmatpush.bf16.msrb.mxu0 %v5682_v29  ;;  %3159 = vmatpush.bf16.msrb.mxu3 %v5662_v54  ;;  %v2217_v29 = vld [vmem:[#allocation2 + $0x28] sm:$0x3] }
 0x488   :  { %3131 = vmatpush.bf16.msrb.mxu2 %v5642_v44 }
 0x489   :  { %3101 = vmatpush.bf16.msra.mxu1 %v5654_v60 }
 0x48b   :  { %3071 = vmatpush.bf16.msrb.mxu0 %v5666_v42  ;;  %3160 = vmatpush.bf16.msrb.mxu3 %v5646_v23  ;;  %v5627_v42 = vld [vmem:[#allocation4 + $0x78] sm:$0xf0] }
 0x48c   :  { %v5630_v47 = vor.u32 %v6124_v41, %v5627_v42 }
 0x48d   :  { %3102 = vmatpush.bf16.msra.mxu1 %v5638_v19  ;;  %v6113_v19 = vld [vmem:[#allocation4 + $0xc] sm:$0xf0] }
 0x48f   :  { %3072 = vmatpush.bf16.msrb.mxu0 %v5650_v59  ;;  %3161 = vmatpush.bf16.msrb.mxu3 %v5630_v47 }
 0x4ee   :  { %v2420_v27 = vpop.f32.mrf.mxu0  ;;  %v2433_v28 = vpop.f32.mrf.mxu1 }
 0x4ef   :  { %v2463_v34 = vadd.f32 %v2420_v27, %v2214_v17  ;;  %v2464_v35 = vadd.f32 %v2433_v28, %v2215_v7  ;;  %v5634_v7 = vor.u32 %v6129_v5, %v5633_v4  ;;  %v6125_v28 = vld [vmem:[#allocation4 + $0x6c] sm:$0xf0] }
 0x4f0   :  { %v5618_v30 = vor.u32 %v6125_v28, %v5617_v25  ;;  %v5571_v25 = vld [vmem:[#allocation4 + $0x10] sm:$0xf0] }
 0x4f1   :  { %v5432_v48 = vmul.f32 -1.442695, %v2463_v34  ;;  %v5433_v49 = vmul.f32 -1.442695, %v2464_v35  ;;  %3073 = vmatpush.bf16.msrb.mxu0 %v5634_v7  ;;  %v5622_v34 = vor.u32 %v6123_v31, %v5619_v32  ;;  %v5625_v35 = vld [vmem:[#allocation4 + $0x68] sm:$0xf] }
 0x4f2   :  { %v5626_v40 = vor.u32 %v6126_v36, %v5625_v35  ;;  %v5569_v7 = vld [vmem:[#allocation4] sm:$0xf] }
 0x4f3   :  { %6278 = vpow2.f32 %v5432_v48  ;;  %3103 = vmatpush.bf16.msra.mxu1 %v5622_v34  ;;  %v6121_v48 = vld [vmem:[#allocation4 + $0x4c] sm:$0xf0]  ;;  %v5570_v23 = vor.u32 %v6113_v19, %v5569_v7  ;;  %v5579_v34 = vld [vmem:[#allocation4 + $0x18] sm:$0xf0] }
 0x4f4   :  { %6280 = vpow2.f32 %v5433_v49  ;;  %v6119_v49 = vld [vmem:[#allocation4 + $0x44] sm:$0xf]  ;;  %3132 = vmatpush.bf16.msrb.mxu2 %v5626_v40  ;;  %v5602_v51 = vor.u32 %v6121_v48, %v5601_v63 }
 0x4f5   :  { %v2446_v0 = vpop.f32.mrf.mxu2  ;;  %v2459_v1 = vpop.f32.mrf.mxu3  ;;  %3074 = vmatpush.bf16.msrb.mxu0 %v5618_v30  ;;  %v5606_v62 = vor.u32 %v6119_v49, %v5603_v52 }
 0x4f6   :  { %v2465_v6 = vadd.f32 %v2446_v0, %v2216_v11  ;;  %v2422_v38 = vpop.f32.mrf.mxu0  ;;  %v2435_v8 = vpop.f32.mrf.mxu1  ;;  %v2466_v39 = vadd.f32 %v2459_v1, %v2217_v29  ;;  %v5610_v0 = vor.u32 %v6122_v9, %v5609_v53  ;;  %v5614_v1 = vor.u32 %v6120_v55, %v5611_v56  ;;  %v2856_v55 = vld [vmem:[#allocation3 + $0x8] sm:$0xff]  ;;  %v2855_v56 = vld [vmem:[#allocation3] sm:$0xff] }
 0x4f7   :  { %v5586_v38 = vor.u32 %v6117_v61, %v5585_v57  ;;  %v5593_v8 = vld [vmem:[#allocation4 + $0x28] sm:$0xf]  ;;  %3104 = vmatpush.bf16.msra.mxu1 %v5606_v62  ;;  %v2863_v57 = vpack.c.bf16 %v2856_v55, %v2855_v56  ;;  %v2859_v61 = vld [vmem:[#allocation3 + $0x10] sm:$0xff]  ;;  %v2535_v62 = vld [vmem:[#allocation2 + $0xa0] sm:$0x3] }
 0x4f8   :  { %v5434_v17 = vmul.f32 -1.442695, %v2465_v6  ;;  %3133 = vmatpush.bf16.msrb.mxu2 %v5610_v0  ;;  %3162 = vmatpush.bf16.msrb.mxu3 %v5614_v1  ;;  %v5594_v16 = vor.u32 %v6118_v12, %v5593_v8  ;;  %v2536_v1 = vld [vmem:[#allocation2 + $0xf8] sm:$0x3]  ;;  %v5811_v8 = vld [vmem:[#allocation7 + $0x1e0] sm:$0xf] }
 0x4f9   :  { %v6279_v20 = vpop.eup %6278  ;;  %3075 = vmatpush.bf16.msrb.mxu0 %v5602_v51 }
 0x4fa   :  { %v6281_v45 = vpop.eup %6280  ;;  %v6736_v22 = vadd.f32 1.0, %v6279_v20  ;;  %6282 = vpow2.f32 %v5434_v17  ;;  %v5598_v17 = vor.u32 %v6116_v13, %v5595_v14  ;;  %v6111_v20 = vld [vmem:[#allocation4 + $0x4] sm:$0xf] }
 0x4fb   :  { %v6738_v24 = vadd.f32 1.0, %v6281_v45  ;;  %3105 = vmatpush.bf16.msra.mxu1 %v5590_v18  ;;  %v5574_v35 = vor.u32 %v6111_v20, %v5571_v25  ;;  %v6171_v18 = vld [vmem:[#allocation7 + $0x1e4] sm:$0xf]  ;;  %v5821_v25 = vld [vmem:[#allocation7 + $0x1f8] sm:$0xf0] }
 0x4fc   :  { %6284 = vrcp.f32 %v6736_v22  ;;  %v2488_v33 = vand.u32 2147483647, %v6736_v22  ;;  %v2490_v60 = vand.u32 2147483648, %v6736_v22  ;;  %vm2484_vm14 = vweird.f32 %v6736_v22  ;;  %3134 = vmatpush.bf16.msrb.mxu2 %v5594_v16  ;;  %3163 = vmatpush.bf16.msrb.mxu3 %v5598_v17  ;;  %v5819_v16 = vld [vmem:[#allocation7 + $0x1e8] sm:$0xf] }
 0x4fd   :  { %6286 = vrcp.f32 %v6738_v24  ;;  %v2448_v26 = vpop.f32.mrf.mxu2  ;;  %v2461_v27 = vpop.f32.mrf.mxu3  ;;  %v2505_v59 = vand.u32 2147483648, %v6738_v24  ;;  %v2503_v6 = vand.u32 2147483647, %v6738_v24  ;;  %3076 = vmatpush.bf16.msrb.mxu0 %v5586_v38  ;;  %vm2499_vm13 = vweird.f32 %v6738_v24  ;;  %v2537_v38 = vld [vmem:[#allocation2 + $0x20] sm:$0x3] }
 0x4fe   :  { %vm6756_vm10 = vcmp.eq.f32.partialorder %v2488_v33, 8.507059e+37  ;;  %v5577_v26 = vld [vmem:[#allocation4 + $0x8] sm:$0xf]  ;;  %v6114_v27 = vld [vmem:[#allocation4 + $0x14] sm:$0xf0]  ;;  %v2491_v31 = vor.u32 1.1754944e-38, %v2490_v60 }
 0x4ff   :  { %v2506_v29 = vor.u32 1.1754944e-38, %v2505_v59  ;;  %v6112_v33 = vld [vmem:[#allocation4 + $0xc] sm:$0xf]  ;;  %vm2504_vm1 = vcmp.eq.f32.partialorder %v2503_v6, 8.507059e+37  ;;  %v5578_v36 = vor.u32 %v6114_v27, %v5577_v26  ;;  %3106 = vmatpush.bf16.msra.mxu1 %v5574_v35  ;;  %v2860_v60 = vld [vmem:[#allocation3 + $0x30] sm:$0xff] }
 0x500   :  { %v6283_v37 = vpop.eup %6282  ;;  %v5582_v41 = vor.u32 %v6112_v33, %v5579_v34  ;;  %v6174_v17 = vld [vmem:[#allocation7 + $0x1f4] sm:$0xf0]  ;;  %v6799_v26 = vld [vmem:[%s7356_s6 + $0x4] sm:$0xf]  ;;  %v6167_v33 = vld [vmem:[#allocation7 + $0x1c4] sm:$0xf] }
 0x501   :  { %v6743_v46 = vadd.f32 1.0, %v6283_v37  ;;  %3077 = vmatpush.bf16.msrb.mxu0 %v5570_v23  ;;  %3135 = vmatpush.bf16.msrb.mxu2 %v5578_v36  ;;  %v6172_v23 = vld [vmem:[#allocation7 + $0x1ec] sm:$0xf]  ;;  %v5797_v34 = vld [vmem:[#allocation7 + $0x1d0] sm:$0xf0] }
 0x502   :  { %v6745_v50 = vpop.eup %6284  ;;  %3164 = vmatpush.bf16.msrb.mxu3 %v5582_v41  ;;  %v6801_v27 = vor.u32 %v6172_v23, %v5821_v25  ;;  %v6150_v23 = vld [vmem:[#allocation7 + $0x134] sm:$0xf0] }
 0x503   :  { %v6747_v10 = vpop.eup %6286  ;;  %v2480_v11 = vmul.f32 %v6745_v50, %v6736_v22  ;;  %6288 = vrcp.f32 %v6743_v46  ;;  %vm2485_vm11 = vweird.f32 %v6745_v50  ;;  %vm2514_vm3 = vweird.f32 %v6743_v46 }
 0x504   :  { %v2495_v58 = vmul.f32 %v6747_v10, %v6738_v24  ;;  %6290 = vtanh.f32 %v2466_v39  ;;  %vm2500_vm12 = vweird.f32 %v6747_v10  ;;  %vm2486_vm15 = vmor %vm2484_vm14, %vm2485_vm11  ;;  %v2518_v51 = vand.u32 2147483647, %v6743_v46 }
 0x505   :  { %v2481_v21 = vsub.f32 1.0, %v2480_v11  ;;  %vm2501_vm0 = vmor %vm2499_vm13, %vm2500_vm12 }
 0x506   :  { %v2496_v4 = vsub.f32 1.0, %v2495_v58  ;;  %vm2519_vm5 = vcmp.eq.f32.partialorder %v2518_v51, 8.507059e+37  ;;  %v2857_v58 = vld [vmem:[#allocation3 + $0x28] sm:$0xff] }
 0x507   :  { %v2482_v54 = vmul.f32 %v6745_v50, %v2481_v21  ;;  %v2865_v21 = vpack.c.bf16 %v2860_v60, %v2859_v61 }
 0x508   :  { %v2497_v15 = vmul.f32 %v6747_v10, %v2496_v4 }
 0x509   :  { %v6289_v44 = vpop.eup %6288  ;;  %v2483_v45 = vadd.f32 %v6745_v50, %v2482_v54  ;;  %v6173_v54 = vld [vmem:[#allocation7 + $0x1ec] sm:$0xf0] }
 0x50a   :  { %v6291_v28 = vpop.eup %6290  ;;  %v2510_v30 = vmul.f32 %v6289_v44, %v6743_v46  ;;  %v2498_v32 = vadd.f32 %v6747_v10, %v2497_v15  ;;  %vm2515_vm2 = vweird.f32 %v6289_v44  ;;  %v6789_v14 = vor.u32 %v6173_v54, %v5811_v8  ;;  %v5813_v15 = vld [vmem:[#allocation7 + $0x1f0] sm:$0xf0] }
 0x50b   :  { %v2487_v22 = vsel %vm2486_vm15, %v6745_v50, %v2483_v45  ;;  %v2520_v50 = vand.u32 2147483648, %v6743_v46  ;;  %vm2516_vm4 = vmor %vm2514_vm3, %vm2515_vm2  ;;  %v2858_v46 = vld [vmem:[#allocation3 + $0x38] sm:$0xff]  ;;  %v6791_v19 = vor.u32 %v6171_v18, %v5813_v15  ;;  %v6793_v45 = vor.u32 %v6174_v17, %v5819_v16  ;;  %v5765_v18 = vld [vmem:[#allocation7 + $0x190] sm:$0xf0] }
 0x50c   :  { %v2511_v37 = vsub.f32 1.0, %v2510_v30  ;;  %v2492_v39 = vsel %vm6756_vm10, %v2491_v31, %v2487_v22  ;;  %v2502_v40 = vsel %vm2501_vm0, %v6747_v10, %v2498_v32  ;;  %v2864_v59 = vpack.c.bf16 %v2858_v46, %v2857_v58  ;;  %v6169_v30 = vld [vmem:[#allocation7 + $0x1cc] sm:$0xf0]  ;;  %v5803_v22 = vld [vmem:[#allocation7 + $0x1c8] sm:$0xf] }
 0x50d   :  { %v2507_v42 = vsel %vm2504_vm1, %v2506_v29, %v2502_v40  ;;  %v2526_v63 = vmul.f32 %v6291_v28, %v2492_v39  ;;  %v2521_v53 = vor.u32 1.1754944e-38, %v2520_v50  ;;  %v5795_v29 = vld [vmem:[#allocation7 + $0x1c0] sm:$0xf]  ;;  %v6813_v39 = vperm.slane %v6799_v26, 0  ;;  %v6170_v40 = vld [vmem:[#allocation7 + $0x1d4] sm:$0xf0] }
 0x50e   :  { %v2512_v24 = vmul.f32 %v6289_v44, %v2511_v37  ;;  %v2525_v47 = vmul.f32 %v2507_v42, %v6733_v43  ;;  %v6805_v32 = vor.u32 %v6169_v30, %v5795_v29  ;;  %v6810_v37 = vor.u32 %v6167_v33, %v5797_v34  ;;  %v2538_v50 = vld [vmem:[#allocation2 + $0x98] sm:$0x3]  ;;  %v6163_v46 = vld [vmem:[#allocation7 + $0x1a4] sm:$0xf]  ;;  %v5781_v58 = vld [vmem:[#allocation7 + $0x1b0] sm:$0xf0] }
 0x50f   :  { %v6819_v42 = vperm.slane %v6799_v26, 1  ;;  %v6162_v17 = vld [vmem:[#allocation7 + $0x194] sm:$0xf0]  ;;  %v5747_v29 = vld [vmem:[#allocation7 + $0x160] sm:$0xf] }
 0x510   :  { %v6781_v48 = vadd.f32 %v2526_v63, %v2525_v47  ;;  %v2513_v49 = vadd.f32 %v6289_v44, %v2512_v24  ;;  %v6821_v63 = vor.u32 %v6170_v40, %v5803_v22  ;;  %v6168_v24 = vld [vmem:[#allocation7 + $0x1cc] sm:$0xf]  ;;  %v5805_v47 = vld [vmem:[#allocation7 + $0x1d8] sm:$0xf0]  ;;  %v6157_v30 = vld [vmem:[#allocation7 + $0x16c] sm:$0xf0] }
 0x512   :  { %6292 = vtanh.f32 %v6781_v48  ;;  %v2517_v52 = vsel %vm2516_vm4, %v6289_v44, %v2513_v49  ;;  %v5779_v49 = vld [vmem:[#allocation7 + $0x1a0] sm:$0xf] }
 0x513   :  { %v2522_v9 = vsel %vm2519_vm5, %v2521_v53, %v2517_v52 }
 0x518   :  { %v6293_v43 = vpop.eup %6292 }
 0x519   :  { %v2529_v10 = vmul.f32 %v6293_v43, %v2522_v9  ;;  %v6829_v43 = vperm.slane %v6799_v26, 2  ;;  %v6165_v9 = vld [vmem:[#allocation7 + $0x1ac] sm:$0xf0] }
 0x51b   :  { %2531 = vst [vmem:[#allocation3 + $0x18] sm:$0x3] %v2529_v10  ;;  %v2539_v11 = vpack.c.bf16 %v2529_v10, %v2529_v10 }
 0x51d   :  { %2740 = vmatmul.bf16.vlgmr.msra.gmra.mxu0 %v2539_v11  ;;  %2753 = vmatmul.bf16.vlgmr.msrb.gmra.mxu1 %v2539_v11 }
 0x51e   :  { %2766 = vmatmul.bf16.vlgmr.msra.gmra.mxu2 %v2539_v11  ;;  %2779 = vmatmul.bf16.vlgmr.msra.gmra.mxu3 %v2539_v11 }
 0x51f   :  { %3420 = vmatpush.bf16.msra.mxu0 %v6789_v14  ;;  %3433 = vmatpush.bf16.msrb.mxu1 %v6791_v19 }
 0x520   :  { %3446 = vmatpush.bf16.msra.mxu2 %v6793_v45  ;;  %3459 = vmatpush.bf16.msra.mxu3 %v6801_v27 }
 0x523   :  { %3421 = vmatpush.bf16.msra.mxu0 %v6805_v32  ;;  %3434 = vmatpush.bf16.msrb.mxu1 %v6810_v37 }
 0x524   :  { %3447 = vmatpush.bf16.msra.mxu2 %v6821_v63 }
 0x52d   :  { %3078 = vmatmul.bf16.vlgmr.msrb.gmra.mxu0 %v2863_v57  ;;  %3107 = vmatmul.bf16.vlgmr.msra.gmra.mxu1 %v2863_v57 }
 0x52e   :  { %3136 = vmatmul.bf16.vlgmr.msrb.gmra.mxu2 %v2863_v57  ;;  %3165 = vmatmul.bf16.vlgmr.msrb.gmra.mxu3 %v2863_v57  ;;  %v6833_v57 = vor.u32 %v6165_v9, %v5779_v49  ;;  %v5755_v49 = vld [vmem:[#allocation7 + $0x168] sm:$0xf] }
 0x530   :  { %3422 = vmatpush.bf16.msra.mxu0 %v6833_v57 }
 0x53d   :  { %3083 = vmatmul.bf16.gmra.mxu0 %v2864_v59  ;;  %3112 = vmatmul.bf16.gmra.mxu1 %v2864_v59 }
 0x53e   :  { %3141 = vmatmul.bf16.gmra.mxu2 %v2864_v59  ;;  %3170 = vmatmul.bf16.gmra.mxu3 %v2864_v59  ;;  %v6835_v59 = vor.u32 %v6168_v24, %v5805_v47  ;;  %v5749_v47 = vld [vmem:[#allocation7 + $0x170] sm:$0xf0] }
 0x540   :  { %3460 = vmatpush.bf16.msra.mxu3 %v6835_v59 }
 0x54d   :  { %3088 = vmatmul.bf16.gmra.mxu0 %v2865_v21  ;;  %3117 = vmatmul.bf16.gmra.mxu1 %v2865_v21 }
 0x54e   :  { %3146 = vmatmul.bf16.gmra.mxu2 %v2865_v21  ;;  %3175 = vmatmul.bf16.gmra.mxu3 %v2865_v21 }
 0x59a   :  { %v2741_v0 = vpop.f32.mrf.mxu0  ;;  %v2754_v2 = vpop.f32.mrf.mxu1 }
 0x59b   :  { %v2784_v3 = vadd.f32 %v2741_v0, %v2535_v62  ;;  %v2785_v4 = vadd.f32 %v2754_v2, %v2536_v1  ;;  %v5787_v62 = vld [vmem:[#allocation7 + $0x1a8] sm:$0xf]  ;;  %v6166_v0 = vld [vmem:[#allocation7 + $0x1b4] sm:$0xf0] }
 0x59d   :  { %v5563_v5 = vmul.f32 -1.442695, %v2784_v3  ;;  %v5564_v6 = vmul.f32 -1.442695, %v2785_v4  ;;  %v6842_v3 = vor.u32 %v6163_v46, %v5781_v58  ;;  %v6844_v4 = vor.u32 %v6166_v0, %v5787_v62  ;;  %v5773_v58 = vld [vmem:[#allocation7 + $0x198] sm:$0xf0] }
 0x59e   :  { %v6892_v0 = vor.u32 %v6157_v30, %v5747_v29  ;;  %v6148_v29 = vld [vmem:[#allocation7 + $0x12c] sm:$0xf] }
 0x59f   :  { %6294 = vpow2.f32 %v5563_v5  ;;  %v5763_v5 = vld [vmem:[#allocation7 + $0x180] sm:$0xf]  ;;  %3435 = vmatpush.bf16.msrb.mxu1 %v6842_v3  ;;  %3448 = vmatpush.bf16.msra.mxu2 %v6844_v4 }
 0x5a0   :  { %6296 = vpow2.f32 %v5564_v6  ;;  %v6161_v6 = vld [vmem:[#allocation7 + $0x18c] sm:$0xf0] }
 0x5a1   :  { %v2767_v12 = vpop.f32.mrf.mxu2  ;;  %v6787_v13 = vpop.f32.mrf.mxu3  ;;  %v6849_v54 = vor.u32 %v6161_v6, %v5763_v5  ;;  %v6151_v5 = vld [vmem:[#allocation7 + $0x144] sm:$0xf]  ;;  %v5733_v6 = vld [vmem:[#allocation7 + $0x150] sm:$0xf0] }
 0x5a2   :  { %v2786_v7 = vadd.f32 %v2767_v12, %v2537_v38  ;;  %v2743_v20 = vpop.f32.mrf.mxu0  ;;  %v2756_v44 = vpop.f32.mrf.mxu1  ;;  %v2787_v2 = vadd.f32 %v6787_v13, %v2538_v50  ;;  %v6159_v38 = vld [vmem:[#allocation7 + $0x184] sm:$0xf]  ;;  %v5771_v12 = vld [vmem:[#allocation7 + $0x188] sm:$0xf]  ;;  %v6854_v13 = vperm.slane %v6799_v26, 3 }
 0x5a3   :  { %v6858_v16 = vor.u32 %v6159_v38, %v5765_v18  ;;  %v5789_v26 = vld [vmem:[#allocation7 + $0x1b8] sm:$0xf0]  ;;  %3423 = vmatpush.bf16.msra.mxu0 %v6849_v54  ;;  %v6877_v40 = vor.u32 %v6162_v17, %v5771_v12 }
 0x5a4   :  { %v5565_v28 = vmul.f32 -1.442695, %v2786_v7  ;;  %v6164_v7 = vld [vmem:[#allocation7 + $0x1ac] sm:$0xf] }
 0x5a5   :  { %v6295_v31 = vpop.eup %6294  ;;  %v6879_v24 = vor.u32 %v6164_v7, %v5789_v26  ;;  %3436 = vmatpush.bf16.msrb.mxu1 %v6858_v16  ;;  %3449 = vmatpush.bf16.msra.mxu2 %v6877_v40  ;;  %v5739_v7 = vld [vmem:[#allocation7 + $0x148] sm:$0xf] }
 0x5a6   :  { %v6297_v35 = vpop.eup %6296  ;;  %v6808_v36 = vadd.f32 1.0, %v6295_v31  ;;  %6298 = vpow2.f32 %v5565_v28  ;;  %v6155_v31 = vld [vmem:[#allocation7 + $0x164] sm:$0xf] }
 0x5a7   :  { %v6815_v41 = vadd.f32 1.0, %v6297_v35  ;;  %3461 = vmatpush.bf16.msra.mxu3 %v6879_v24  ;;  %3424 = vmatpush.bf16.msra.mxu0 %v6892_v0 }
 0x5a8   :  { %6300 = vrcp.f32 %v6808_v36  ;;  %v2809_v51 = vand.u32 2147483647, %v6808_v36  ;;  %v2811_v11 = vand.u32 2147483648, %v6808_v36  ;;  %vm2805_vm7 = vweird.f32 %v6808_v36 }
 0x5a9   :  { %6302 = vrcp.f32 %v6815_v41  ;;  %v2769_v52 = vpop.f32.mrf.mxu2  ;;  %v2782_v53 = vpop.f32.mrf.mxu3  ;;  %v2826_v10 = vand.u32 2147483648, %v6815_v41  ;;  %v2824_v60 = vand.u32 2147483647, %v6815_v41  ;;  %vm2820_vm10 = vweird.f32 %v6815_v41 }
 0x5aa   :  { %v3079_v55 = vpop.f32.mrf.mxu0  ;;  %v3108_v56 = vpop.f32.mrf.mxu1  ;;  %vm6865_vm6 = vcmp.eq.f32.partialorder %v2809_v51, 8.507059e+37  ;;  %v6869_v25 = vor.u32 1.1754944e-38, %v2811_v11  ;;  %v6160_v11 = vld [vmem:[#allocation7 + $0x18c] sm:$0xf] }
 0x5ab   :  { %v3080_v61 = vadd.f32 %v3079_v55, %v6813_v39  ;;  %v3109_v21 = vadd.f32 %v3108_v56, %v6819_v42  ;;  %v6875_v34 = vor.u32 1.1754944e-38, %v2826_v10  ;;  %v6158_v10 = vld [vmem:[#allocation7 + $0x174] sm:$0xf0]  ;;  %vm6904_vm11 = vcmp.eq.f32.partialorder %v2824_v60, 8.507059e+37 }
 0x5ac   :  { %v6299_v1 = vpop.eup %6298  ;;  %v6908_v17 = vor.u32 %v6160_v11, %v5773_v58  ;;  %v5723_v58 = vld [vmem:[#allocation7 + $0x128] sm:$0xf] }
 0x5ad   :  { %v6847_v8 = vadd.f32 1.0, %v6299_v1  ;;  %3186 = vst [vmem:[#allocation2 + $0xb0] sm:$0xff] %v3080_v61  ;;  %v5731_v61 = vld [vmem:[#allocation7 + $0x140] sm:$0xf]  ;;  %v6894_v1 = vor.u32 %v6155_v31, %v5749_v47  ;;  %v6156_v31 = vld [vmem:[#allocation7 + $0x16c] sm:$0xf] }
 0x5ae   :  { %v6851_v15 = vpop.eup %6300  ;;  %3187 = vst [vmem:[#allocation2] sm:$0xff] %v3109_v21  ;;  %v6153_v21 = vld [vmem:[#allocation7 + $0x14c] sm:$0xf0]  ;;  %3462 = vmatpush.bf16.msra.mxu3 %v6908_v17 }
 0x5af   :  { %v6860_v20 = vpop.eup %6302  ;;  %v2801_v44 = vmul.f32 %v6851_v15, %v6808_v36  ;;  %6304 = vrcp.f32 %v6847_v8  ;;  %vm2806_vm9 = vweird.f32 %v6851_v15  ;;  %3437 = vmatpush.bf16.msrb.mxu1 %v6894_v1  ;;  %v6923_v30 = vor.u32 %v6153_v21, %v5731_v61  ;;  %v6145_v36 = vld [vmem:[#allocation7 + $0x10c] sm:$0xf0] }
 0x5b0   :  { %v2816_v28 = vmul.f32 %v6860_v20, %v6815_v41  ;;  %6306 = vtanh.f32 %v2787_v2  ;;  %vm2821_vm8 = vweird.f32 %v6860_v20  ;;  %v6896_v2 = vor.u32 %v6158_v10, %v5755_v49  ;;  %vm6916_vm12 = vmor %vm2805_vm7, %vm2806_vm9  ;;  %v5715_v49 = vld [vmem:[#allocation7 + $0x120] sm:$0xf] }
 0x5b1   :  { %v2802_v33 = vsub.f32 1.0, %v2801_v44  ;;  %v3137_v22 = vpop.f32.mrf.mxu2  ;;  %v3166_v35 = vpop.f32.mrf.mxu3  ;;  %v6154_v44 = vld [vmem:[#allocation7 + $0x154] sm:$0xf0]  ;;  %vm6929_vm13 = vmor %vm2820_vm10, %vm2821_vm8  ;;  %3425 = vmatpush.bf16.msra.mxu0 %v6923_v30  ;;  %vm2835_vm15 = vweird.f32 %v6847_v8 }
 0x5b2   :  { %v2817_v50 = vsub.f32 1.0, %v2816_v28  ;;  %v3138_v51 = vadd.f32 %v3137_v22, %v6829_v43  ;;  %v3167_v52 = vadd.f32 %v3166_v35, %v6854_v13  ;;  %v3081_v53 = vpop.f32.mrf.mxu0  ;;  %v3110_v9 = vpop.f32.mrf.mxu1  ;;  %3450 = vmatpush.bf16.msra.mxu2 %v6896_v2  ;;  %v6938_v35 = vor.u32 %v6151_v5, %v5733_v6 }
 0x5b3   :  { %v2803_v55 = vmul.f32 %v6851_v15, %v2802_v33  ;;  %v3082_v56 = vadd.f32 %v3081_v53, %v6813_v39  ;;  %v3111_v46 = vadd.f32 %v3110_v9, %v6819_v42  ;;  %v5757_v33 = vld [vmem:[#allocation7 + $0x178] sm:$0xf0]  ;;  %v6940_v47 = vor.u32 %v6154_v44, %v5739_v7  ;;  %v6147_v53 = vld [vmem:[#allocation7 + $0x124] sm:$0xf]  ;;  %v5717_v9 = vld [vmem:[#allocation7 + $0x130] sm:$0xf0] }
 0x5b4   :  { %v2818_v62 = vmul.f32 %v6860_v20, %v2817_v50  ;;  %3188 = vst [vmem:[#allocation2 + $0xd8] sm:$0xff] %v3138_v51  ;;  %v6149_v50 = vld [vmem:[#allocation7 + $0x12c] sm:$0xf0]  ;;  %3438 = vmatpush.bf16.msrb.mxu1 %v6938_v35  ;;  %v6964_v7 = vor.u32 %v6147_v53, %v5717_v9  ;;  %v6146_v53 = vld [vmem:[#allocation7 + $0x114] sm:$0xf0] }
 0x5b5   :  { %v6898_v38 = vpop.eup %6304  ;;  %v2804_v18 = vadd.f32 %v6851_v15, %v2803_v55  ;;  %3189 = vst [vmem:[#allocation2 + $0x18] sm:$0xff] %v3167_v52  ;;  %v6948_v52 = vor.u32 %v6156_v31, %v5757_v33  ;;  %v5699_v33 = vld [vmem:[#allocation7 + $0x100] sm:$0xf] }
 0x5b6   :  { %v6307_v26 = vpop.eup %6306  ;;  %v2831_v28 = vmul.f32 %v6898_v38, %v6847_v8  ;;  %v2819_v60 = vadd.f32 %v6860_v20, %v2818_v62  ;;  %3190 = vst [vmem:[#allocation2 + $0x50] sm:$0xff] %v3082_v56  ;;  %3451 = vmatpush.bf16.msra.mxu2 %v6940_v47  ;;  %vm2836_vm14 = vweird.f32 %v6898_v38 }
 0x5b7   :  { %v2808_v22 = vsel %vm6916_vm12, %v6851_v15, %v2804_v18  ;;  %3191 = vst [vmem:[#allocation2 + $0x68] sm:$0xff] %v3111_v46  ;;  %v6953_v46 = vor.u32 %v6149_v50, %v5715_v49  ;;  %v2839_v18 = vand.u32 2147483647, %v6847_v8  ;;  %3463 = vmatpush.bf16.msra.mxu3 %v6948_v52  ;;  %v6979_v49 = vor.u32 %v6145_v36, %v5699_v33  ;;  %v6143_v50 = vld [vmem:[#allocation7 + $0x104] sm:$0xf]  ;;  %vm6988_vm0 = vmor %vm2835_vm15, %vm2836_vm14 }
 0x5b8   :  { %v2832_v41 = vsub.f32 1.0, %v2831_v28  ;;  %v2813_v51 = vsel %vm6865_vm6, %v6869_v25, %v2808_v22  ;;  %v2823_v15 = vsel %vm6929_vm13, %v6860_v20, %v2819_v60  ;;  %v6152_v25 = vld [vmem:[#allocation7 + $0x14c] sm:$0xf]  ;;  %v5725_v60 = vld [vmem:[#allocation7 + $0x138] sm:$0xf0]  ;;  %v2841_v22 = vand.u32 2147483648, %v6847_v8  ;;  %3439 = vmatpush.bf16.msrb.mxu1 %v6964_v7 }
 0x5b9   :  { %v2828_v10 = vsel %vm6904_vm11, %v6875_v34, %v2823_v15  ;;  %v2847_v11 = vmul.f32 %v6307_v26, %v2813_v51  ;;  %v3139_v55 = vpop.f32.mrf.mxu2  ;;  %v3168_v56 = vpop.f32.mrf.mxu3  ;;  %v5741_v34 = vld [vmem:[#allocation7 + $0x158] sm:$0xf0]  ;;  %3426 = vmatpush.bf16.msra.mxu0 %v6953_v46  ;;  %v5707_v15 = vld [vmem:[#allocation7 + $0x108] sm:$0xf]  ;;  %vm2840_vm1 = vcmp.eq.f32.partialorder %v2839_v18, 8.507059e+37 }
 0x5ba   :  { %v2833_v61 = vmul.f32 %v6898_v38, %v2832_v41  ;;  %v2846_v20 = vmul.f32 %v2828_v10, %v6781_v48  ;;  %v3140_v21 = vadd.f32 %v3139_v55, %v6829_v43  ;;  %v3169_v62 = vadd.f32 %v3168_v56, %v6854_v13  ;;  %v3084_v5 = vpop.f32.mrf.mxu0  ;;  %v3113_v6 = vpop.f32.mrf.mxu1  ;;  %v5701_v41 = vld [vmem:[#allocation7 + $0x110] sm:$0xf0] }
 0x5bb   :  { %v3085_v12 = vadd.f32 %v3084_v5, %v6813_v39  ;;  %v6966_v48 = vor.u32 %v6150_v23, %v5723_v58  ;;  %v3114_v26 = vadd.f32 %v3113_v6, %v6819_v42  ;;  %v6970_v28 = vor.u32 %v6152_v25, %v5741_v34  ;;  %v6144_v58 = vld [vmem:[#allocation7 + $0x10c] sm:$0xf]  ;;  %v5709_v23 = vld [vmem:[#allocation7 + $0x118] sm:$0xf0] }
 0x5bc   :  { %v2848_v44 = vadd.f32 %v2847_v11, %v2846_v20  ;;  %3192 = vst [vmem:[#allocation2 + $0x30] sm:$0xff] %v3140_v21  ;;  %v2834_v31 = vadd.f32 %v6898_v38, %v2833_v61  ;;  %v6984_v51 = vor.u32 %v6143_v50, %v5701_v41  ;;  %v6993_v10 = vor.u32 %v6148_v29, %v5725_v60  ;;  %v2861_v50 = vld [vmem:[#allocation3 + $0x18] sm:$0xff] }
 0x5bd   :  { %3193 = vst [vmem:[#allocation2 + $0x48] sm:$0xff] %v3169_v62  ;;  %3452 = vmatpush.bf16.msra.mxu2 %v6966_v48  ;;  %3464 = vmatpush.bf16.msra.mxu3 %v6970_v28  ;;  %v6995_v8 = vor.u32 %v6146_v53, %v5707_v15  ;;  %v2842_v25 = vor.u32 1.1754944e-38, %v2841_v22  ;;  %v7007_v34 = vor.u32 %v6144_v58, %v5709_v23 }
 0x5be   :  { %6308 = vtanh.f32 %v2848_v44  ;;  %2854 = vst [vmem:[%s7361_s11] sm:$0x3] %v2848_v44  ;;  %v2838_v11 = vsel %vm6988_vm0, %v6898_v38, %v2834_v31  ;;  %3427 = vmatpush.bf16.msra.mxu0 %v6979_v49  ;;  %3440 = vmatpush.bf16.msrb.mxu1 %v6984_v51 }
 0x5bf   :  { %3194 = vst [vmem:[#allocation2 + $0x80] sm:$0xff] %v3085_v12  ;;  %v2843_v6 = vsel %vm2840_vm1, %v2842_v25, %v2838_v11 }
 0x5c0   :  { %3195 = vst [vmem:[#allocation2 + $0x88] sm:$0xff] %v3114_v26 }
 0x5c1   :  { %v3142_v55 = vpop.f32.mrf.mxu2  ;;  %v3171_v56 = vpop.f32.mrf.mxu3  ;;  %3453 = vmatpush.bf16.msra.mxu2 %v6995_v8  ;;  %3465 = vmatpush.bf16.msra.mxu3 %v6993_v10 }
 0x5c2   :  { %v3143_v61 = vadd.f32 %v3142_v55, %v6829_v43  ;;  %v3172_v20 = vadd.f32 %v3171_v56, %v6854_v13  ;;  %v3086_v21 = vpop.f32.mrf.mxu0  ;;  %v3115_v62 = vpop.f32.mrf.mxu1  ;;  %3544 = vmatpush.bf16.msrb.mxu0 %v6789_v14  ;;  %3557 = vmatpush.bf16.msra.mxu1 %v6791_v19 }
 0x5c3   :  { %v3087_v5 = vadd.f32 %v3086_v21, %v6813_v39  ;;  %v3116_v44 = vadd.f32 %v3115_v62, %v6819_v42 }
 0x5c4   :  { %v6309_v38 = vpop.eup %6308  ;;  %3196 = vst [vmem:[#allocation2 + $0xe8] sm:$0xff] %v3143_v61 }
 0x5c5   :  { %v2850_v12 = vmul.f32 %v6309_v38, %v2843_v6  ;;  %3197 = vst [vmem:[#allocation2 + $0xb8] sm:$0xff] %v3172_v20  ;;  %3570 = vmatpush.bf16.msrb.mxu2 %v6793_v45  ;;  %3466 = vmatpush.bf16.msra.mxu3 %v7007_v34 }
 0x5c6   :  { %3198 = vst [vmem:[#allocation2 + $0x60] sm:$0xff] %v3087_v5  ;;  %3545 = vmatpush.bf16.msrb.mxu0 %v6805_v32  ;;  %3558 = vmatpush.bf16.msra.mxu1 %v6810_v37  ;;  %v5695_v5 = vld [vmem:[%s7351_s1 + $0x2] sm:$0x3] }
 0x5c7   :  { %2852 = vst [vmem:[#allocation3 + $0x20] sm:$0x3] %v2850_v12  ;;  %v3226_v38 = vpack.c.bf16 %v5695_v5, %v5695_v5 }
 0x5c8   :  { %2853 = vst [vmem:[%s7360_s10] sm:$0x3] %v2850_v12 }
 0x5c9   :  { %3199 = vst [vmem:[#allocation2 + $0xf0] sm:$0xff] %v3116_v44  ;;  %v3144_v18 = vpop.f32.mrf.mxu2  ;;  %v3173_v26 = vpop.f32.mrf.mxu3  ;;  %3583 = vmatpush.bf16.msrb.mxu3 %v6801_v27  ;;  %3571 = vmatpush.bf16.msrb.mxu2 %v6821_v63 }
 0x5ca   :  { %v3145_v29 = vadd.f32 %v3144_v18, %v6829_v43  ;;  %v3174_v60 = vadd.f32 %v3173_v26, %v6854_v13  ;;  %v3089_v31 = vpop.f32.mrf.mxu0  ;;  %v3118_v33 = vpop.f32.mrf.mxu1  ;;  %3546 = vmatpush.bf16.msrb.mxu0 %v6833_v57  ;;  %3559 = vmatpush.bf16.msra.mxu1 %v6842_v3 }
 0x5cb   :  { %v3090_v36 = vadd.f32 %v3089_v31, %v6813_v39  ;;  %v3119_v22 = vadd.f32 %v3118_v33, %v6819_v42 }
 0x5cc   :  { %3200 = vst [vmem:[#allocation2 + $0x8] sm:$0xff] %v3145_v29 }
 0x5cd   :  { %3201 = vst [vmem:[#allocation2 + $0x78] sm:$0xff] %v3174_v60  ;;  %3584 = vmatpush.bf16.msrb.mxu3 %v6835_v59  ;;  %3572 = vmatpush.bf16.msrb.mxu2 %v6844_v4 }
 0x5ce   :  { %3202 = vst [vmem:[#allocation2 + $0x38] sm:$0xff] %v3090_v36  ;;  %v2862_v41 = vld [vmem:[#allocation3 + $0x20] sm:$0xff]  ;;  %3547 = vmatpush.bf16.msrb.mxu0 %v6849_v54  ;;  %3560 = vmatpush.bf16.msra.mxu1 %v6858_v16 }
 0x5cf   :  { %3203 = vst [vmem:[#allocation2 + $0x58] sm:$0xff] %v3119_v22  ;;  %v2866_v15 = vpack.c.bf16 %v2862_v41, %v2861_v50 }
 0x5d1   :  { %3093 = vmatmul.bf16.gmra.mxu0 %v2866_v15  ;;  %3122 = vmatmul.bf16.gmra.mxu1 %v2866_v15  ;;  %v3147_v53 = vpop.f32.mrf.mxu2  ;;  %v3176_v9 = vpop.f32.mrf.mxu3 }
 0x5d2   :  { %v3148_v11 = vadd.f32 %v3147_v53, %v6829_v43  ;;  %3151 = vmatmul.bf16.gmra.mxu2 %v2866_v15  ;;  %v3177_v55 = vadd.f32 %v3176_v9, %v6854_v13  ;;  %3180 = vmatmul.bf16.gmra.mxu3 %v2866_v15  ;;  %v3091_v56 = vpop.f32.mrf.mxu0  ;;  %v3120_v58 = vpop.f32.mrf.mxu1 }
 0x5d3   :  { %v3092_v23 = vadd.f32 %v3091_v56, %v6813_v39  ;;  %v3121_v25 = vadd.f32 %v3120_v58, %v6819_v42  ;;  %3585 = vmatpush.bf16.msrb.mxu3 %v6879_v24  ;;  %3573 = vmatpush.bf16.msrb.mxu2 %v6877_v40  ;;  %v3223_v56 = vld [vmem:[#allocation2] sm:$0x3] }
 0x5d4   :  { %3204 = vst [vmem:[#allocation2 + $0x40] sm:$0xff] %v3148_v11  ;;  %3548 = vmatpush.bf16.msrb.mxu0 %v6892_v0  ;;  %3561 = vmatpush.bf16.msra.mxu1 %v6894_v1  ;;  %v3222_v11 = vld [vmem:[#allocation2 + $0xb0] sm:$0x3] }
 0x5d5   :  { %3205 = vst [vmem:[#allocation2 + $0xc8] sm:$0xff] %v3177_v55 }
 0x5d6   :  { %3206 = vst [vmem:[#allocation2 + $0xe0] sm:$0xff] %v3092_v23 }
 0x5d7   :  { %3207 = vst [vmem:[#allocation2 + $0x90] sm:$0xff] %v3121_v25  ;;  %3586 = vmatpush.bf16.msrb.mxu3 %v6908_v17  ;;  %3574 = vmatpush.bf16.msrb.mxu2 %v6896_v2 }
 0x5d8   :  { %3549 = vmatpush.bf16.msrb.mxu0 %v6923_v30  ;;  %3562 = vmatpush.bf16.msra.mxu1 %v6938_v35 }
 0x5d9   :  { %v3149_v61 = vpop.f32.mrf.mxu2  ;;  %v3178_v20 = vpop.f32.mrf.mxu3 }
 0x5da   :  { %v3150_v21 = vadd.f32 %v3149_v61, %v6829_v43  ;;  %v3179_v62 = vadd.f32 %v3178_v20, %v6854_v13  ;;  %v3224_v61 = vld [vmem:[#allocation2 + $0xd8] sm:$0x3] }
 0x5db   :  { %3587 = vmatpush.bf16.msrb.mxu3 %v6948_v52  ;;  %3575 = vmatpush.bf16.msrb.mxu2 %v6940_v47 }
 0x5dc   :  { %3208 = vst [vmem:[#allocation2 + $0x70] sm:$0xff] %v3150_v21  ;;  %3550 = vmatpush.bf16.msrb.mxu0 %v6953_v46  ;;  %3563 = vmatpush.bf16.msra.mxu1 %v6964_v7 }
 0x5dd   :  { %3209 = vst [vmem:[#allocation2 + $0xc0] sm:$0xff] %v3179_v62 }
 0x5df   :  { %3588 = vmatpush.bf16.msrb.mxu3 %v6970_v28  ;;  %3576 = vmatpush.bf16.msrb.mxu2 %v6966_v48 }
 0x5e0   :  { %3551 = vmatpush.bf16.msrb.mxu0 %v6979_v49  ;;  %3564 = vmatpush.bf16.msra.mxu1 %v6984_v51 }
 0x5e1   :  { %3428 = vmatmul.bf16.vlgmr.msra.gmra.mxu0 %v3226_v38  ;;  %3441 = vmatmul.bf16.vlgmr.msrb.gmra.mxu1 %v3226_v38 }
 0x5e2   :  { %3454 = vmatmul.bf16.vlgmr.msra.gmra.mxu2 %v3226_v38  ;;  %3467 = vmatmul.bf16.vlgmr.msra.gmra.mxu3 %v3226_v38 }
 0x5e3   :  { %3589 = vmatpush.bf16.msrb.mxu3 %v6993_v10  ;;  %3577 = vmatpush.bf16.msrb.mxu2 %v6995_v8 }
 0x5e4   :  { %3668 = vmatpush.bf16.msra.mxu0 %v6789_v14  ;;  %3681 = vmatpush.bf16.msrb.mxu1 %v6791_v19 }
 0x5e7   :  { %3694 = vmatpush.bf16.msra.mxu2 %v6793_v45  ;;  %3590 = vmatpush.bf16.msrb.mxu3 %v7007_v34 }
 0x5e8   :  { %3669 = vmatpush.bf16.msra.mxu0 %v6805_v32  ;;  %3682 = vmatpush.bf16.msrb.mxu1 %v6810_v37 }
 0x5eb   :  { %3707 = vmatpush.bf16.msra.mxu3 %v6801_v27  ;;  %3695 = vmatpush.bf16.msra.mxu2 %v6821_v63 }
 0x5ec   :  { %3670 = vmatpush.bf16.msra.mxu0 %v6833_v57  ;;  %3683 = vmatpush.bf16.msrb.mxu1 %v6842_v3 }
 0x5ef   :  { %3708 = vmatpush.bf16.msra.mxu3 %v6835_v59  ;;  %3696 = vmatpush.bf16.msra.mxu2 %v6844_v4 }
 0x5f0   :  { %3671 = vmatpush.bf16.msra.mxu0 %v6849_v54  ;;  %3684 = vmatpush.bf16.msrb.mxu1 %v6858_v16 }
 0x5f3   :  { %3709 = vmatpush.bf16.msra.mxu3 %v6879_v24  ;;  %3697 = vmatpush.bf16.msra.mxu2 %v6877_v40 }
 0x5f4   :  { %3672 = vmatpush.bf16.msra.mxu0 %v6892_v0  ;;  %3685 = vmatpush.bf16.msrb.mxu1 %v6894_v1 }
 0x5f7   :  { %3710 = vmatpush.bf16.msra.mxu3 %v6908_v17  ;;  %3698 = vmatpush.bf16.msra.mxu2 %v6896_v2 }
 0x5f8   :  { %3673 = vmatpush.bf16.msra.mxu0 %v6923_v30  ;;  %3686 = vmatpush.bf16.msrb.mxu1 %v6938_v35 }
 0x5fb   :  { %3711 = vmatpush.bf16.msra.mxu3 %v6948_v52  ;;  %3699 = vmatpush.bf16.msra.mxu2 %v6940_v47 }
 0x5fc   :  { %3674 = vmatpush.bf16.msra.mxu0 %v6953_v46  ;;  %3687 = vmatpush.bf16.msrb.mxu1 %v6964_v7 }
 0x5ff   :  { %3712 = vmatpush.bf16.msra.mxu3 %v6970_v28  ;;  %3700 = vmatpush.bf16.msra.mxu2 %v6966_v48 }
 0x600   :  { %3675 = vmatpush.bf16.msra.mxu0 %v6979_v49  ;;  %3688 = vmatpush.bf16.msrb.mxu1 %v6984_v51 }
 0x603   :  { %3713 = vmatpush.bf16.msra.mxu3 %v6993_v10  ;;  %3701 = vmatpush.bf16.msra.mxu2 %v6995_v8 }
 0x607   :  { %3714 = vmatpush.bf16.msra.mxu3 %v7007_v34 }
 0x64e   :  { %v3094_v6 = vpop.f32.mrf.mxu0  ;;  %v3123_v12 = vpop.f32.mrf.mxu1 }
 0x64f   :  { %v3095_v44 = vadd.f32 %v3094_v6, %v6813_v39  ;;  %v3124_v18 = vadd.f32 %v3123_v12, %v6819_v42 }
 0x651   :  { %3210 = vst [vmem:[#allocation2 + $0xa8] sm:$0xff] %v3095_v44 }
 0x652   :  { %3211 = vst [vmem:[#allocation2 + $0xd0] sm:$0xff] %v3124_v18 }
 0x655   :  { %v3152_v26 = vpop.f32.mrf.mxu2  ;;  %v3181_v29 = vpop.f32.mrf.mxu3 }
 0x656   :  { %v3153_v60 = vadd.f32 %v3152_v26, %v6829_v43  ;;  %v3182_v31 = vadd.f32 %v3181_v29, %v6854_v13  ;;  %v3096_v33 = vpop.f32.mrf.mxu0  ;;  %v3125_v36 = vpop.f32.mrf.mxu1 }
 0x657   :  { %v3097_v22 = vadd.f32 %v3096_v33, %v6813_v39  ;;  %v3126_v50 = vadd.f32 %v3125_v36, %v6819_v42 }
 0x658   :  { %3212 = vst [vmem:[#allocation2 + $0x10] sm:$0xff] %v3153_v60 }
 0x659   :  { %3213 = vst [vmem:[#allocation2 + $0x28] sm:$0xff] %v3182_v31  ;;  %v3225_v31 = vld [vmem:[#allocation2 + $0x18] sm:$0x3] }
 0x65a   :  { %3214 = vst [vmem:[#allocation2 + $0xa0] sm:$0xff] %v3097_v22 }
 0x65b   :  { %3215 = vst [vmem:[#allocation2 + $0xf8] sm:$0xff] %v3126_v50 }
 0x65d   :  { %v3154_v41 = vpop.f32.mrf.mxu2  ;;  %v3183_v15 = vpop.f32.mrf.mxu3 }
 0x65e   :  { %v3155_v53 = vadd.f32 %v3154_v41, %v6829_v43  ;;  %v3184_v9 = vadd.f32 %v3183_v15, %v6854_v13  ;;  %v3429_v55 = vpop.f32.mrf.mxu0  ;;  %v3442_v58 = vpop.f32.mrf.mxu1 }
 0x65f   :  { %v3472_v23 = vadd.f32 %v3429_v55, %v3222_v11  ;;  %v3473_v25 = vadd.f32 %v3442_v58, %v3223_v56 }
 0x660   :  { %3216 = vst [vmem:[#allocation2 + $0x20] sm:$0xff] %v3155_v53 }
 0x661   :  { %3217 = vst [vmem:[#allocation2 + $0x98] sm:$0xff] %v3184_v9  ;;  %v5825_v39 = vmul.f32 -1.442695, %v3472_v23  ;;  %v5826_v42 = vmul.f32 -1.442695, %v3473_v25 }
 0x663   :  { %6310 = vpow2.f32 %v5825_v39 }
 0x664   :  { %6312 = vpow2.f32 %v5826_v42 }
 0x665   :  { %v3455_v20 = vpop.f32.mrf.mxu2  ;;  %v3468_v21 = vpop.f32.mrf.mxu3 }
 0x666   :  { %v3474_v62 = vadd.f32 %v3455_v20, %v3224_v61  ;;  %v3431_v5 = vpop.f32.mrf.mxu0  ;;  %v3444_v43 = vpop.f32.mrf.mxu1  ;;  %v3475_v36 = vadd.f32 %v3468_v21, %v3225_v31 }
 0x668   :  { %v5827_v38 = vmul.f32 -1.442695, %v3474_v62  ;;  %v5696_v62 = vld [vmem:[%s7352_s2 + $0x2] sm:$0x3] }
 0x669   :  { %v6311_v13 = vpop.eup %6310 }
 0x66a   :  { %v6313_v6 = vpop.eup %6312  ;;  %v3485_v12 = vadd.f32 1.0, %v6311_v13  ;;  %6314 = vpow2.f32 %v5827_v38 }
 0x66b   :  { %v3486_v44 = vadd.f32 1.0, %v6313_v6 }
 0x66c   :  { %6316 = vrcp.f32 %v3485_v12  ;;  %v3499_v9 = vand.u32 2147483648, %v3485_v12  ;;  %v3497_v56 = vand.u32 2147483647, %v3485_v12  ;;  %vm3493_vm4 = vweird.f32 %v3485_v12 }
 0x66d   :  { %6318 = vrcp.f32 %v3486_v44  ;;  %v3457_v18 = vpop.f32.mrf.mxu2  ;;  %v3470_v26 = vpop.f32.mrf.mxu3  ;;  %v3514_v11 = vand.u32 2147483648, %v3486_v44  ;;  %v3512_v23 = vand.u32 2147483647, %v3486_v44  ;;  %vm3508_vm5 = vweird.f32 %v3486_v44 }
 0x66e   :  { %v3500_v61 = vor.u32 1.1754944e-38, %v3499_v9  ;;  %vm3498_vm8 = vcmp.eq.f32.partialorder %v3497_v56, 8.507059e+37 }
 0x66f   :  { %v3515_v21 = vor.u32 1.1754944e-38, %v3514_v11  ;;  %vm3513_vm9 = vcmp.eq.f32.partialorder %v3512_v23, 8.507059e+37 }
 0x670   :  { %v6315_v29 = vpop.eup %6314 }
 0x671   :  { %v3487_v60 = vadd.f32 1.0, %v6315_v29 }
 0x672   :  { %v6317_v33 = vpop.eup %6316 }
 0x673   :  { %v6319_v22 = vpop.eup %6318  ;;  %v3489_v50 = vmul.f32 %v6317_v33, %v3485_v12  ;;  %6320 = vrcp.f32 %v3487_v60  ;;  %vm3494_vm2 = vweird.f32 %v6317_v33  ;;  %vm3523_vm11 = vweird.f32 %v3487_v60 }
 0x674   :  { %v3504_v41 = vmul.f32 %v6319_v22, %v3486_v44  ;;  %6322 = vtanh.f32 %v3475_v36  ;;  %vm3509_vm3 = vweird.f32 %v6319_v22  ;;  %vm3495_vm6 = vmor %vm3493_vm4, %vm3494_vm2  ;;  %v3529_v36 = vand.u32 2147483648, %v3487_v60 }
 0x675   :  { %v3490_v15 = vsub.f32 1.0, %v3489_v50  ;;  %vm3510_vm7 = vmor %vm3508_vm5, %vm3509_vm3  ;;  %v3527_v50 = vand.u32 2147483647, %v3487_v60 }
 0x676   :  { %v3505_v53 = vsub.f32 1.0, %v3504_v41  ;;  %v3530_v41 = vor.u32 1.1754944e-38, %v3529_v36  ;;  %v3542_v36 = vld [vmem:[#allocation2 + $0x48] sm:$0x3] }
 0x677   :  { %v3491_v55 = vmul.f32 %v6317_v33, %v3490_v15  ;;  %vm3528_vm13 = vcmp.eq.f32.partialorder %v3527_v50, 8.507059e+37 }
 0x678   :  { %v3506_v58 = vmul.f32 %v6319_v22, %v3505_v53 }
 0x679   :  { %v6321_v25 = vpop.eup %6320  ;;  %v3492_v39 = vadd.f32 %v6317_v33, %v3491_v55  ;;  %v3540_v55 = vld [vmem:[#allocation2 + $0x68] sm:$0x3] }
 0x67a   :  { %v3519_v42 = vmul.f32 %v6321_v25, %v3487_v60  ;;  %v3507_v20 = vadd.f32 %v6319_v22, %v3506_v58  ;;  %v6323_v43 = vpop.eup %6322  ;;  %vm3524_vm10 = vweird.f32 %v6321_v25  ;;  %v3539_v60 = vld [vmem:[#allocation2 + $0x50] sm:$0x3] }
 0x67b   :  { %v3496_v5 = vsel %vm3495_vm6, %v6317_v33, %v3492_v39  ;;  %vm3525_vm12 = vmor %vm3523_vm11, %vm3524_vm10 }
 0x67c   :  { %v3520_v38 = vsub.f32 1.0, %v3519_v42  ;;  %v3501_v13 = vsel %vm3498_vm8, %v3500_v61, %v3496_v5  ;;  %v3511_v6 = vsel %vm3510_vm7, %v6319_v22, %v3507_v20  ;;  %v3541_v42 = vld [vmem:[#allocation2 + $0x30] sm:$0x3] }
 0x67d   :  { %v3516_v18 = vsel %vm3513_vm9, %v3515_v21, %v3511_v6  ;;  %v3535_v12 = vmul.f32 %v6323_v43, %v3501_v13 }
 0x67e   :  { %v3521_v44 = vmul.f32 %v6321_v25, %v3520_v38  ;;  %v3534_v26 = vmul.f32 %v5696_v62, %v3516_v18 }
 0x680   :  { %v7102_v29 = vadd.f32 %v3535_v12, %v3534_v26  ;;  %v3522_v31 = vadd.f32 %v6321_v25, %v3521_v44 }
 0x682   :  { %6324 = vtanh.f32 %v7102_v29  ;;  %v3526_v33 = vsel %vm3525_vm12, %v6321_v25, %v3522_v31 }
 0x683   :  { %v3531_v22 = vsel %vm3528_vm13, %v3530_v41, %v3526_v33 }
 0x688   :  { %v6325_v15 = vpop.eup %6324 }
 0x689   :  { %v3538_v53 = vmul.f32 %v6325_v15, %v3531_v22 }
 0x68b   :  { %v3543_v9 = vpack.c.bf16 %v3538_v53, %v3538_v53 }
 0x68d   :  { %3552 = vmatmul.bf16.vlgmr.msrb.gmra.mxu0 %v3543_v9  ;;  %3565 = vmatmul.bf16.vlgmr.msra.gmra.mxu1 %v3543_v9 }
 0x68e   :  { %3578 = vmatmul.bf16.vlgmr.msrb.gmra.mxu2 %v3543_v9  ;;  %3591 = vmatmul.bf16.vlgmr.msrb.gmra.mxu3 %v3543_v9 }
 0x68f   :  { %3792 = vmatpush.bf16.msrb.mxu0 %v6789_v14  ;;  %3805 = vmatpush.bf16.msra.mxu1 %v6791_v19 }
 0x690   :  { %3818 = vmatpush.bf16.msrb.mxu2 %v6793_v45  ;;  %3831 = vmatpush.bf16.msrb.mxu3 %v6801_v27 }
 0x693   :  { %3793 = vmatpush.bf16.msrb.mxu0 %v6805_v32  ;;  %3806 = vmatpush.bf16.msra.mxu1 %v6810_v37 }
 0x694   :  { %3819 = vmatpush.bf16.msrb.mxu2 %v6821_v63  ;;  %3832 = vmatpush.bf16.msrb.mxu3 %v6835_v59 }
 0x697   :  { %3794 = vmatpush.bf16.msrb.mxu0 %v6833_v57  ;;  %3807 = vmatpush.bf16.msra.mxu1 %v6842_v3 }
 0x698   :  { %3820 = vmatpush.bf16.msrb.mxu2 %v6844_v4  ;;  %3833 = vmatpush.bf16.msrb.mxu3 %v6879_v24 }
 0x69b   :  { %3795 = vmatpush.bf16.msrb.mxu0 %v6849_v54  ;;  %3808 = vmatpush.bf16.msra.mxu1 %v6858_v16 }
 0x69c   :  { %3821 = vmatpush.bf16.msrb.mxu2 %v6877_v40  ;;  %3834 = vmatpush.bf16.msrb.mxu3 %v6908_v17 }
 0x69f   :  { %3796 = vmatpush.bf16.msrb.mxu0 %v6892_v0  ;;  %3809 = vmatpush.bf16.msra.mxu1 %v6894_v1 }
 0x6a0   :  { %3822 = vmatpush.bf16.msrb.mxu2 %v6896_v2  ;;  %3835 = vmatpush.bf16.msrb.mxu3 %v6948_v52 }
 0x6a3   :  { %3797 = vmatpush.bf16.msrb.mxu0 %v6923_v30  ;;  %3810 = vmatpush.bf16.msra.mxu1 %v6938_v35 }
 0x6a4   :  { %3823 = vmatpush.bf16.msrb.mxu2 %v6940_v47  ;;  %3836 = vmatpush.bf16.msrb.mxu3 %v6970_v28 }
 0x6a7   :  { %3798 = vmatpush.bf16.msrb.mxu0 %v6953_v46  ;;  %3811 = vmatpush.bf16.msra.mxu1 %v6964_v7 }
 0x6a8   :  { %3824 = vmatpush.bf16.msrb.mxu2 %v6966_v48  ;;  %3837 = vmatpush.bf16.msrb.mxu3 %v6993_v10 }
 0x6ab   :  { %3799 = vmatpush.bf16.msrb.mxu0 %v6979_v49  ;;  %3812 = vmatpush.bf16.msra.mxu1 %v6984_v51 }
 0x6ac   :  { %3825 = vmatpush.bf16.msrb.mxu2 %v6995_v8  ;;  %3838 = vmatpush.bf16.msrb.mxu3 %v7007_v34 }
 0x70a   :  { %v3553_v11 = vpop.f32.mrf.mxu0  ;;  %v3566_v56 = vpop.f32.mrf.mxu1 }
 0x70b   :  { %v3596_v58 = vadd.f32 %v3553_v11, %v3539_v60  ;;  %v3597_v23 = vadd.f32 %v3566_v56, %v3540_v55 }
 0x70d   :  { %v5828_v25 = vmul.f32 -1.442695, %v3596_v58  ;;  %v5829_v39 = vmul.f32 -1.442695, %v3597_v23 }
 0x70f   :  { %6326 = vpow2.f32 %v5828_v25 }
 0x710   :  { %6328 = vpow2.f32 %v5829_v39 }
 0x711   :  { %v3579_v61 = vpop.f32.mrf.mxu2  ;;  %v3592_v20 = vpop.f32.mrf.mxu3 }
 0x712   :  { %v3598_v21 = vadd.f32 %v3579_v61, %v3541_v42  ;;  %v3555_v62 = vpop.f32.mrf.mxu0  ;;  %v3568_v5 = vpop.f32.mrf.mxu1  ;;  %v3599_v33 = vadd.f32 %v3592_v20, %v3542_v36 }
 0x714   :  { %v5830_v43 = vmul.f32 -1.442695, %v3598_v21 }
 0x715   :  { %v6327_v38 = vpop.eup %6326 }
 0x716   :  { %v6329_v13 = vpop.eup %6328  ;;  %v3609_v6 = vadd.f32 1.0, %v6327_v38  ;;  %6330 = vpow2.f32 %v5830_v43 }
 0x717   :  { %v3610_v18 = vadd.f32 1.0, %v6329_v13 }
 0x718   :  { %6332 = vrcp.f32 %v3609_v6  ;;  %v3623_v60 = vand.u32 2147483648, %v3609_v6  ;;  %v3621_v56 = vand.u32 2147483647, %v3609_v6  ;;  %vm3617_vm0 = vweird.f32 %v3609_v6 }
 0x719   :  { %6334 = vrcp.f32 %v3610_v18  ;;  %v3581_v12 = vpop.f32.mrf.mxu2  ;;  %v3594_v44 = vpop.f32.mrf.mxu3  ;;  %v3638_v11 = vand.u32 2147483648, %v3610_v18  ;;  %v3636_v23 = vand.u32 2147483647, %v3610_v18  ;;  %vm3632_vm1 = vweird.f32 %v3610_v18 }
 0x71a   :  { %v3624_v61 = vor.u32 1.1754944e-38, %v3623_v60  ;;  %vm3622_vm4 = vcmp.eq.f32.partialorder %v3621_v56, 8.507059e+37 }
 0x71b   :  { %v3639_v21 = vor.u32 1.1754944e-38, %v3638_v11  ;;  %vm3637_vm5 = vcmp.eq.f32.partialorder %v3636_v23, 8.507059e+37  ;;  %v3664_v11 = vld [vmem:[#allocation2 + $0x88] sm:$0x3] }
 0x71c   :  { %v6331_v26 = vpop.eup %6330 }
 0x71d   :  { %v3611_v31 = vadd.f32 1.0, %v6331_v26 }
 0x71e   :  { %v6333_v50 = vpop.eup %6332 }
 0x71f   :  { %v6335_v41 = vpop.eup %6334  ;;  %v3613_v15 = vmul.f32 %v6333_v50, %v3609_v6  ;;  %6336 = vrcp.f32 %v3611_v31  ;;  %vm3618_vm14 = vweird.f32 %v6333_v50  ;;  %vm3647_vm7 = vweird.f32 %v3611_v31 }
 0x720   :  { %v3628_v22 = vmul.f32 %v6335_v41, %v3610_v18  ;;  %6338 = vtanh.f32 %v3599_v33  ;;  %vm3633_vm15 = vweird.f32 %v6335_v41  ;;  %vm3619_vm2 = vmor %vm3617_vm0, %vm3618_vm14  ;;  %v3653_v33 = vand.u32 2147483648, %v3611_v31 }
 0x721   :  { %v3614_v53 = vsub.f32 1.0, %v3613_v15  ;;  %vm3634_vm3 = vmor %vm3632_vm1, %vm3633_vm15 }
 0x722   :  { %v3629_v9 = vsub.f32 1.0, %v3628_v22  ;;  %v3654_v22 = vor.u32 1.1754944e-38, %v3653_v33  ;;  %v3666_v33 = vld [vmem:[#allocation2 + $0xb8] sm:$0x3] }
 0x723   :  { %v3615_v55 = vmul.f32 %v6333_v50, %v3614_v53 }
 0x724   :  { %v3630_v58 = vmul.f32 %v6335_v41, %v3629_v9 }
 0x725   :  { %v6337_v25 = vpop.eup %6336  ;;  %v3616_v39 = vadd.f32 %v6333_v50, %v3615_v55 }
 0x726   :  { %v3643_v42 = vmul.f32 %v6337_v25, %v3611_v31  ;;  %v3631_v20 = vadd.f32 %v6335_v41, %v3630_v58  ;;  %v6339_v5 = vpop.eup %6338  ;;  %vm3648_vm6 = vweird.f32 %v6337_v25 }
 0x727   :  { %v3620_v62 = vsel %vm3619_vm2, %v6333_v50, %v3616_v39  ;;  %v3651_v50 = vand.u32 2147483647, %v3611_v31  ;;  %vm3649_vm8 = vmor %vm3647_vm7, %vm3648_vm6  ;;  %v3665_v39 = vld [vmem:[#allocation2 + $0xe8] sm:$0x3] }
 0x728   :  { %v3644_v43 = vsub.f32 1.0, %v3643_v42  ;;  %v3625_v38 = vsel %vm3622_vm4, %v3624_v61, %v3620_v62  ;;  %v3635_v13 = vsel %vm3634_vm3, %v6335_v41, %v3631_v20 }
 0x729   :  { %v3640_v12 = vsel %vm3637_vm5, %v3639_v21, %v3635_v13  ;;  %v3659_v44 = vmul.f32 %v6339_v5, %v3625_v38  ;;  %vm3652_vm9 = vcmp.eq.f32.partialorder %v3651_v50, 8.507059e+37 }
 0x72a   :  { %v3645_v26 = vmul.f32 %v6337_v25, %v3644_v43  ;;  %v3658_v36 = vmul.f32 %v3640_v12, %v7102_v29  ;;  %v3663_v29 = vld [vmem:[#allocation2 + $0x80] sm:$0x3] }
 0x72c   :  { %v7138_v6 = vadd.f32 %v3659_v44, %v3658_v36  ;;  %v3646_v18 = vadd.f32 %v6337_v25, %v3645_v26 }
 0x72e   :  { %6340 = vtanh.f32 %v7138_v6  ;;  %v3650_v15 = vsel %vm3649_vm8, %v6337_v25, %v3646_v18 }
 0x72f   :  { %v3655_v53 = vsel %vm3652_vm9, %v3654_v22, %v3650_v15 }
 0x734   :  { %v6341_v41 = vpop.eup %6340 }
 0x735   :  { %v3662_v9 = vmul.f32 %v6341_v41, %v3655_v53 }
 0x737   :  { %v3667_v60 = vpack.c.bf16 %v3662_v9, %v3662_v9 }
 0x739   :  { %3676 = vmatmul.bf16.vlgmr.msra.gmra.mxu0 %v3667_v60  ;;  %3689 = vmatmul.bf16.vlgmr.msrb.gmra.mxu1 %v3667_v60 }
 0x73a   :  { %3702 = vmatmul.bf16.vlgmr.msra.gmra.mxu2 %v3667_v60  ;;  %3715 = vmatmul.bf16.vlgmr.msra.gmra.mxu3 %v3667_v60 }
 0x73b   :  { %3916 = vmatpush.bf16.msra.mxu0 %v6789_v14  ;;  %3929 = vmatpush.bf16.msrb.mxu1 %v6791_v19 }
 0x73c   :  { %3942 = vmatpush.bf16.msra.mxu2 %v6793_v45  ;;  %3955 = vmatpush.bf16.msra.mxu3 %v6801_v27 }
 0x73f   :  { %3917 = vmatpush.bf16.msra.mxu0 %v6805_v32  ;;  %3930 = vmatpush.bf16.msrb.mxu1 %v6810_v37 }
 0x740   :  { %3943 = vmatpush.bf16.msra.mxu2 %v6821_v63  ;;  %3956 = vmatpush.bf16.msra.mxu3 %v6835_v59 }
 0x743   :  { %3918 = vmatpush.bf16.msra.mxu0 %v6833_v57  ;;  %3931 = vmatpush.bf16.msrb.mxu1 %v6842_v3 }
 0x744   :  { %3944 = vmatpush.bf16.msra.mxu2 %v6844_v4  ;;  %3957 = vmatpush.bf16.msra.mxu3 %v6879_v24 }
 0x747   :  { %3919 = vmatpush.bf16.msra.mxu0 %v6849_v54  ;;  %3932 = vmatpush.bf16.msrb.mxu1 %v6858_v16 }
 0x748   :  { %3945 = vmatpush.bf16.msra.mxu2 %v6877_v40  ;;  %3958 = vmatpush.bf16.msra.mxu3 %v6908_v17 }
 0x74b   :  { %3920 = vmatpush.bf16.msra.mxu0 %v6892_v0  ;;  %3933 = vmatpush.bf16.msrb.mxu1 %v6894_v1 }
 0x74c   :  { %3946 = vmatpush.bf16.msra.mxu2 %v6896_v2  ;;  %3959 = vmatpush.bf16.msra.mxu3 %v6948_v52 }
 0x74f   :  { %3921 = vmatpush.bf16.msra.mxu0 %v6923_v30  ;;  %3934 = vmatpush.bf16.msrb.mxu1 %v6938_v35 }
 0x750   :  { %3947 = vmatpush.bf16.msra.mxu2 %v6940_v47  ;;  %3960 = vmatpush.bf16.msra.mxu3 %v6970_v28 }
 0x753   :  { %3922 = vmatpush.bf16.msra.mxu0 %v6953_v46  ;;  %3935 = vmatpush.bf16.msrb.mxu1 %v6964_v7 }
 0x754   :  { %3948 = vmatpush.bf16.msra.mxu2 %v6966_v48  ;;  %3961 = vmatpush.bf16.msra.mxu3 %v6993_v10 }
 0x757   :  { %3923 = vmatpush.bf16.msra.mxu0 %v6979_v49  ;;  %3936 = vmatpush.bf16.msrb.mxu1 %v6984_v51 }
 0x758   :  { %3949 = vmatpush.bf16.msra.mxu2 %v6995_v8  ;;  %3962 = vmatpush.bf16.msra.mxu3 %v7007_v34 }
 0x7b6   :  { %v3677_v31 = vpop.f32.mrf.mxu0  ;;  %v3690_v55 = vpop.f32.mrf.mxu1 }
 0x7b7   :  { %v3720_v56 = vadd.f32 %v3677_v31, %v3663_v29  ;;  %v3721_v58 = vadd.f32 %v3690_v55, %v3664_v11 }
 0x7b9   :  { %v5831_v23 = vmul.f32 -1.442695, %v3720_v56  ;;  %v5832_v25 = vmul.f32 -1.442695, %v3721_v58 }
 0x7bb   :  { %6342 = vpow2.f32 %v5831_v23 }
 0x7bc   :  { %6344 = vpow2.f32 %v5832_v25 }
 0x7bd   :  { %v3703_v42 = vpop.f32.mrf.mxu2  ;;  %v3716_v61 = vpop.f32.mrf.mxu3 }
 0x7be   :  { %v3722_v20 = vadd.f32 %v3703_v42, %v3665_v39  ;;  %v3679_v21 = vpop.f32.mrf.mxu0  ;;  %v3692_v62 = vpop.f32.mrf.mxu1  ;;  %v3723_v15 = vadd.f32 %v3716_v61, %v3666_v33 }
 0x7c0   :  { %v5833_v5 = vmul.f32 -1.442695, %v3722_v20 }
 0x7c1   :  { %v6343_v43 = vpop.eup %6342 }
 0x7c2   :  { %v6345_v38 = vpop.eup %6344  ;;  %v3733_v13 = vadd.f32 1.0, %v6343_v43  ;;  %6346 = vpow2.f32 %v5833_v5 }
 0x7c3   :  { %v3734_v12 = vadd.f32 1.0, %v6345_v38 }
 0x7c4   :  { %6348 = vrcp.f32 %v3733_v13  ;;  %v3747_v29 = vand.u32 2147483648, %v3733_v13  ;;  %v3745_v55 = vand.u32 2147483647, %v3733_v13  ;;  %vm3741_vm12 = vweird.f32 %v3733_v13 }
 0x7c5   :  { %6350 = vrcp.f32 %v3734_v12  ;;  %v3705_v44 = vpop.f32.mrf.mxu2  ;;  %v3718_v26 = vpop.f32.mrf.mxu3  ;;  %v3762_v31 = vand.u32 2147483648, %v3734_v12  ;;  %v3760_v58 = vand.u32 2147483647, %v3734_v12  ;;  %vm3756_vm13 = vweird.f32 %v3734_v12 }
 0x7c6   :  { %v3748_v42 = vor.u32 1.1754944e-38, %v3747_v29  ;;  %vm3746_vm0 = vcmp.eq.f32.partialorder %v3745_v55, 8.507059e+37 }
 0x7c7   :  { %v3763_v20 = vor.u32 1.1754944e-38, %v3762_v31  ;;  %vm3761_vm1 = vcmp.eq.f32.partialorder %v3760_v58, 8.507059e+37  ;;  %v3788_v31 = vld [vmem:[#allocation2 + $0xf0] sm:$0x3] }
 0x7c8   :  { %v6347_v36 = vpop.eup %6346 }
 0x7c9   :  { %v3735_v18 = vadd.f32 1.0, %v6347_v36 }
 0x7ca   :  { %v6349_v50 = vpop.eup %6348 }
 0x7cb   :  { %v6351_v22 = vpop.eup %6350  ;;  %v3737_v41 = vmul.f32 %v6349_v50, %v3733_v13  ;;  %6352 = vrcp.f32 %v3735_v18  ;;  %vm3742_vm10 = vweird.f32 %v6349_v50  ;;  %vm3771_vm3 = vweird.f32 %v3735_v18 }
 0x7cc   :  { %v3752_v53 = vmul.f32 %v6351_v22, %v3734_v12  ;;  %6354 = vtanh.f32 %v3723_v15  ;;  %vm3757_vm11 = vweird.f32 %v6351_v22  ;;  %vm3743_vm14 = vmor %vm3741_vm12, %vm3742_vm10  ;;  %v3777_v15 = vand.u32 2147483648, %v3735_v18 }
 0x7cd   :  { %v3738_v9 = vsub.f32 1.0, %v3737_v41  ;;  %vm3758_vm15 = vmor %vm3756_vm13, %vm3757_vm11 }
 0x7ce   :  { %v3753_v60 = vsub.f32 1.0, %v3752_v53  ;;  %v3778_v53 = vor.u32 1.1754944e-38, %v3777_v15  ;;  %v3790_v15 = vld [vmem:[#allocation2 + $0x78] sm:$0x3] }
 0x7cf   :  { %v3739_v11 = vmul.f32 %v6349_v50, %v3738_v9 }
 0x7d0   :  { %v3754_v56 = vmul.f32 %v6351_v22, %v3753_v60 }
 0x7d1   :  { %v6353_v23 = vpop.eup %6352  ;;  %v3740_v25 = vadd.f32 %v6349_v50, %v3739_v11 }
 0x7d2   :  { %v3767_v39 = vmul.f32 %v6353_v23, %v3735_v18  ;;  %v3755_v61 = vadd.f32 %v6351_v22, %v3754_v56  ;;  %v6355_v62 = vpop.eup %6354  ;;  %vm3772_vm2 = vweird.f32 %v6353_v23 }
 0x7d3   :  { %v3744_v21 = vsel %vm3743_vm14, %v6349_v50, %v3740_v25  ;;  %v3775_v50 = vand.u32 2147483647, %v3735_v18  ;;  %vm3773_vm4 = vmor %vm3771_vm3, %vm3772_vm2  ;;  %v3789_v25 = vld [vmem:[#allocation2 + $0x8] sm:$0x3] }
 0x7d4   :  { %v3768_v5 = vsub.f32 1.0, %v3767_v39  ;;  %v3749_v43 = vsel %vm3746_vm0, %v3748_v42, %v3744_v21  ;;  %v3759_v38 = vsel %vm3758_vm15, %v6351_v22, %v3755_v61 }
 0x7d5   :  { %v3764_v44 = vsel %vm3761_vm1, %v3763_v20, %v3759_v38  ;;  %v3783_v26 = vmul.f32 %v6355_v62, %v3749_v43  ;;  %vm3776_vm5 = vcmp.eq.f32.partialorder %v3775_v50, 8.507059e+37 }
 0x7d6   :  { %v3769_v36 = vmul.f32 %v6353_v23, %v3768_v5  ;;  %v3782_v33 = vmul.f32 %v3764_v44, %v7138_v6  ;;  %v3787_v6 = vld [vmem:[#allocation2 + $0x60] sm:$0x3] }
 0x7d8   :  { %v7174_v13 = vadd.f32 %v3783_v26, %v3782_v33  ;;  %v3770_v12 = vadd.f32 %v6353_v23, %v3769_v36 }
 0x7da   :  { %6356 = vtanh.f32 %v7174_v13  ;;  %v3774_v41 = vsel %vm3773_vm4, %v6353_v23, %v3770_v12 }
 0x7db   :  { %v3779_v9 = vsel %vm3776_vm5, %v3778_v53, %v3774_v41 }
 0x7e0   :  { %v6357_v22 = vpop.eup %6356 }
 0x7e1   :  { %v3786_v60 = vmul.f32 %v6357_v22, %v3779_v9 }
 0x7e3   :  { %v3791_v29 = vpack.c.bf16 %v3786_v60, %v3786_v60 }
 0x7e5   :  { %3800 = vmatmul.bf16.vlgmr.msrb.gmra.mxu0 %v3791_v29  ;;  %3813 = vmatmul.bf16.vlgmr.msra.gmra.mxu1 %v3791_v29 }
 0x7e6   :  { %3826 = vmatmul.bf16.vlgmr.msrb.gmra.mxu2 %v3791_v29  ;;  %3839 = vmatmul.bf16.vlgmr.msrb.gmra.mxu3 %v3791_v29 }
 0x7e7   :  { %4040 = vmatpush.bf16.msrb.mxu0 %v6789_v14  ;;  %4053 = vmatpush.bf16.msra.mxu1 %v6791_v19 }
 0x7e8   :  { %4066 = vmatpush.bf16.msrb.mxu2 %v6793_v45  ;;  %4079 = vmatpush.bf16.msrb.mxu3 %v6801_v27 }
 0x7eb   :  { %4041 = vmatpush.bf16.msrb.mxu0 %v6805_v32  ;;  %4054 = vmatpush.bf16.msra.mxu1 %v6810_v37 }
 0x7ec   :  { %4067 = vmatpush.bf16.msrb.mxu2 %v6821_v63  ;;  %4080 = vmatpush.bf16.msrb.mxu3 %v6835_v59 }
 0x7ef   :  { %4042 = vmatpush.bf16.msrb.mxu0 %v6833_v57  ;;  %4055 = vmatpush.bf16.msra.mxu1 %v6842_v3 }
 0x7f0   :  { %4068 = vmatpush.bf16.msrb.mxu2 %v6844_v4  ;;  %4081 = vmatpush.bf16.msrb.mxu3 %v6879_v24 }
 0x7f3   :  { %4043 = vmatpush.bf16.msrb.mxu0 %v6849_v54  ;;  %4056 = vmatpush.bf16.msra.mxu1 %v6858_v16 }
 0x7f4   :  { %4069 = vmatpush.bf16.msrb.mxu2 %v6877_v40  ;;  %4082 = vmatpush.bf16.msrb.mxu3 %v6908_v17 }
 0x7f7   :  { %4044 = vmatpush.bf16.msrb.mxu0 %v6892_v0  ;;  %4057 = vmatpush.bf16.msra.mxu1 %v6894_v1 }
 0x7f8   :  { %4070 = vmatpush.bf16.msrb.mxu2 %v6896_v2  ;;  %4083 = vmatpush.bf16.msrb.mxu3 %v6948_v52 }
 0x7fb   :  { %4045 = vmatpush.bf16.msrb.mxu0 %v6923_v30  ;;  %4058 = vmatpush.bf16.msra.mxu1 %v6938_v35 }
 0x7fc   :  { %4071 = vmatpush.bf16.msrb.mxu2 %v6940_v47  ;;  %4084 = vmatpush.bf16.msrb.mxu3 %v6970_v28 }
 0x7ff   :  { %4046 = vmatpush.bf16.msrb.mxu0 %v6953_v46  ;;  %4059 = vmatpush.bf16.msra.mxu1 %v6964_v7 }
 0x800   :  { %4072 = vmatpush.bf16.msrb.mxu2 %v6966_v48  ;;  %4085 = vmatpush.bf16.msrb.mxu3 %v6993_v10 }
 0x803   :  { %4047 = vmatpush.bf16.msrb.mxu0 %v6979_v49  ;;  %4060 = vmatpush.bf16.msra.mxu1 %v6984_v51 }
 0x804   :  { %4073 = vmatpush.bf16.msrb.mxu2 %v6995_v8  ;;  %4086 = vmatpush.bf16.msrb.mxu3 %v7007_v34 }
 0x862   :  { %v3801_v18 = vpop.f32.mrf.mxu0  ;;  %v3814_v11 = vpop.f32.mrf.mxu1 }
 0x863   :  { %v3844_v55 = vadd.f32 %v3801_v18, %v3787_v6  ;;  %v3845_v56 = vadd.f32 %v3814_v11, %v3788_v31 }
 0x865   :  { %v5834_v58 = vmul.f32 -1.442695, %v3844_v55  ;;  %v5835_v23 = vmul.f32 -1.442695, %v3845_v56 }
 0x867   :  { %6358 = vpow2.f32 %v5834_v58 }
 0x868   :  { %6360 = vpow2.f32 %v5835_v23 }
 0x869   :  { %v3827_v39 = vpop.f32.mrf.mxu2  ;;  %v3840_v42 = vpop.f32.mrf.mxu3 }
 0x86a   :  { %v3846_v61 = vadd.f32 %v3827_v39, %v3789_v25  ;;  %v3803_v20 = vpop.f32.mrf.mxu0  ;;  %v3816_v21 = vpop.f32.mrf.mxu1  ;;  %v3847_v41 = vadd.f32 %v3840_v42, %v3790_v15 }
 0x86c   :  { %v5836_v62 = vmul.f32 -1.442695, %v3846_v61 }
 0x86d   :  { %v6359_v5 = vpop.eup %6358 }
 0x86e   :  { %v6361_v43 = vpop.eup %6360  ;;  %v3857_v38 = vadd.f32 1.0, %v6359_v5  ;;  %6362 = vpow2.f32 %v5836_v62 }
 0x86f   :  { %v3858_v44 = vadd.f32 1.0, %v6361_v43 }
 0x870   :  { %6364 = vrcp.f32 %v3857_v38  ;;  %v3871_v6 = vand.u32 2147483648, %v3857_v38  ;;  %v3869_v11 = vand.u32 2147483647, %v3857_v38  ;;  %vm3865_vm8 = vweird.f32 %v3857_v38 }
 0x871   :  { %6366 = vrcp.f32 %v3858_v44  ;;  %v3829_v26 = vpop.f32.mrf.mxu2  ;;  %v3842_v36 = vpop.f32.mrf.mxu3  ;;  %v3886_v18 = vand.u32 2147483648, %v3858_v44  ;;  %v3884_v56 = vand.u32 2147483647, %v3858_v44  ;;  %vm3880_vm9 = vweird.f32 %v3858_v44 }
 0x872   :  { %v3872_v39 = vor.u32 1.1754944e-38, %v3871_v6  ;;  %vm3870_vm12 = vcmp.eq.f32.partialorder %v3869_v11, 8.507059e+37 }
 0x873   :  { %v3887_v61 = vor.u32 1.1754944e-38, %v3886_v18  ;;  %vm3885_vm13 = vcmp.eq.f32.partialorder %v3884_v56, 8.507059e+37  ;;  %v3912_v18 = vld [vmem:[#allocation2 + $0x58] sm:$0x3] }
 0x874   :  { %v6363_v33 = vpop.eup %6362 }
 0x875   :  { %v3859_v12 = vadd.f32 1.0, %v6363_v33 }
 0x876   :  { %v6365_v50 = vpop.eup %6364 }
 0x877   :  { %v6367_v53 = vpop.eup %6366  ;;  %v3861_v22 = vmul.f32 %v6365_v50, %v3857_v38  ;;  %6368 = vrcp.f32 %v3859_v12  ;;  %vm3866_vm6 = vweird.f32 %v6365_v50  ;;  %vm3895_vm15 = vweird.f32 %v3859_v12 }
 0x878   :  { %v3876_v9 = vmul.f32 %v6367_v53, %v3858_v44  ;;  %6370 = vtanh.f32 %v3847_v41  ;;  %vm3881_vm7 = vweird.f32 %v6367_v53  ;;  %vm3867_vm10 = vmor %vm3865_vm8, %vm3866_vm6  ;;  %v3901_v41 = vand.u32 2147483648, %v3859_v12 }
 0x879   :  { %v3862_v60 = vsub.f32 1.0, %v3861_v22  ;;  %vm3882_vm11 = vmor %vm3880_vm9, %vm3881_vm7 }
 0x87a   :  { %v3877_v29 = vsub.f32 1.0, %v3876_v9  ;;  %v3902_v9 = vor.u32 1.1754944e-38, %v3901_v41  ;;  %v3914_v41 = vld [vmem:[#allocation2 + $0xc8] sm:$0x3] }
 0x87b   :  { %v3863_v31 = vmul.f32 %v6365_v50, %v3862_v60 }
 0x87c   :  { %v3878_v55 = vmul.f32 %v6367_v53, %v3877_v29 }
 0x87d   :  { %v6369_v58 = vpop.eup %6368  ;;  %v3864_v23 = vadd.f32 %v6365_v50, %v3863_v31 }
 0x87e   :  { %v3891_v25 = vmul.f32 %v6369_v58, %v3859_v12  ;;  %v3879_v42 = vadd.f32 %v6367_v53, %v3878_v55  ;;  %v6371_v21 = vpop.eup %6370  ;;  %vm3896_vm14 = vweird.f32 %v6369_v58 }
 0x87f   :  { %v3868_v20 = vsel %vm3867_vm10, %v6365_v50, %v3864_v23  ;;  %v3899_v50 = vand.u32 2147483647, %v3859_v12  ;;  %vm3897_vm0 = vmor %vm3895_vm15, %vm3896_vm14  ;;  %v3913_v23 = vld [vmem:[#allocation2 + $0x40] sm:$0x3] }
 0x880   :  { %v3892_v62 = vsub.f32 1.0, %v3891_v25  ;;  %v3873_v5 = vsel %vm3870_vm12, %v3872_v39, %v3868_v20  ;;  %v3883_v43 = vsel %vm3882_vm11, %v6367_v53, %v3879_v42 }
 0x881   :  { %v3888_v26 = vsel %vm3885_vm13, %v3887_v61, %v3883_v43  ;;  %v3907_v36 = vmul.f32 %v6371_v21, %v3873_v5  ;;  %vm3900_vm1 = vcmp.eq.f32.partialorder %v3899_v50, 8.507059e+37 }
 0x882   :  { %v3893_v33 = vmul.f32 %v6369_v58, %v3892_v62  ;;  %v3906_v15 = vmul.f32 %v3888_v26, %v7174_v13  ;;  %v3911_v13 = vld [vmem:[#allocation2 + $0x38] sm:$0x3] }
 0x884   :  { %v7210_v38 = vadd.f32 %v3907_v36, %v3906_v15  ;;  %v3894_v44 = vadd.f32 %v6369_v58, %v3893_v33 }
 0x886   :  { %6372 = vtanh.f32 %v7210_v38  ;;  %v3898_v22 = vsel %vm3897_vm0, %v6369_v58, %v3894_v44 }
 0x887   :  { %v3903_v60 = vsel %vm3900_vm1, %v3902_v9, %v3898_v22 }
 0x88c   :  { %v6373_v53 = vpop.eup %6372 }
 0x88d   :  { %v3910_v29 = vmul.f32 %v6373_v53, %v3903_v60 }
 0x88f   :  { %v3915_v6 = vpack.c.bf16 %v3910_v29, %v3910_v29 }
 0x891   :  { %3924 = vmatmul.bf16.vlgmr.msra.gmra.mxu0 %v3915_v6  ;;  %3937 = vmatmul.bf16.vlgmr.msrb.gmra.mxu1 %v3915_v6 }
 0x892   :  { %3950 = vmatmul.bf16.vlgmr.msra.gmra.mxu2 %v3915_v6  ;;  %3963 = vmatmul.bf16.vlgmr.msra.gmra.mxu3 %v3915_v6 }
 0x893   :  { %4164 = vmatpush.bf16.msra.mxu0 %v6789_v14  ;;  %4177 = vmatpush.bf16.msrb.mxu1 %v6791_v19 }
 0x894   :  { %4190 = vmatpush.bf16.msra.mxu2 %v6793_v45  ;;  %4203 = vmatpush.bf16.msra.mxu3 %v6801_v27 }
 0x897   :  { %4165 = vmatpush.bf16.msra.mxu0 %v6805_v32  ;;  %4178 = vmatpush.bf16.msrb.mxu1 %v6810_v37 }
 0x898   :  { %4191 = vmatpush.bf16.msra.mxu2 %v6821_v63  ;;  %4204 = vmatpush.bf16.msra.mxu3 %v6835_v59 }
 0x89b   :  { %4166 = vmatpush.bf16.msra.mxu0 %v6833_v57  ;;  %4179 = vmatpush.bf16.msrb.mxu1 %v6842_v3 }
 0x89c   :  { %4192 = vmatpush.bf16.msra.mxu2 %v6844_v4  ;;  %4205 = vmatpush.bf16.msra.mxu3 %v6879_v24 }
 0x89f   :  { %4167 = vmatpush.bf16.msra.mxu0 %v6849_v54  ;;  %4180 = vmatpush.bf16.msrb.mxu1 %v6858_v16 }
 0x8a0   :  { %4193 = vmatpush.bf16.msra.mxu2 %v6877_v40  ;;  %4206 = vmatpush.bf16.msra.mxu3 %v6908_v17 }
 0x8a3   :  { %4168 = vmatpush.bf16.msra.mxu0 %v6892_v0  ;;  %4181 = vmatpush.bf16.msrb.mxu1 %v6894_v1 }
 0x8a4   :  { %4194 = vmatpush.bf16.msra.mxu2 %v6896_v2  ;;  %4207 = vmatpush.bf16.msra.mxu3 %v6948_v52 }
 0x8a7   :  { %4169 = vmatpush.bf16.msra.mxu0 %v6923_v30  ;;  %4182 = vmatpush.bf16.msrb.mxu1 %v6938_v35 }
 0x8a8   :  { %4195 = vmatpush.bf16.msra.mxu2 %v6940_v47  ;;  %4208 = vmatpush.bf16.msra.mxu3 %v6970_v28 }
 0x8ab   :  { %4170 = vmatpush.bf16.msra.mxu0 %v6953_v46  ;;  %4183 = vmatpush.bf16.msrb.mxu1 %v6964_v7 }
 0x8ac   :  { %4196 = vmatpush.bf16.msra.mxu2 %v6966_v48  ;;  %4209 = vmatpush.bf16.msra.mxu3 %v6993_v10 }
 0x8af   :  { %4171 = vmatpush.bf16.msra.mxu0 %v6979_v49  ;;  %4184 = vmatpush.bf16.msrb.mxu1 %v6984_v51 }
 0x8b0   :  { %4197 = vmatpush.bf16.msra.mxu2 %v6995_v8  ;;  %4210 = vmatpush.bf16.msra.mxu3 %v7007_v34 }
 0x90e   :  { %v3925_v12 = vpop.f32.mrf.mxu0  ;;  %v3938_v31 = vpop.f32.mrf.mxu1 }
 0x90f   :  { %v3968_v11 = vadd.f32 %v3925_v12, %v3911_v13  ;;  %v3969_v55 = vadd.f32 %v3938_v31, %v3912_v18 }
 0x911   :  { %v5837_v56 = vmul.f32 -1.442695, %v3968_v11  ;;  %v5838_v58 = vmul.f32 -1.442695, %v3969_v55 }
 0x913   :  { %6374 = vpow2.f32 %v5837_v56 }
 0x914   :  { %6376 = vpow2.f32 %v5838_v58 }
 0x915   :  { %v3951_v25 = vpop.f32.mrf.mxu2  ;;  %v3964_v39 = vpop.f32.mrf.mxu3 }
 0x916   :  { %v3970_v42 = vadd.f32 %v3951_v25, %v3913_v23  ;;  %v3927_v61 = vpop.f32.mrf.mxu0  ;;  %v3940_v20 = vpop.f32.mrf.mxu1  ;;  %v3971_v22 = vadd.f32 %v3964_v39, %v3914_v41 }
 0x918   :  { %v5839_v21 = vmul.f32 -1.442695, %v3970_v42 }
 0x919   :  { %v6375_v62 = vpop.eup %6374 }
 0x91a   :  { %v6377_v5 = vpop.eup %6376  ;;  %v3981_v43 = vadd.f32 1.0, %v6375_v62  ;;  %6378 = vpow2.f32 %v5839_v21 }
 0x91b   :  { %v3982_v26 = vadd.f32 1.0, %v6377_v5 }
 0x91c   :  { %6380 = vrcp.f32 %v3981_v43  ;;  %v3995_v13 = vand.u32 2147483648, %v3981_v43  ;;  %v3993_v31 = vand.u32 2147483647, %v3981_v43  ;;  %vm3989_vm4 = vweird.f32 %v3981_v43 }
 0x91d   :  { %6382 = vrcp.f32 %v3982_v26  ;;  %v3953_v36 = vpop.f32.mrf.mxu2  ;;  %v3966_v33 = vpop.f32.mrf.mxu3  ;;  %v4010_v12 = vand.u32 2147483648, %v3982_v26  ;;  %v4008_v55 = vand.u32 2147483647, %v3982_v26  ;;  %vm4004_vm5 = vweird.f32 %v3982_v26 }
 0x91e   :  { %v3996_v25 = vor.u32 1.1754944e-38, %v3995_v13  ;;  %vm3994_vm8 = vcmp.eq.f32.partialorder %v3993_v31, 8.507059e+37 }
 0x91f   :  { %v4011_v42 = vor.u32 1.1754944e-38, %v4010_v12  ;;  %vm4009_vm9 = vcmp.eq.f32.partialorder %v4008_v55, 8.507059e+37 }
 0x920   :  { %v6379_v15 = vpop.eup %6378 }
 0x921   :  { %v3983_v44 = vadd.f32 1.0, %v6379_v15 }
 0x922   :  { %v6381_v50 = vpop.eup %6380 }
 0x923   :  { %v6383_v9 = vpop.eup %6382  ;;  %v3985_v53 = vmul.f32 %v6381_v50, %v3981_v43  ;;  %6384 = vrcp.f32 %v3983_v44  ;;  %vm3990_vm2 = vweird.f32 %v6381_v50  ;;  %vm4019_vm11 = vweird.f32 %v3983_v44 }
 0x924   :  { %v4000_v60 = vmul.f32 %v6383_v9, %v3982_v26  ;;  %6386 = vtanh.f32 %v3971_v22  ;;  %vm4005_vm3 = vweird.f32 %v6383_v9  ;;  %vm3991_vm6 = vmor %vm3989_vm4, %vm3990_vm2  ;;  %v4025_v22 = vand.u32 2147483648, %v3983_v44 }
 0x925   :  { %v3986_v29 = vsub.f32 1.0, %v3985_v53  ;;  %vm4006_vm7 = vmor %vm4004_vm5, %vm4005_vm3 }
 0x926   :  { %v4001_v6 = vsub.f32 1.0, %v4000_v60  ;;  %v4026_v60 = vor.u32 1.1754944e-38, %v4025_v22 }
 0x927   :  { %v3987_v18 = vmul.f32 %v6381_v50, %v3986_v29 }
 0x928   :  { %v4002_v11 = vmul.f32 %v6383_v9, %v4001_v6 }
 0x929   :  { %v6385_v56 = vpop.eup %6384  ;;  %v3988_v58 = vadd.f32 %v6381_v50, %v3987_v18 }
 0x92a   :  { %v4015_v23 = vmul.f32 %v6385_v56, %v3983_v44  ;;  %v4003_v39 = vadd.f32 %v6383_v9, %v4002_v11  ;;  %v6387_v20 = vpop.eup %6386  ;;  %vm4020_vm10 = vweird.f32 %v6385_v56 }
 0x92b   :  { %v3992_v61 = vsel %vm3991_vm6, %v6381_v50, %v3988_v58  ;;  %v4023_v50 = vand.u32 2147483647, %v3983_v44  ;;  %vm4021_vm12 = vmor %vm4019_vm11, %vm4020_vm10 }
 0x92c   :  { %v4016_v21 = vsub.f32 1.0, %v4015_v23  ;;  %v3997_v62 = vsel %vm3994_vm8, %v3996_v25, %v3992_v61  ;;  %v4007_v5 = vsel %vm4006_vm7, %v6383_v9, %v4003_v39 }
 0x92d   :  { %v4012_v36 = vsel %vm4009_vm9, %v4011_v42, %v4007_v5  ;;  %v4031_v33 = vmul.f32 %v6387_v20, %v3997_v62  ;;  %vm4024_vm13 = vcmp.eq.f32.partialorder %v4023_v50, 8.507059e+37 }
 0x92e   :  { %v4017_v15 = vmul.f32 %v6385_v56, %v4016_v21  ;;  %v4030_v41 = vmul.f32 %v4012_v36, %v7210_v38 }
 0x930   :  { %v7246_v43 = vadd.f32 %v4031_v33, %v4030_v41  ;;  %v4018_v26 = vadd.f32 %v6385_v56, %v4017_v15 }
 0x932   :  { %6388 = vtanh.f32 %v7246_v43  ;;  %v4022_v53 = vsel %vm4021_vm12, %v6385_v56, %v4018_v26 }
 0x933   :  { %v4027_v29 = vsel %vm4024_vm13, %v4026_v60, %v4022_v53 }
 0x938   :  { %v6389_v9 = vpop.eup %6388 }
 0x939   :  { %v4034_v6 = vmul.f32 %v6389_v9, %v4027_v29 }
 0x93b   :  { %v4039_v13 = vpack.c.bf16 %v4034_v6, %v4034_v6 }
 0x93d   :  { %4048 = vmatmul.bf16.vlgmr.msrb.gmra.mxu0 %v4039_v13  ;;  %4061 = vmatmul.bf16.vlgmr.msra.gmra.mxu1 %v4039_v13 }
 0x93e   :  { %4074 = vmatmul.bf16.vlgmr.msrb.gmra.mxu2 %v4039_v13  ;;  %4087 = vmatmul.bf16.vlgmr.msrb.gmra.mxu3 %v4039_v13 }
 0x93f   :  { %4288 = vmatpush.bf16.msrb.mxu0 %v6789_v14  ;;  %4301 = vmatpush.bf16.msra.mxu1 %v6791_v19  ;;  %v4035_v14 = vld [vmem:[#allocation2 + $0xe0] sm:$0x3] }
 0x940   :  { %4314 = vmatpush.bf16.msrb.mxu2 %v6793_v45  ;;  %4327 = vmatpush.bf16.msrb.mxu3 %v6801_v27  ;;  %v4036_v45 = vld [vmem:[#allocation2 + $0x90] sm:$0x3] }
 0x943   :  { %4289 = vmatpush.bf16.msrb.mxu0 %v6805_v32  ;;  %4302 = vmatpush.bf16.msra.mxu1 %v6810_v37 }
 0x944   :  { %4315 = vmatpush.bf16.msrb.mxu2 %v6821_v63  ;;  %4328 = vmatpush.bf16.msrb.mxu3 %v6835_v59  ;;  %v4037_v59 = vld [vmem:[#allocation2 + $0x70] sm:$0x3] }
 0x947   :  { %4290 = vmatpush.bf16.msrb.mxu0 %v6833_v57  ;;  %4303 = vmatpush.bf16.msra.mxu1 %v6842_v3 }
 0x948   :  { %4316 = vmatpush.bf16.msrb.mxu2 %v6844_v4  ;;  %4329 = vmatpush.bf16.msrb.mxu3 %v6879_v24 }
 0x94b   :  { %4291 = vmatpush.bf16.msrb.mxu0 %v6849_v54  ;;  %4304 = vmatpush.bf16.msra.mxu1 %v6858_v16 }
 0x94c   :  { %4317 = vmatpush.bf16.msrb.mxu2 %v6877_v40  ;;  %4330 = vmatpush.bf16.msrb.mxu3 %v6908_v17 }
 0x94f   :  { %4292 = vmatpush.bf16.msrb.mxu0 %v6892_v0  ;;  %4305 = vmatpush.bf16.msra.mxu1 %v6894_v1 }
 0x950   :  { %4318 = vmatpush.bf16.msrb.mxu2 %v6896_v2  ;;  %4331 = vmatpush.bf16.msrb.mxu3 %v6948_v52 }
 0x953   :  { %4293 = vmatpush.bf16.msrb.mxu0 %v6923_v30  ;;  %4306 = vmatpush.bf16.msra.mxu1 %v6938_v35 }
 0x954   :  { %4319 = vmatpush.bf16.msrb.mxu2 %v6940_v47  ;;  %4332 = vmatpush.bf16.msrb.mxu3 %v6970_v28 }
 0x957   :  { %4294 = vmatpush.bf16.msrb.mxu0 %v6953_v46  ;;  %4307 = vmatpush.bf16.msra.mxu1 %v6964_v7  ;;  %v4038_v46 = vld [vmem:[#allocation2 + $0xc0] sm:$0x3] }
 0x958   :  { %4320 = vmatpush.bf16.msrb.mxu2 %v6966_v48  ;;  %4333 = vmatpush.bf16.msrb.mxu3 %v6993_v10 }
 0x95b   :  { %4295 = vmatpush.bf16.msrb.mxu0 %v6979_v49  ;;  %4308 = vmatpush.bf16.msra.mxu1 %v6984_v51 }
 0x95c   :  { %4321 = vmatpush.bf16.msrb.mxu2 %v6995_v8  ;;  %4334 = vmatpush.bf16.msrb.mxu3 %v7007_v34 }
 0x9ba   :  { %v4049_v19 = vpop.f32.mrf.mxu0  ;;  %v4062_v27 = vpop.f32.mrf.mxu1 }
 0x9bb   :  { %v4092_v32 = vadd.f32 %v4049_v19, %v4035_v14  ;;  %v4093_v37 = vadd.f32 %v4062_v27, %v4036_v45  ;;  %v4160_v14 = vld [vmem:[#allocation2 + $0xd0] sm:$0x3] }
 0x9bd   :  { %v5840_v63 = vmul.f32 -1.442695, %v4092_v32  ;;  %v5841_v57 = vmul.f32 -1.442695, %v4093_v37 }
 0x9bf   :  { %6390 = vpow2.f32 %v5840_v63  ;;  %v4161_v63 = vld [vmem:[#allocation2 + $0x10] sm:$0x3] }
 0x9c0   :  { %6392 = vpow2.f32 %v5841_v57 }
 0x9c1   :  { %v4075_v3 = vpop.f32.mrf.mxu2  ;;  %v4088_v4 = vpop.f32.mrf.mxu3 }
 0x9c2   :  { %v4094_v54 = vadd.f32 %v4075_v3, %v4037_v59  ;;  %v4051_v16 = vpop.f32.mrf.mxu0  ;;  %v4064_v40 = vpop.f32.mrf.mxu1  ;;  %v4095_v48 = vadd.f32 %v4088_v4, %v4038_v46 }
 0x9c4   :  { %v5842_v24 = vmul.f32 -1.442695, %v4094_v54 }
 0x9c5   :  { %v6391_v0 = vpop.eup %6390 }
 0x9c6   :  { %v6393_v1 = vpop.eup %6392  ;;  %v4105_v2 = vadd.f32 1.0, %v6391_v0  ;;  %6394 = vpow2.f32 %v5842_v24 }
 0x9c7   :  { %v4106_v17 = vadd.f32 1.0, %v6393_v1 }
 0x9c8   :  { %6396 = vrcp.f32 %v4105_v2  ;;  %v4119_v34 = vand.u32 2147483648, %v4105_v2  ;;  %v4117_v12 = vand.u32 2147483647, %v4105_v2  ;;  %vm4113_vm0 = vweird.f32 %v4105_v2 }
 0x9c9   :  { %6398 = vrcp.f32 %v4106_v17  ;;  %v4077_v30 = vpop.f32.mrf.mxu2  ;;  %v4090_v35 = vpop.f32.mrf.mxu3  ;;  %v4134_v38 = vand.u32 2147483648, %v4106_v17  ;;  %v4132_v31 = vand.u32 2147483647, %v4106_v17  ;;  %vm4128_vm1 = vweird.f32 %v4106_v17 }
 0x9ca   :  { %v4120_v58 = vor.u32 1.1754944e-38, %v4119_v34  ;;  %vm4118_vm4 = vcmp.eq.f32.partialorder %v4117_v12, 8.507059e+37 }
 0x9cb   :  { %v4135_v25 = vor.u32 1.1754944e-38, %v4134_v38  ;;  %vm4133_vm5 = vcmp.eq.f32.partialorder %v4132_v31, 8.507059e+37 }
 0x9cc   :  { %v6395_v47 = vpop.eup %6394 }
 0x9cd   :  { %v4107_v52 = vadd.f32 1.0, %v6395_v47  ;;  %v4162_v47 = vld [vmem:[#allocation2 + $0x28] sm:$0x3] }
 0x9ce   :  { %v6397_v7 = vpop.eup %6396 }
 0x9cf   :  { %v6399_v28 = vpop.eup %6398  ;;  %v4109_v49 = vmul.f32 %v6397_v7, %v4105_v2  ;;  %6400 = vrcp.f32 %v4107_v52  ;;  %vm4114_vm14 = vweird.f32 %v6397_v7  ;;  %v4149_v26 = vand.u32 2147483648, %v4107_v52 }
 0x9d0   :  { %v4124_v51 = vmul.f32 %v6399_v28, %v4106_v17  ;;  %6402 = vtanh.f32 %v4095_v48  ;;  %vm4129_vm15 = vweird.f32 %v6399_v28  ;;  %vm4115_vm2 = vmor %vm4113_vm0, %vm4114_vm14  ;;  %vm4143_vm7 = vweird.f32 %v4107_v52 }
 0x9d1   :  { %v4110_v10 = vsub.f32 1.0, %v4109_v49  ;;  %vm4130_vm3 = vmor %vm4128_vm1, %vm4129_vm15  ;;  %v4147_v22 = vand.u32 2147483647, %v4107_v52  ;;  %v4150_v53 = vor.u32 1.1754944e-38, %v4149_v26 }
 0x9d2   :  { %v4125_v8 = vsub.f32 1.0, %v4124_v51 }
 0x9d3   :  { %v4111_v44 = vmul.f32 %v6397_v7, %v4110_v10  ;;  %vm4148_vm9 = vcmp.eq.f32.partialorder %v4147_v22, 8.507059e+37 }
 0x9d4   :  { %v4126_v18 = vmul.f32 %v6399_v28, %v4125_v8 }
 0x9d5   :  { %v6401_v11 = vpop.eup %6400  ;;  %v4112_v55 = vadd.f32 %v6397_v7, %v4111_v44 }
 0x9d6   :  { %v4139_v56 = vmul.f32 %v6401_v11, %v4107_v52  ;;  %v4127_v23 = vadd.f32 %v6399_v28, %v4126_v18  ;;  %v6403_v42 = vpop.eup %6402  ;;  %vm4144_vm6 = vweird.f32 %v6401_v11 }
 0x9d7   :  { %v4116_v39 = vsel %vm4115_vm2, %v6397_v7, %v4112_v55  ;;  %vm4145_vm8 = vmor %vm4143_vm7, %vm4144_vm6 }
 0x9d8   :  { %v4140_v61 = vsub.f32 1.0, %v4139_v56  ;;  %v4121_v20 = vsel %vm4118_vm4, %v4120_v58, %v4116_v39  ;;  %v4131_v21 = vsel %vm4130_vm3, %v6399_v28, %v4127_v23 }
 0x9d9   :  { %v4136_v62 = vsel %vm4133_vm5, %v4135_v25, %v4131_v21  ;;  %v4155_v5 = vmul.f32 %v6403_v42, %v4121_v20 }
 0x9da   :  { %v4141_v36 = vmul.f32 %v6401_v11, %v4140_v61  ;;  %v4154_v33 = vmul.f32 %v4136_v62, %v7246_v43  ;;  %v4159_v43 = vld [vmem:[#allocation2 + $0xa8] sm:$0x3] }
 0x9dc   :  { %v7282_v15 = vadd.f32 %v4155_v5, %v4154_v33  ;;  %v4142_v41 = vadd.f32 %v6401_v11, %v4141_v36 }
 0x9de   :  { %6404 = vtanh.f32 %v7282_v15  ;;  %v4146_v50 = vsel %vm4145_vm8, %v6401_v11, %v4142_v41 }
 0x9df   :  { %v4151_v9 = vsel %vm4148_vm9, %v4150_v53, %v4146_v50 }
 0x9e4   :  { %v6405_v60 = vpop.eup %6404 }
 0x9e5   :  { %v4158_v29 = vmul.f32 %v6405_v60, %v4151_v9 }
 0x9e7   :  { %v4163_v6 = vpack.c.bf16 %v4158_v29, %v4158_v29 }
 0x9e9   :  { %4172 = vmatmul.bf16.vlgmr.msra.gmra.mxu0 %v4163_v6  ;;  %4185 = vmatmul.bf16.vlgmr.msrb.gmra.mxu1 %v4163_v6 }
 0x9ea   :  { %4198 = vmatmul.bf16.vlgmr.msra.gmra.mxu2 %v4163_v6  ;;  %4211 = vmatmul.bf16.vlgmr.msra.gmra.mxu3 %v4163_v6  ;;  %v4425_v6 = vld [vmem:[%s7357_s7 + $0x70] sm:$0xff] }
 0xa66   :  { %v4173_v13 = vpop.f32.mrf.mxu0  ;;  %v4186_v19 = vpop.f32.mrf.mxu1 }
 0xa67   :  { %v4216_v45 = vadd.f32 %v4173_v13, %v4159_v43  ;;  %v4217_v27 = vadd.f32 %v4186_v19, %v4160_v14  ;;  %v4424_v43 = vld [vmem:[%s7357_s7 + $0x68] sm:$0xff]  ;;  %v4423_v13 = vld [vmem:[%s7357_s7 + $0x60] sm:$0xff]  ;;  %v4422_v14 = vld [vmem:[%s7357_s7 + $0x58] sm:$0xff] }
 0xa68   :  { %v4421_v19 = vld [vmem:[%s7357_s7 + $0x50] sm:$0xff] }
 0xa69   :  { %v5843_v32 = vmul.f32 -1.442695, %v4216_v45  ;;  %v5844_v37 = vmul.f32 -1.442695, %v4217_v27  ;;  %v4420_v45 = vld [vmem:[%s7357_s7 + $0x48] sm:$0xff]  ;;  %v4419_v27 = vld [vmem:[%s7357_s7 + $0x40] sm:$0xff] }
 0xa6b   :  { %6406 = vpow2.f32 %v5843_v32  ;;  %v4418_v32 = vld [vmem:[%s7357_s7 + $0x38] sm:$0xff] }
 0xa6c   :  { %6408 = vpow2.f32 %v5844_v37  ;;  %v4283_v37 = vld [vmem:[#allocation2 + $0xa0] sm:$0x3] }
 0xa6d   :  { %v4199_v57 = vpop.f32.mrf.mxu2  ;;  %v4212_v59 = vpop.f32.mrf.mxu3 }
 0xa6e   :  { %v4218_v3 = vadd.f32 %v4199_v57, %v4161_v63  ;;  %v4175_v4 = vpop.f32.mrf.mxu0  ;;  %v4188_v54 = vpop.f32.mrf.mxu1  ;;  %v4219_v46 = vadd.f32 %v4212_v59, %v4162_v47  ;;  %v4284_v57 = vld [vmem:[#allocation2 + $0xf8] sm:$0x3] }
 0xa70   :  { %v5845_v16 = vmul.f32 -1.442695, %v4218_v3  ;;  %v4417_v3 = vld [vmem:[%s7357_s7 + $0x30] sm:$0xff] }
 0xa71   :  { %v6407_v40 = vpop.eup %6406 }
 0xa72   :  { %v6409_v24 = vpop.eup %6408  ;;  %v4229_v0 = vadd.f32 1.0, %v6407_v40  ;;  %6410 = vpow2.f32 %v5845_v16  ;;  %v4416_v16 = vld [vmem:[%s7357_s7 + $0x28] sm:$0xff] }
 0xa73   :  { %v4230_v1 = vadd.f32 1.0, %v6409_v24 }
 0xa74   :  { %6412 = vrcp.f32 %v4229_v0  ;;  %v4243_v10 = vand.u32 2147483648, %v4229_v0  ;;  %v4241_v38 = vand.u32 2147483647, %v4229_v0  ;;  %vm4237_vm12 = vweird.f32 %v4229_v0 }
 0xa75   :  { %6414 = vrcp.f32 %v4230_v1  ;;  %v4201_v2 = vpop.f32.mrf.mxu2  ;;  %v4214_v17 = vpop.f32.mrf.mxu3  ;;  %v4258_v8 = vand.u32 2147483648, %v4230_v1  ;;  %v4256_v12 = vand.u32 2147483647, %v4230_v1  ;;  %vm4252_vm13 = vweird.f32 %v4230_v1 }
 0xa76   :  { %v4244_v55 = vor.u32 1.1754944e-38, %v4243_v10  ;;  %vm4242_vm0 = vcmp.eq.f32.partialorder %v4241_v38, 8.507059e+37  ;;  %v4413_v2 = vld [vmem:[%s7357_s7 + $0x10] sm:$0xff]  ;;  %v4285_v17 = vld [vmem:[#allocation2 + $0x20] sm:$0x3] }
 0xa77   :  { %v4259_v58 = vor.u32 1.1754944e-38, %v4258_v8  ;;  %vm4257_vm1 = vcmp.eq.f32.partialorder %v4256_v12, 8.507059e+37 }
 0xa78   :  { %v6411_v30 = vpop.eup %6410 }
 0xa79   :  { %v4231_v35 = vadd.f32 1.0, %v6411_v30 }
 0xa7a   :  { %v6413_v52 = vpop.eup %6412 }
 0xa7b   :  { %v6415_v7 = vpop.eup %6414  ;;  %v4233_v48 = vmul.f32 %v6413_v52, %v4229_v0  ;;  %6416 = vrcp.f32 %v4231_v35  ;;  %vm4238_vm10 = vweird.f32 %v6413_v52  ;;  %v4273_v41 = vand.u32 2147483648, %v4231_v35  ;;  %v4415_v0 = vld [vmem:[%s7357_s7 + $0x20] sm:$0xff] }
 0xa7c   :  { %v4248_v28 = vmul.f32 %v6415_v7, %v4230_v1  ;;  %6418 = vtanh.f32 %v4219_v46  ;;  %vm4253_vm11 = vweird.f32 %v6415_v7  ;;  %vm4239_vm14 = vmor %vm4237_vm12, %vm4238_vm10  ;;  %vm4267_vm3 = vweird.f32 %v4231_v35  ;;  %v4414_v1 = vld [vmem:[%s7357_s7 + $0x18] sm:$0xff] }
 0xa7d   :  { %v4234_v49 = vsub.f32 1.0, %v4233_v48  ;;  %vm4254_vm15 = vmor %vm4252_vm13, %vm4253_vm11  ;;  %v4271_v26 = vand.u32 2147483647, %v4231_v35  ;;  %v4274_v50 = vor.u32 1.1754944e-38, %v4273_v41 }
 0xa7e   :  { %v4249_v51 = vsub.f32 1.0, %v4248_v28  ;;  %v4411_v28 = vld [vmem:[%s7357_s7] sm:$0xff] }
 0xa7f   :  { %v4235_v34 = vmul.f32 %v6413_v52, %v4234_v49  ;;  %vm4272_vm5 = vcmp.eq.f32.partialorder %v4271_v26, 8.507059e+37 }
 0xa80   :  { %v4250_v44 = vmul.f32 %v6415_v7, %v4249_v51 }
 0xa81   :  { %v6417_v18 = vpop.eup %6416  ;;  %v4236_v31 = vadd.f32 %v6413_v52, %v4235_v34 }
 0xa82   :  { %v4263_v11 = vmul.f32 %v6417_v18, %v4231_v35  ;;  %v4251_v56 = vadd.f32 %v6415_v7, %v4250_v44  ;;  %v6419_v25 = vpop.eup %6418  ;;  %vm4268_vm2 = vweird.f32 %v6417_v18 }
 0xa83   :  { %v4240_v23 = vsel %vm4239_vm14, %v6413_v52, %v4236_v31  ;;  %vm4269_vm4 = vmor %vm4267_vm3, %vm4268_vm2  ;;  %vm4451_vm2 = vcmask 25600  }
 0xa84   :  { %v4264_v39 = vsub.f32 1.0, %v4263_v11  ;;  %v4245_v42 = vsel %vm4242_vm0, %v4244_v55, %v4240_v23  ;;  %v4255_v61 = vsel %vm4254_vm15, %v6415_v7, %v4251_v56  ;;  %v4412_v7 = vld [vmem:[%s7357_s7 + $0x8] sm:$0xff] }
 0xa85   :  { %v4260_v20 = vsel %vm4257_vm1, %v4259_v58, %v4255_v61  ;;  %v4279_v21 = vmul.f32 %v6419_v25, %v4245_v42 }
 0xa86   :  { %v4265_v62 = vmul.f32 %v6417_v18, %v4264_v39  ;;  %v4278_v5 = vmul.f32 %v4260_v20, %v7282_v15  ;;  %v4426_v15 = vld [vmem:[%s7357_s7 + $0x78] sm:$0xff] }
 0xa87   :  { %4431 = vmatpush.msra.mxu0 %v4426_v15 }
 0xa88   :  { %v7286_v36 = vadd.f32 %v4279_v21, %v4278_v5  ;;  %v4266_v33 = vadd.f32 %v6417_v18, %v4265_v62 }
 0xa89   :  { %4432 = vmatpush.msra.mxu0 %v4425_v6 }
 0xa8a   :  { %6420 = vtanh.f32 %v7286_v36  ;;  %v4270_v22 = vsel %vm4269_vm4, %v6417_v18, %v4266_v33  ;;  %v4286_v18 = vld [vmem:[#allocation2 + $0x98] sm:$0x3] }
 0xa8b   :  { %v4275_v60 = vsel %vm4272_vm5, %v4274_v50, %v4270_v22  ;;  %4433 = vmatpush.msra.mxu0 %v4424_v43 }
 0xa8d   :  { %4434 = vmatpush.msra.mxu0 %v4423_v13 }
 0xa8f   :  { %4435 = vmatpush.msra.mxu0 %v4422_v14 }
 0xa90   :  { %v6421_v53 = vpop.eup %6420 }
 0xa91   :  { %v4282_v9 = vmul.f32 %v6421_v53, %v4275_v60  ;;  %4436 = vmatpush.msra.mxu0 %v4421_v19 }
 0xa93   :  { %v4287_v29 = vpack.c.bf16 %v4282_v9, %v4282_v9  ;;  %4437 = vmatpush.msra.mxu0 %v4420_v45 }
 0xa95   :  { %4296 = vmatmul.bf16.vlgmr.msrb.gmra.mxu0 %v4287_v29  ;;  %4309 = vmatmul.bf16.vlgmr.msra.gmra.mxu1 %v4287_v29 }
 0xa96   :  { %4322 = vmatmul.bf16.vlgmr.msrb.gmra.mxu2 %v4287_v29  ;;  %4335 = vmatmul.bf16.vlgmr.msrb.gmra.mxu3 %v4287_v29 }
 0xa97   :  { %4438 = vmatpush.msra.mxu0 %v4419_v27 }
 0xa99   :  { %4439 = vmatpush.msra.mxu0 %v4418_v32 }
 0xa9b   :  { %4440 = vmatpush.msra.mxu0 %v4417_v3 }
 0xa9d   :  { %4441 = vmatpush.msra.mxu0 %v4416_v16 }
 0xa9f   :  { %4442 = vmatpush.msra.mxu0 %v4415_v0 }
 0xaa1   :  { %4443 = vmatpush.msra.mxu0 %v4414_v1 }
 0xaa3   :  { %4444 = vmatpush.msra.mxu0 %v4413_v2 }
 0xaa5   :  { %4445 = vmatpush.msra.mxu0 %v4412_v7 }
 0xaa7   :  { %4446 = vmatpush.msra.mxu0 %v4411_v28 }
 0xb12   :  { %v4297_v63 = vpop.f32.mrf.mxu0  ;;  %v4310_v59 = vpop.f32.mrf.mxu1 }
 0xb13   :  { %v4340_v4 = vadd.f32 %v4297_v63, %v4283_v37  ;;  %v4341_v54 = vadd.f32 %v4310_v59, %v4284_v57 }
 0xb15   :  { %v5846_v40 = vmul.f32 -1.442695, %v4340_v4  ;;  %v5847_v24 = vmul.f32 -1.442695, %v4341_v54 }
 0xb17   :  { %6422 = vpow2.f32 %v5846_v40 }
 0xb18   :  { %6424 = vpow2.f32 %v5847_v24 }
 0xb19   :  { %v4323_v30 = vpop.f32.mrf.mxu2  ;;  %v4336_v35 = vpop.f32.mrf.mxu3 }
 0xb1a   :  { %v4342_v47 = vadd.f32 %v4323_v30, %v4285_v17  ;;  %v4299_v52 = vpop.f32.mrf.mxu0  ;;  %v4312_v46 = vpop.f32.mrf.mxu1  ;;  %v4343_v11 = vadd.f32 %v4336_v35, %v4286_v18 }
 0xb1c   :  { %v5848_v48 = vmul.f32 -1.442695, %v4342_v47 }
 0xb1d   :  { %v6423_v49 = vpop.eup %6422 }
 0xb1e   :  { %v6425_v51 = vpop.eup %6424  ;;  %v4353_v10 = vadd.f32 1.0, %v6423_v49  ;;  %6426 = vpow2.f32 %v5848_v48 }
 0xb1f   :  { %v4354_v8 = vadd.f32 1.0, %v6425_v51 }
 0xb20   :  { %6428 = vrcp.f32 %v4353_v10  ;;  %v4367_v39 = vand.u32 2147483648, %v4353_v10  ;;  %v4365_v20 = vand.u32 2147483647, %v4353_v10  ;;  %vm4361_vm8 = vweird.f32 %v4353_v10 }
 0xb21   :  { %6430 = vrcp.f32 %v4354_v8  ;;  %v4325_v34 = vpop.f32.mrf.mxu2  ;;  %v4338_v38 = vpop.f32.mrf.mxu3  ;;  %v4382_v42 = vand.u32 2147483648, %v4354_v8  ;;  %v4380_v62 = vand.u32 2147483647, %v4354_v8  ;;  %vm4376_vm9 = vweird.f32 %v4354_v8 }
 0xb22   :  { %v4368_v26 = vor.u32 1.1754944e-38, %v4367_v39  ;;  %vm4366_vm12 = vcmp.eq.f32.partialorder %v4365_v20, 8.507059e+37 }
 0xb23   :  { %v4383_v50 = vor.u32 1.1754944e-38, %v4382_v42  ;;  %vm4381_vm13 = vcmp.eq.f32.partialorder %v4380_v62, 8.507059e+37 }
 0xb24   :  { %v6427_v44 = vpop.eup %6426 }
 0xb25   :  { %v4355_v12 = vadd.f32 1.0, %v6427_v44 }
 0xb26   :  { %v6429_v31 = vpop.eup %6428 }
 0xb27   :  { %v6431_v55 = vpop.eup %6430  ;;  %v4357_v56 = vmul.f32 %v6429_v31, %v4353_v10  ;;  %6432 = vrcp.f32 %v4355_v12  ;;  %vm4362_vm6 = vweird.f32 %v6429_v31  ;;  %v4397_v27 = vand.u32 2147483648, %v4355_v12 }
 0xb28   :  { %v4372_v58 = vmul.f32 %v6431_v55, %v4354_v8  ;;  %6434 = vtanh.f32 %v4343_v11  ;;  %vm4377_vm7 = vweird.f32 %v6431_v55  ;;  %vm4363_vm10 = vmor %vm4361_vm8, %vm4362_vm6  ;;  %vm4391_vm15 = vweird.f32 %v4355_v12 }
 0xb29   :  { %v4358_v23 = vsub.f32 1.0, %v4357_v56  ;;  %vm4378_vm11 = vmor %vm4376_vm9, %vm4377_vm7  ;;  %v4395_v32 = vand.u32 2147483647, %v4355_v12  ;;  %v4398_v63 = vor.u32 1.1754944e-38, %v4397_v27 }
 0xb2a   :  { %v4373_v25 = vsub.f32 1.0, %v4372_v58 }
 0xb2b   :  { %v4359_v61 = vmul.f32 %v6429_v31, %v4358_v23  ;;  %vm4396_vm1 = vcmp.eq.f32.partialorder %v4395_v32, 8.507059e+37 }
 0xb2c   :  { %v4374_v21 = vmul.f32 %v6431_v55, %v4373_v25 }
 0xb2d   :  { %v6433_v5 = vpop.eup %6432  ;;  %v4360_v33 = vadd.f32 %v6429_v31, %v4359_v61 }
 0xb2e   :  { %v4387_v41 = vmul.f32 %v6433_v5, %v4355_v12  ;;  %v4375_v22 = vadd.f32 %v6431_v55, %v4374_v21  ;;  %v6435_v60 = vpop.eup %6434  ;;  %vm4392_vm14 = vweird.f32 %v6433_v5 }
 0xb2f   :  { %v4364_v53 = vsel %vm4363_vm10, %v6429_v31, %v4360_v33  ;;  %vm4393_vm0 = vmor %vm4391_vm15, %vm4392_vm14 }
 0xb30   :  { %v4388_v9 = vsub.f32 1.0, %v4387_v41  ;;  %v4369_v29 = vsel %vm4366_vm12, %v4368_v26, %v4364_v53  ;;  %v4379_v15 = vsel %vm4378_vm11, %v6431_v55, %v4375_v22 }
 0xb31   :  { %v4384_v6 = vsel %vm4381_vm13, %v4383_v50, %v4379_v15  ;;  %v4403_v43 = vmul.f32 %v6435_v60, %v4369_v29 }
 0xb32   :  { %v4389_v13 = vmul.f32 %v6433_v5, %v4388_v9  ;;  %v4402_v14 = vmul.f32 %v4384_v6, %v7286_v36  ;;  %v6181_v36 = vld [vmem:[%s7358_s8] ss:$0 sm:$0xff] }
 0xb34   :  { %v4404_v19 = vadd.f32 %v4403_v43, %v4402_v14  ;;  %v4390_v45 = vadd.f32 %v6433_v5, %v4389_v13 }
 0xb36   :  { %6436 = vtanh.f32 %v4404_v19  ;;  %5850 = vst [vmem:[%s7361_s11 + $0x2] sm:$0x3] %v4404_v19  ;;  %v4394_v37 = vsel %vm4393_vm0, %v6433_v5, %v4390_v45  ;;  %s4458_s11 = sshll.u32 %s6520_s17, 4  ;;  %s4459_s11 = int_to_ptr.vmem [resolvable:$true] %s4458_s11 }
 0xb37   :  { %v4399_v59 = vsel %vm4396_vm1, %v4398_v63, %v4394_v37 }
 0xb3c   :  { %v6437_v57 = vpop.eup %6436 }
 0xb3d   :  { %v4406_v3 = vmul.f32 %v6437_v57, %v4399_v59 }
 0xb3f   :  { %5849 = vst [vmem:[%s7360_s10 + $0x2] sm:$0x3] %v4406_v3  ;;  %4447 = vmatmul.f32.vlgmr.msra.gmra.mxu0 %v4406_v3 }
 0xbbc   :  { %v4448_v4 = vpop.f32.mrf.mxu0 }
 0xbbd   :  { %v4449_v54 = vadd.f32 %v6181_v36, %v4448_v4 }
 0xbbf   :  { %4452 = vst.msk [vmem:[#allocation9] sm:$0x3] %vm4451_vm2, %v4449_v54 }
 0xbc0   :  { %4463 = dma.vmem_to_hbm [thread:$0]  %s4459_s11, 32, %s4461_s20, [#allocation6]  }
 0xbc1   :  { %6514 = dma.done.wait [#allocation6], 32  }
 0xbc2   :  { %6515 = vsyncadd [#allocation6], 4294967264 }
 0xbc3   :  { %4476 = vsyncpa [#allocation5], 1 }
 0xbc4   :  { %4477 = vsyncpa [#allocation8], 1 }
 0xbc5   :  { %4478 = vsyncpa [#allocation6], 1 }

</bundles_post_ra>
